<compile_context>
chip_gen: v5e
topology: v5e:2x2
jax: 0.10.0
libtpu: 0.0.40
codegen_flags: <defaults>
</compile_context>

<pallas_src>
import jax
import jax.numpy as jnp
from jax.experimental import pallas as pl
from jax.experimental.pallas import tpu as pltpu

# ----------------------------- static configuration -----------------------------
NUM_FEATURES = 16          # dataset.num_features
DIM = 32                   # args.dim
BLOCKS = 5
NUM_CLASSES = 8            # dataset.num_classes
NUM_GRAPHS = 4             # graphs per mini-batch
NODES_PER_GRAPH = 16
N = NUM_GRAPHS * NODES_PER_GRAPH            # 64 nodes per mini-batch
EDGES_PER_GRAPH = 48
NUM_BATCHES = 8            # independent mini-batches per kernel launch
STEPS = 2                  # grid steps: "parallel" -> both TCs on v7x; only 2 step overheads
BATCHES_PER_STEP = NUM_BATCHES // STEPS     # 4 mini-batches fused per step
BN = BATCHES_PER_STEP * N                   # 256 rows per step (matmul M dimension)
PG = BATCHES_PER_STEP * NUM_GRAPHS          # 16 graphs per step
BN_EPS = 1e-5

# eps of GINConv for block b == that block's in_channels (see PyTorch code).
EPS0 = float(NUM_FEATURES)     # block 0
EPS_REST = float(DIM)          # blocks 1..4


# ----------------------------------- kernel ------------------------------------
def net_kernel(a_ref, p_ref, x_ref, w1_ref, w2_ref, wc1_ref, wc2_ref, out_ref):
    # a_ref:   [BN, BN]  bf16  block-diagonal adjacency for the 4 fused mini-batches
    # p_ref:   [PG, BN]  bf16  sum-pool matrix (P[g, n] = 1 iff node n belongs to graph g)
    # x_ref:   [BN, DIM] bf16  node features (zero-padded from NUM_FEATURES to DIM)
    # w1_ref:  [BLOCKS, DIM, DIM]  first Linear of each block MLP (BN1 folded in)
    # w2_ref:  [BLOCKS, DIM, DIM]  second Linear of each block MLP (BN2 folded in)
    # wc1_ref: [BLOCKS, DIM, DIM]  classifier Linear 1 split per block (classifier BN folded in)
    # wc2_ref: [DIM, NUM_CLASSES]  classifier Linear 2
    a = a_ref[...]
    p = p_ref[...]
    x = x_ref[...]
    f_acc = jnp.zeros((PG, DIM), jnp.float32)     # classifier-input accumulator (replaces slab)

    for blk in range(BLOCKS):                     # static unroll
        eps = EPS0 if blk == 0 else EPS_REST
        # GIN aggregation: sum_j A[i,j] x_j  (MXU)  +  (1+eps) * x_i  (VPU)
        h = jnp.dot(a, x, preferred_element_type=jnp.float32)
        h = h + (1.0 + eps) * x.astype(jnp.float32)
        # MLP: Linear -> ReLU -> BN -> Linear -> ReLU -> BN  (zero biases, BN folded into W)
        h = jnp.dot(h.astype(jnp.bfloat16), w1_ref[blk],
                    preferred_element_type=jnp.float32)
        h = jnp.maximum(h, 0.0).astype(jnp.bfloat16)
        h = jnp.dot(h, w2_ref[blk], preferred_element_type=jnp.float32)
        x = jnp.maximum(h, 0.0).astype(jnp.bfloat16)
        # global_add_pool of this block, immediately folded through its slice of wc1
        pooled = jnp.dot(p, x, preferred_element_type=jnp.float32)              # [PG, DIM]
        f_acc = f_acc + jnp.dot(pooled.astype(jnp.bfloat16), wc1_ref[blk],
                                preferred_element_type=jnp.float32)

    # classifier: (BN folded into wc1) -> Linear -> ReLU -> Dropout(eval=identity) -> Linear
    h = jnp.maximum(f_acc, 0.0).astype(jnp.bfloat16)
    logits = jnp.dot(h, wc2_ref[...], preferred_element_type=jnp.float32)       # [PG, C]
    # log_softmax over the class axis
    m = jnp.max(logits, axis=-1, keepdims=True)
    lse = m + jnp.log(jnp.sum(jnp.exp(logits - m), axis=-1, keepdims=True))
    out_ref[...] = logits - lse


def net_forward(a_bd, p_step, x_steps, params):
    w1, w2, wc1, wc2 = params
    grid_spec = pltpu.PrefetchScalarGridSpec(
        num_scalar_prefetch=0,
        grid=(STEPS,),
        in_specs=[
            # per-step inputs (leading step dim squeezed out of the kernel view)
            pl.BlockSpec((None, BN, BN), lambda s: (s, 0, 0)),            # block-diagonal A
            # shared inputs: constant block index -> resident, no re-DMA per step
            pl.BlockSpec((PG, BN), lambda s: (0, 0)),                     # P
            pl.BlockSpec((None, BN, DIM), lambda s: (s, 0, 0)),           # x
            pl.BlockSpec((BLOCKS, DIM, DIM), lambda s: (0, 0, 0)),        # w1
            pl.BlockSpec((BLOCKS, DIM, DIM), lambda s: (0, 0, 0)),        # w2
            pl.BlockSpec((BLOCKS, DIM, DIM), lambda s: (0, 0, 0)),        # wc1 (split per block)
            pl.BlockSpec((DIM, NUM_CLASSES), lambda s: (0, 0)),           # wc2
        ],
        out_specs=pl.BlockSpec((None, PG, NUM_CLASSES), lambda s: (s, 0, 0)),
    )
    out = pl.pallas_call(
        net_kernel,
        out_shape=jax.ShapeDtypeStruct((STEPS, PG, NUM_CLASSES), jnp.float32),
        grid_spec=grid_spec,
        compiler_params=pltpu.CompilerParams(
            dimension_semantics=("parallel",)),   # independent steps -> both TCs on v7x
    )(a_bd, p_step, x_steps, w1, w2, wc1, wc2)
    # [STEPS, PG, C] -> [NUM_BATCHES, NUM_GRAPHS, C]
    return out.reshape(NUM_BATCHES, NUM_GRAPHS, NUM_CLASSES)


# ------------------------------ parameter setup (glue) ---------------------------
def xavier_uniform(key, fan_in, fan_out):
    bound = (6.0 / (fan_in + fan_out)) ** 0.5
    return jax.random.uniform(key, (fan_in, fan_out), jnp.float32, -bound, bound)


def make_params(key):
    keys = jax.random.split(key, 2 * BLOCKS + 2)
    # GIN block MLP weights (xavier-uniform; biases are 0 per the PyTorch init and omitted).
    w1_0 = xavier_uniform(keys[0], NUM_FEATURES, DIM)
    w1_0 = jnp.pad(w1_0, ((0, DIM - NUM_FEATURES), (0, 0)))        # zero-pad rows -> [DIM, DIM]
    w1 = jnp.stack([w1_0] + [xavier_uniform(keys[b], DIM, DIM)
                             for b in range(1, BLOCKS)], axis=0)   # [5, DIM, DIM]
    w2 = jnp.stack([xavier_uniform(keys[BLOCKS + b], DIM, DIM)
                    for b in range(BLOCKS)], axis=0)               # [5, DIM, DIM]
    # BatchNorm1d fold (eval mode, running_mean=0, running_var=1, gamma=1, beta=0):
    # BN(z) = z * s with s = 1/sqrt(1+eps) > 0 and zero shift, and relu(z) * s == relu(z * s),
    # so each BN folds into the output columns of the preceding Linear. (Only valid for these
    # identity-like BN stats: a nonzero shift would NOT commute with the ReLU.)
    s_bn = 1.0 / jnp.sqrt(1.0 + BN_EPS)
    w1 = w1 * s_bn
    w2 = w2 * s_bn
    # Classifier: BN(blocks*dim) -> Linear(blocks*dim, dim) -> ReLU -> Dropout -> Linear(dim, C)
    wc1 = xavier_uniform(keys[2 * BLOCKS], BLOCKS * DIM, DIM)
    wc1 = wc1 * s_bn                                               # classifier-input BN fold
    wc1 = wc1.reshape(BLOCKS, DIM, DIM)                            # split per source block
    wc2 = xavier_uniform(keys[2 * BLOCKS + 1], DIM, NUM_CLASSES)
    return (w1.astype(jnp.bfloat16), w2.astype(jnp.bfloat16),
            wc1.astype(jnp.bfloat16), wc2.astype(jnp.bfloat16))


def make_inputs(key):
    k_x, k_src, k_dst = jax.random.split(key, 3)
    x = jax.random.normal(k_x, (NUM_BATCHES, N, NUM_FEATURES), jnp.float32)
    # Random edges within each graph of each mini-batch; dense adjacency A[b, dst, src].
    src_l = jax.random.randint(k_src, (NUM_BATCHES, NUM_GRAPHS, EDGES_PER_GRAPH),
                               0, NODES_PER_GRAPH)
    dst_l = jax.random.randint(k_dst, (NUM_BATCHES, NUM_GRAPHS, EDGES_PER_GRAPH),
                               0, NODES_PER_GRAPH)
    offsets = jnp.arange(NUM_GRAPHS)[None, :, None] * NODES_PER_GRAPH
    src = (src_l + offsets).reshape(NUM_BATCHES, -1)
    dst = (dst_l + offsets).reshape(NUM_BATCHES, -1)
    b_idx = jnp.broadcast_to(jnp.arange(NUM_BATCHES)[:, None], src.shape)
    a = jnp.zeros((NUM_BATCHES, N, N), jnp.float32).at[b_idx, dst, src].add(1.0)
    # Zero-pad features to DIM channels so every block uses the same [DIM, DIM] weight shape.
    x_pad = jnp.pad(x, ((0, 0), (0, 0), (0, DIM - NUM_FEATURES)))
    return a, x_pad


def pack_step_inputs(a, x_pad):
    # Block-diagonal adjacency per step: [STEPS, BN, BN] (edge counts are exact in bf16).
    a_r = a.reshape(STEPS, BATCHES_PER_STEP, N, N)
    eye_b = jnp.eye(BATCHES_PER_STEP, dtype=a.dtype)
    a_bd = a_r[:, :, None, :, :] * eye_b[None, :, :, None, None]   # [S, Bp, Bp, N, N]
    a_bd = a_bd.transpose(0, 1, 3, 2, 4).reshape(STEPS, BN, BN)
    # Node features per step: batches fused along the row (M) dimension.
    x_steps = x_pad.reshape(STEPS, BN, DIM)
    # Sum-pooling matrix for the fused step: graph g covers nodes [g*16, (g+1)*16).
    batch_vec = jnp.repeat(jnp.arange(PG), NODES_PER_GRAPH)
    p_step = (batch_vec[None, :] == jnp.arange(PG)[:, None]).astype(jnp.float32)
    return (a_bd.astype(jnp.bfloat16), p_step.astype(jnp.bfloat16),
            x_steps.astype(jnp.bfloat16))


# --------------------------- pure-JAX reference (same math) ----------------------
def reference_forward(a, x_pad, params):
    w1, w2, wc1, wc2 = params
    x_bf = x_pad.astype(jnp.bfloat16)
    batch_vec = jnp.repeat(jnp.arange(NUM_GRAPHS), NODES_PER_GRAPH)
    p = (batch_vec[None, :] == jnp.arange(NUM_GRAPHS)[:, None]).astype(jnp.bfloat16)
    outs = []
    for b in range(NUM_BATCHES):
        ab = a[b].astype(jnp.bfloat16)
        xb = x_bf[b]
        f_acc = jnp.zeros((NUM_GRAPHS, DIM), jnp.float32)
        for blk in range(BLOCKS):
            eps = EPS0 if blk == 0 else EPS_REST
            h = jnp.dot(ab, xb, preferred_element_type=jnp.float32)
            h = h + (1.0 + eps) * xb.astype(jnp.float32)
            h = jnp.dot(h.astype(jnp.bfloat16), w1[blk], preferred_element_type=jnp.float32)
            h = jnp.maximum(h, 0.0).astype(jnp.bfloat16)
            h = jnp.dot(h, w2[blk], preferred_element_type=jnp.float32)
            xb = jnp.maximum(h, 0.0).astype(jnp.bfloat16)
            pooled = jnp.dot(p, xb, preferred_element_type=jnp.float32)
            f_acc = f_acc + jnp.dot(pooled.astype(jnp.bfloat16), wc1[blk],
                                    preferred_element_type=jnp.float32)
        h = jnp.maximum(f_acc, 0.0).astype(jnp.bfloat16)
        logits = jnp.dot(h, wc2, preferred_element_type=jnp.float32)
        outs.append(jax.nn.log_softmax(logits, axis=-1))
    return jnp.stack(outs, axis=0)


# ------------------------------------- main --------------------------------------
if __name__ == "__main__":
    key = jax.random.PRNGKey(0)
    k_in, k_par = jax.random.split(key)
    a, x_pad = make_inputs(k_in)
    params = make_params(k_par)
    a_bd, p_step, x_steps = pack_step_inputs(a, x_pad)

    out = net_forward(a_bd, p_step, x_steps, params)
    out = jax.block_until_ready(out)

    assert out.shape == (NUM_BATCHES, NUM_GRAPHS, NUM_CLASSES)
    assert bool(jnp.all(jnp.isfinite(out)))
    # log_softmax rows must exponentiate to probability distributions
    row_sums = jnp.sum(jnp.exp(out), axis=-1)
    assert bool(jnp.all(jnp.abs(row_sums - 1.0) < 1e-3))
    # compare against the pure-JAX reference (same dtypes / casts)
    ref = reference_forward(a, x_pad, params)
    assert bool(jnp.all(jnp.abs(out - ref) < 2e-2))
    print("KERNEL_OK")
</pallas_src>

<mosaic_0001>
module attributes {stable_mosaic.version = 11 : i64} {
  func.func @net_kernel(%arg0: i32, %arg1: memref<1x256x256xbf16, #tpu.memory_space<vmem>>, %arg2: memref<16x256xbf16, #tpu.memory_space<vmem>>, %arg3: memref<1x256x32xbf16, #tpu.memory_space<vmem>>, %arg4: memref<5x32x32xbf16, #tpu.memory_space<vmem>>, %arg5: memref<5x32x32xbf16, #tpu.memory_space<vmem>>, %arg6: memref<5x32x32xbf16, #tpu.memory_space<vmem>>, %arg7: memref<32x8xbf16, #tpu.memory_space<vmem>>, %arg8: memref<1x16x8xf32, #tpu.memory_space<vmem>>) attributes {dimension_semantics = [#tpu.dimension_semantics<parallel>], iteration_bounds = array<i64: 2>, scalar_prefetch = 0 : i64, scratch_operands = 0 : i64, tpu.core_type = #tpu.core_type<tc>, window_params = [{transform_indices = @transform_0, window_bounds = array<i64: 1, 256, 256>}, {pipeline_mode = #tpu.pipeline_mode<synchronous>, transform_indices = @transform_1, window_bounds = array<i64: 16, 256>}, {transform_indices = @transform_2, window_bounds = array<i64: 1, 256, 32>}, {pipeline_mode = #tpu.pipeline_mode<synchronous>, transform_indices = @transform_3, window_bounds = array<i64: 5, 32, 32>}, {pipeline_mode = #tpu.pipeline_mode<synchronous>, transform_indices = @transform_4, window_bounds = array<i64: 5, 32, 32>}, {pipeline_mode = #tpu.pipeline_mode<synchronous>, transform_indices = @transform_5, window_bounds = array<i64: 5, 32, 32>}, {pipeline_mode = #tpu.pipeline_mode<synchronous>, transform_indices = @transform_6, window_bounds = array<i64: 32, 8>}, {transform_indices = @transform_7, window_bounds = array<i64: 1, 16, 8>}]} {
    %c0 = arith.constant 0 : index
    %c0_0 = arith.constant 0 : index
    %c0_1 = arith.constant 0 : index
    %0 = vector.load %arg1[%c0, %c0_0, %c0_1] : memref<1x256x256xbf16, #tpu.memory_space<vmem>>, vector<1x256x256xbf16>
    %1 = vector.shape_cast %0 : vector<1x256x256xbf16> to vector<256x256xbf16>
    %c0_2 = arith.constant 0 : index
    %c0_3 = arith.constant 0 : index
    %2 = vector.load %arg2[%c0_2, %c0_3] : memref<16x256xbf16, #tpu.memory_space<vmem>>, vector<16x256xbf16>
    %c0_4 = arith.constant 0 : index
    %c0_5 = arith.constant 0 : index
    %c0_6 = arith.constant 0 : index
    %3 = vector.load %arg3[%c0_4, %c0_5, %c0_6] : memref<1x256x32xbf16, #tpu.memory_space<vmem>>, vector<1x256x32xbf16>
    %4 = vector.shape_cast %3 : vector<1x256x32xbf16> to vector<256x32xbf16>
    %cst = arith.constant 0.000000e+00 : f32
    %5 = vector.broadcast %cst : f32 to vector<16x32xf32>
    %cst_7 = arith.constant dense<0.000000e+00> : vector<256x32xf32>
    %6 = tpu.matmul %1, %4, %cst_7 {dimension_numbers = #tpu.dot_dimension_numbers<[1], [0], [0], [1], [0, 0, 1, 1], [], []>} : vector<256x256xbf16>, vector<256x32xbf16>, vector<256x32xf32> -> vector<256x32xf32>
    %7 = arith.extf %4 : vector<256x32xbf16> to vector<256x32xf32>
    %cst_8 = arith.constant 1.700000e+01 : f32
    %8 = vector.broadcast %cst_8 : f32 to vector<256x32xf32>
    %9 = arith.mulf %8, %7 : vector<256x32xf32>
    %10 = arith.addf %6, %9 : vector<256x32xf32>
    %11 = arith.truncf %10 : vector<256x32xf32> to vector<256x32xbf16>
    %c0_9 = arith.constant 0 : index
    %c0_10 = arith.constant 0 : index
    %c0_11 = arith.constant 0 : index
    %12 = vector.load %arg4[%c0_9, %c0_10, %c0_11] : memref<5x32x32xbf16, #tpu.memory_space<vmem>>, vector<1x32x32xbf16>
    %13 = vector.shape_cast %12 : vector<1x32x32xbf16> to vector<32x32xbf16>
    %cst_12 = arith.constant dense<0.000000e+00> : vector<256x32xf32>
    %14 = tpu.matmul %11, %13, %cst_12 {dimension_numbers = #tpu.dot_dimension_numbers<[1], [0], [0], [1], [0, 0, 1, 1], [], []>} : vector<256x32xbf16>, vector<32x32xbf16>, vector<256x32xf32> -> vector<256x32xf32>
    %cst_13 = arith.constant 0.000000e+00 : f32
    %15 = vector.broadcast %cst_13 : f32 to vector<256x32xf32>
    %16 = arith.maximumf %14, %15 : vector<256x32xf32>
    %17 = arith.truncf %16 : vector<256x32xf32> to vector<256x32xbf16>
    %c0_14 = arith.constant 0 : index
    %c0_15 = arith.constant 0 : index
    %c0_16 = arith.constant 0 : index
    %18 = vector.load %arg5[%c0_14, %c0_15, %c0_16] : memref<5x32x32xbf16, #tpu.memory_space<vmem>>, vector<1x32x32xbf16>
    %19 = vector.shape_cast %18 : vector<1x32x32xbf16> to vector<32x32xbf16>
    %cst_17 = arith.constant dense<0.000000e+00> : vector<256x32xf32>
    %20 = tpu.matmul %17, %19, %cst_17 {dimension_numbers = #tpu.dot_dimension_numbers<[1], [0], [0], [1], [0, 0, 1, 1], [], []>} : vector<256x32xbf16>, vector<32x32xbf16>, vector<256x32xf32> -> vector<256x32xf32>
    %cst_18 = arith.constant 0.000000e+00 : f32
    %21 = vector.broadcast %cst_18 : f32 to vector<256x32xf32>
    %22 = arith.maximumf %20, %21 : vector<256x32xf32>
    %23 = arith.truncf %22 : vector<256x32xf32> to vector<256x32xbf16>
    %cst_19 = arith.constant dense<0.000000e+00> : vector<16x32xf32>
    %24 = tpu.matmul %2, %23, %cst_19 {dimension_numbers = #tpu.dot_dimension_numbers<[1], [0], [0], [1], [0, 0, 1, 1], [], []>} : vector<16x256xbf16>, vector<256x32xbf16>, vector<16x32xf32> -> vector<16x32xf32>
    %25 = arith.truncf %24 : vector<16x32xf32> to vector<16x32xbf16>
    %c0_20 = arith.constant 0 : index
    %c0_21 = arith.constant 0 : index
    %c0_22 = arith.constant 0 : index
    %26 = vector.load %arg6[%c0_20, %c0_21, %c0_22] : memref<5x32x32xbf16, #tpu.memory_space<vmem>>, vector<1x32x32xbf16>
    %27 = vector.shape_cast %26 : vector<1x32x32xbf16> to vector<32x32xbf16>
    %cst_23 = arith.constant dense<0.000000e+00> : vector<16x32xf32>
    %28 = tpu.matmul %25, %27, %cst_23 {dimension_numbers = #tpu.dot_dimension_numbers<[1], [0], [0], [1], [0, 0, 1, 1], [], []>} : vector<16x32xbf16>, vector<32x32xbf16>, vector<16x32xf32> -> vector<16x32xf32>
    %29 = arith.addf %5, %28 : vector<16x32xf32>
    %cst_24 = arith.constant dense<0.000000e+00> : vector<256x32xf32>
    %30 = tpu.matmul %1, %23, %cst_24 {dimension_numbers = #tpu.dot_dimension_numbers<[1], [0], [0], [1], [0, 0, 1, 1], [], []>} : vector<256x256xbf16>, vector<256x32xbf16>, vector<256x32xf32> -> vector<256x32xf32>
    %31 = arith.extf %23 : vector<256x32xbf16> to vector<256x32xf32>
    %cst_25 = arith.constant 3.300000e+01 : f32
    %32 = vector.broadcast %cst_25 : f32 to vector<256x32xf32>
    %33 = arith.mulf %32, %31 : vector<256x32xf32>
    %34 = arith.addf %30, %33 : vector<256x32xf32>
    %35 = arith.truncf %34 : vector<256x32xf32> to vector<256x32xbf16>
    %c1 = arith.constant 1 : index
    %c0_26 = arith.constant 0 : index
    %c0_27 = arith.constant 0 : index
    %36 = vector.load %arg4[%c1, %c0_26, %c0_27] : memref<5x32x32xbf16, #tpu.memory_space<vmem>>, vector<1x32x32xbf16>
    %37 = vector.shape_cast %36 : vector<1x32x32xbf16> to vector<32x32xbf16>
    %cst_28 = arith.constant dense<0.000000e+00> : vector<256x32xf32>
    %38 = tpu.matmul %35, %37, %cst_28 {dimension_numbers = #tpu.dot_dimension_numbers<[1], [0], [0], [1], [0, 0, 1, 1], [], []>} : vector<256x32xbf16>, vector<32x32xbf16>, vector<256x32xf32> -> vector<256x32xf32>
    %cst_29 = arith.constant 0.000000e+00 : f32
    %39 = vector.broadcast %cst_29 : f32 to vector<256x32xf32>
    %40 = arith.maximumf %38, %39 : vector<256x32xf32>
    %41 = arith.truncf %40 : vector<256x32xf32> to vector<256x32xbf16>
    %c1_30 = arith.constant 1 : index
    %c0_31 = arith.constant 0 : index
    %c0_32 = arith.constant 0 : index
    %42 = vector.load %arg5[%c1_30, %c0_31, %c0_32] : memref<5x32x32xbf16, #tpu.memory_space<vmem>>, vector<1x32x32xbf16>
    %43 = vector.shape_cast %42 : vector<1x32x32xbf16> to vector<32x32xbf16>
    %cst_33 = arith.constant dense<0.000000e+00> : vector<256x32xf32>
    %44 = tpu.matmul %41, %43, %cst_33 {dimension_numbers = #tpu.dot_dimension_numbers<[1], [0], [0], [1], [0, 0, 1, 1], [], []>} : vector<256x32xbf16>, vector<32x32xbf16>, vector<256x32xf32> -> vector<256x32xf32>
    %cst_34 = arith.constant 0.000000e+00 : f32
    %45 = vector.broadcast %cst_34 : f32 to vector<256x32xf32>
    %46 = arith.maximumf %44, %45 : vector<256x32xf32>
    %47 = arith.truncf %46 : vector<256x32xf32> to vector<256x32xbf16>
    %cst_35 = arith.constant dense<0.000000e+00> : vector<16x32xf32>
    %48 = tpu.matmul %2, %47, %cst_35 {dimension_numbers = #tpu.dot_dimension_numbers<[1], [0], [0], [1], [0, 0, 1, 1], [], []>} : vector<16x256xbf16>, vector<256x32xbf16>, vector<16x32xf32> -> vector<16x32xf32>
    %49 = arith.truncf %48 : vector<16x32xf32> to vector<16x32xbf16>
    %c1_36 = arith.constant 1 : index
    %c0_37 = arith.constant 0 : index
    %c0_38 = arith.constant 0 : index
    %50 = vector.load %arg6[%c1_36, %c0_37, %c0_38] : memref<5x32x32xbf16, #tpu.memory_space<vmem>>, vector<1x32x32xbf16>
    %51 = vector.shape_cast %50 : vector<1x32x32xbf16> to vector<32x32xbf16>
    %cst_39 = arith.constant dense<0.000000e+00> : vector<16x32xf32>
    %52 = tpu.matmul %49, %51, %cst_39 {dimension_numbers = #tpu.dot_dimension_numbers<[1], [0], [0], [1], [0, 0, 1, 1], [], []>} : vector<16x32xbf16>, vector<32x32xbf16>, vector<16x32xf32> -> vector<16x32xf32>
    %53 = arith.addf %29, %52 : vector<16x32xf32>
    %cst_40 = arith.constant dense<0.000000e+00> : vector<256x32xf32>
    %54 = tpu.matmul %1, %47, %cst_40 {dimension_numbers = #tpu.dot_dimension_numbers<[1], [0], [0], [1], [0, 0, 1, 1], [], []>} : vector<256x256xbf16>, vector<256x32xbf16>, vector<256x32xf32> -> vector<256x32xf32>
    %55 = arith.extf %47 : vector<256x32xbf16> to vector<256x32xf32>
    %cst_41 = arith.constant 3.300000e+01 : f32
    %56 = vector.broadcast %cst_41 : f32 to vector<256x32xf32>
    %57 = arith.mulf %56, %55 : vector<256x32xf32>
    %58 = arith.addf %54, %57 : vector<256x32xf32>
    %59 = arith.truncf %58 : vector<256x32xf32> to vector<256x32xbf16>
    %c2 = arith.constant 2 : index
    %c0_42 = arith.constant 0 : index
    %c0_43 = arith.constant 0 : index
    %60 = vector.load %arg4[%c2, %c0_42, %c0_43] : memref<5x32x32xbf16, #tpu.memory_space<vmem>>, vector<1x32x32xbf16>
    %61 = vector.shape_cast %60 : vector<1x32x32xbf16> to vector<32x32xbf16>
    %cst_44 = arith.constant dense<0.000000e+00> : vector<256x32xf32>
    %62 = tpu.matmul %59, %61, %cst_44 {dimension_numbers = #tpu.dot_dimension_numbers<[1], [0], [0], [1], [0, 0, 1, 1], [], []>} : vector<256x32xbf16>, vector<32x32xbf16>, vector<256x32xf32> -> vector<256x32xf32>
    %cst_45 = arith.constant 0.000000e+00 : f32
    %63 = vector.broadcast %cst_45 : f32 to vector<256x32xf32>
    %64 = arith.maximumf %62, %63 : vector<256x32xf32>
    %65 = arith.truncf %64 : vector<256x32xf32> to vector<256x32xbf16>
    %c2_46 = arith.constant 2 : index
    %c0_47 = arith.constant 0 : index
    %c0_48 = arith.constant 0 : index
    %66 = vector.load %arg5[%c2_46, %c0_47, %c0_48] : memref<5x32x32xbf16, #tpu.memory_space<vmem>>, vector<1x32x32xbf16>
    %67 = vector.shape_cast %66 : vector<1x32x32xbf16> to vector<32x32xbf16>
    %cst_49 = arith.constant dense<0.000000e+00> : vector<256x32xf32>
    %68 = tpu.matmul %65, %67, %cst_49 {dimension_numbers = #tpu.dot_dimension_numbers<[1], [0], [0], [1], [0, 0, 1, 1], [], []>} : vector<256x32xbf16>, vector<32x32xbf16>, vector<256x32xf32> -> vector<256x32xf32>
    %cst_50 = arith.constant 0.000000e+00 : f32
    %69 = vector.broadcast %cst_50 : f32 to vector<256x32xf32>
    %70 = arith.maximumf %68, %69 : vector<256x32xf32>
    %71 = arith.truncf %70 : vector<256x32xf32> to vector<256x32xbf16>
    %cst_51 = arith.constant dense<0.000000e+00> : vector<16x32xf32>
    %72 = tpu.matmul %2, %71, %cst_51 {dimension_numbers = #tpu.dot_dimension_numbers<[1], [0], [0], [1], [0, 0, 1, 1], [], []>} : vector<16x256xbf16>, vector<256x32xbf16>, vector<16x32xf32> -> vector<16x32xf32>
    %73 = arith.truncf %72 : vector<16x32xf32> to vector<16x32xbf16>
    %c2_52 = arith.constant 2 : index
    %c0_53 = arith.constant 0 : index
    %c0_54 = arith.constant 0 : index
    %74 = vector.load %arg6[%c2_52, %c0_53, %c0_54] : memref<5x32x32xbf16, #tpu.memory_space<vmem>>, vector<1x32x32xbf16>
    %75 = vector.shape_cast %74 : vector<1x32x32xbf16> to vector<32x32xbf16>
    %cst_55 = arith.constant dense<0.000000e+00> : vector<16x32xf32>
    %76 = tpu.matmul %73, %75, %cst_55 {dimension_numbers = #tpu.dot_dimension_numbers<[1], [0], [0], [1], [0, 0, 1, 1], [], []>} : vector<16x32xbf16>, vector<32x32xbf16>, vector<16x32xf32> -> vector<16x32xf32>
    %77 = arith.addf %53, %76 : vector<16x32xf32>
    %cst_56 = arith.constant dense<0.000000e+00> : vector<256x32xf32>
    %78 = tpu.matmul %1, %71, %cst_56 {dimension_numbers = #tpu.dot_dimension_numbers<[1], [0], [0], [1], [0, 0, 1, 1], [], []>} : vector<256x256xbf16>, vector<256x32xbf16>, vector<256x32xf32> -> vector<256x32xf32>
    %79 = arith.extf %71 : vector<256x32xbf16> to vector<256x32xf32>
    %cst_57 = arith.constant 3.300000e+01 : f32
    %80 = vector.broadcast %cst_57 : f32 to vector<256x32xf32>
    %81 = arith.mulf %80, %79 : vector<256x32xf32>
    %82 = arith.addf %78, %81 : vector<256x32xf32>
    %83 = arith.truncf %82 : vector<256x32xf32> to vector<256x32xbf16>
    %c3 = arith.constant 3 : index
    %c0_58 = arith.constant 0 : index
    %c0_59 = arith.constant 0 : index
    %84 = vector.load %arg4[%c3, %c0_58, %c0_59] : memref<5x32x32xbf16, #tpu.memory_space<vmem>>, vector<1x32x32xbf16>
    %85 = vector.shape_cast %84 : vector<1x32x32xbf16> to vector<32x32xbf16>
    %cst_60 = arith.constant dense<0.000000e+00> : vector<256x32xf32>
    %86 = tpu.matmul %83, %85, %cst_60 {dimension_numbers = #tpu.dot_dimension_numbers<[1], [0], [0], [1], [0, 0, 1, 1], [], []>} : vector<256x32xbf16>, vector<32x32xbf16>, vector<256x32xf32> -> vector<256x32xf32>
    %cst_61 = arith.constant 0.000000e+00 : f32
    %87 = vector.broadcast %cst_61 : f32 to vector<256x32xf32>
    %88 = arith.maximumf %86, %87 : vector<256x32xf32>
    %89 = arith.truncf %88 : vector<256x32xf32> to vector<256x32xbf16>
    %c3_62 = arith.constant 3 : index
    %c0_63 = arith.constant 0 : index
    %c0_64 = arith.constant 0 : index
    %90 = vector.load %arg5[%c3_62, %c0_63, %c0_64] : memref<5x32x32xbf16, #tpu.memory_space<vmem>>, vector<1x32x32xbf16>
    %91 = vector.shape_cast %90 : vector<1x32x32xbf16> to vector<32x32xbf16>
    %cst_65 = arith.constant dense<0.000000e+00> : vector<256x32xf32>
    %92 = tpu.matmul %89, %91, %cst_65 {dimension_numbers = #tpu.dot_dimension_numbers<[1], [0], [0], [1], [0, 0, 1, 1], [], []>} : vector<256x32xbf16>, vector<32x32xbf16>, vector<256x32xf32> -> vector<256x32xf32>
    %cst_66 = arith.constant 0.000000e+00 : f32
    %93 = vector.broadcast %cst_66 : f32 to vector<256x32xf32>
    %94 = arith.maximumf %92, %93 : vector<256x32xf32>
    %95 = arith.truncf %94 : vector<256x32xf32> to vector<256x32xbf16>
    %cst_67 = arith.constant dense<0.000000e+00> : vector<16x32xf32>
    %96 = tpu.matmul %2, %95, %cst_67 {dimension_numbers = #tpu.dot_dimension_numbers<[1], [0], [0], [1], [0, 0, 1, 1], [], []>} : vector<16x256xbf16>, vector<256x32xbf16>, vector<16x32xf32> -> vector<16x32xf32>
    %97 = arith.truncf %96 : vector<16x32xf32> to vector<16x32xbf16>
    %c3_68 = arith.constant 3 : index
    %c0_69 = arith.constant 0 : index
    %c0_70 = arith.constant 0 : index
    %98 = vector.load %arg6[%c3_68, %c0_69, %c0_70] : memref<5x32x32xbf16, #tpu.memory_space<vmem>>, vector<1x32x32xbf16>
    %99 = vector.shape_cast %98 : vector<1x32x32xbf16> to vector<32x32xbf16>
    %cst_71 = arith.constant dense<0.000000e+00> : vector<16x32xf32>
    %100 = tpu.matmul %97, %99, %cst_71 {dimension_numbers = #tpu.dot_dimension_numbers<[1], [0], [0], [1], [0, 0, 1, 1], [], []>} : vector<16x32xbf16>, vector<32x32xbf16>, vector<16x32xf32> -> vector<16x32xf32>
    %101 = arith.addf %77, %100 : vector<16x32xf32>
    %cst_72 = arith.constant dense<0.000000e+00> : vector<256x32xf32>
    %102 = tpu.matmul %1, %95, %cst_72 {dimension_numbers = #tpu.dot_dimension_numbers<[1], [0], [0], [1], [0, 0, 1, 1], [], []>} : vector<256x256xbf16>, vector<256x32xbf16>, vector<256x32xf32> -> vector<256x32xf32>
    %103 = arith.extf %95 : vector<256x32xbf16> to vector<256x32xf32>
    %cst_73 = arith.constant 3.300000e+01 : f32
    %104 = vector.broadcast %cst_73 : f32 to vector<256x32xf32>
    %105 = arith.mulf %104, %103 : vector<256x32xf32>
    %106 = arith.addf %102, %105 : vector<256x32xf32>
    %107 = arith.truncf %106 : vector<256x32xf32> to vector<256x32xbf16>
    %c4 = arith.constant 4 : index
    %c0_74 = arith.constant 0 : index
    %c0_75 = arith.constant 0 : index
    %108 = vector.load %arg4[%c4, %c0_74, %c0_75] : memref<5x32x32xbf16, #tpu.memory_space<vmem>>, vector<1x32x32xbf16>
    %109 = vector.shape_cast %108 : vector<1x32x32xbf16> to vector<32x32xbf16>
    %cst_76 = arith.constant dense<0.000000e+00> : vector<256x32xf32>
    %110 = tpu.matmul %107, %109, %cst_76 {dimension_numbers = #tpu.dot_dimension_numbers<[1], [0], [0], [1], [0, 0, 1, 1], [], []>} : vector<256x32xbf16>, vector<32x32xbf16>, vector<256x32xf32> -> vector<256x32xf32>
    %cst_77 = arith.constant 0.000000e+00 : f32
    %111 = vector.broadcast %cst_77 : f32 to vector<256x32xf32>
    %112 = arith.maximumf %110, %111 : vector<256x32xf32>
    %113 = arith.truncf %112 : vector<256x32xf32> to vector<256x32xbf16>
    %c4_78 = arith.constant 4 : index
    %c0_79 = arith.constant 0 : index
    %c0_80 = arith.constant 0 : index
    %114 = vector.load %arg5[%c4_78, %c0_79, %c0_80] : memref<5x32x32xbf16, #tpu.memory_space<vmem>>, vector<1x32x32xbf16>
    %115 = vector.shape_cast %114 : vector<1x32x32xbf16> to vector<32x32xbf16>
    %cst_81 = arith.constant dense<0.000000e+00> : vector<256x32xf32>
    %116 = tpu.matmul %113, %115, %cst_81 {dimension_numbers = #tpu.dot_dimension_numbers<[1], [0], [0], [1], [0, 0, 1, 1], [], []>} : vector<256x32xbf16>, vector<32x32xbf16>, vector<256x32xf32> -> vector<256x32xf32>
    %cst_82 = arith.constant 0.000000e+00 : f32
    %117 = vector.broadcast %cst_82 : f32 to vector<256x32xf32>
    %118 = arith.maximumf %116, %117 : vector<256x32xf32>
    %119 = arith.truncf %118 : vector<256x32xf32> to vector<256x32xbf16>
    %cst_83 = arith.constant dense<0.000000e+00> : vector<16x32xf32>
    %120 = tpu.matmul %2, %119, %cst_83 {dimension_numbers = #tpu.dot_dimension_numbers<[1], [0], [0], [1], [0, 0, 1, 1], [], []>} : vector<16x256xbf16>, vector<256x32xbf16>, vector<16x32xf32> -> vector<16x32xf32>
    %121 = arith.truncf %120 : vector<16x32xf32> to vector<16x32xbf16>
    %c4_84 = arith.constant 4 : index
    %c0_85 = arith.constant 0 : index
    %c0_86 = arith.constant 0 : index
    %122 = vector.load %arg6[%c4_84, %c0_85, %c0_86] : memref<5x32x32xbf16, #tpu.memory_space<vmem>>, vector<1x32x32xbf16>
    %123 = vector.shape_cast %122 : vector<1x32x32xbf16> to vector<32x32xbf16>
    %cst_87 = arith.constant dense<0.000000e+00> : vector<16x32xf32>
    %124 = tpu.matmul %121, %123, %cst_87 {dimension_numbers = #tpu.dot_dimension_numbers<[1], [0], [0], [1], [0, 0, 1, 1], [], []>} : vector<16x32xbf16>, vector<32x32xbf16>, vector<16x32xf32> -> vector<16x32xf32>
    %125 = arith.addf %101, %124 : vector<16x32xf32>
    %cst_88 = arith.constant 0.000000e+00 : f32
    %126 = vector.broadcast %cst_88 : f32 to vector<16x32xf32>
    %127 = arith.maximumf %125, %126 : vector<16x32xf32>
    %128 = arith.truncf %127 : vector<16x32xf32> to vector<16x32xbf16>
    %c0_89 = arith.constant 0 : index
    %c0_90 = arith.constant 0 : index
    %129 = vector.load %arg7[%c0_89, %c0_90] : memref<32x8xbf16, #tpu.memory_space<vmem>>, vector<32x8xbf16>
    %cst_91 = arith.constant dense<0.000000e+00> : vector<16x8xf32>
    %130 = tpu.matmul %128, %129, %cst_91 {dimension_numbers = #tpu.dot_dimension_numbers<[1], [0], [0], [1], [0, 0, 1, 1], [], []>} : vector<16x32xbf16>, vector<32x8xbf16>, vector<16x8xf32> -> vector<16x8xf32>
    %cst_92 = arith.constant dense<0xFF800000> : vector<16xf32>
    %131 = vector.multi_reduction <maximumf>, %130, %cst_92 [1] : vector<16x8xf32> to vector<16xf32>
    %132 = vector.shape_cast %131 : vector<16xf32> to vector<16x1xf32>
    %133 = vector.broadcast %132 : vector<16x1xf32> to vector<16x8xf32>
    %134 = arith.subf %130, %133 : vector<16x8xf32>
    %135 = math.exp %134 : vector<16x8xf32>
    %cst_93 = arith.constant dense<0.000000e+00> : vector<16xf32>
    %136 = vector.multi_reduction <add>, %135, %cst_93 [1] : vector<16x8xf32> to vector<16xf32>
    %137 = vector.shape_cast %136 : vector<16xf32> to vector<16x1xf32>
    %138 = math.log %137 : vector<16x1xf32>
    %139 = arith.addf %132, %138 : vector<16x1xf32>
    %140 = vector.broadcast %139 : vector<16x1xf32> to vector<16x8xf32>
    %141 = arith.subf %130, %140 : vector<16x8xf32>
    %c0_94 = arith.constant 0 : index
    %c0_95 = arith.constant 0 : index
    %c0_96 = arith.constant 0 : index
    %142 = vector.load %arg8[%c0_94, %c0_95, %c0_96] : memref<1x16x8xf32, #tpu.memory_space<vmem>>, vector<1x16x8xf32>
    %143 = vector.shape_cast %142 : vector<1x16x8xf32> to vector<16x8xf32>
    %144 = vector.shape_cast %141 : vector<16x8xf32> to vector<1x16x8xf32>
    tpu.vector_store %arg8[%c0_94, %c0_95, %c0_96], %144 {strides = array<i32>} : memref<1x16x8xf32, #tpu.memory_space<vmem>>, vector<1x16x8xf32>,
    return
  }
  func.func @transform_0(%arg0: i32) -> (i32, i32, i32) {
    %c0_i32 = arith.constant 0 : i32
    %c0_i32_0 = arith.constant 0 : i32
    %c0_i32_1 = arith.constant 0 : i32
    return %arg0, %c0_i32, %c0_i32_0 : i32, i32, i32
  }
  func.func @transform_1(%arg0: i32) -> (i32, i32) {
    %c0_i32 = arith.constant 0 : i32
    %c0_i32_0 = arith.constant 0 : i32
    %c0_i32_1 = arith.constant 0 : i32
    return %c0_i32, %c0_i32_0 : i32, i32
  }
  func.func @transform_2(%arg0: i32) -> (i32, i32, i32) {
    %c0_i32 = arith.constant 0 : i32
    %c0_i32_0 = arith.constant 0 : i32
    %c0_i32_1 = arith.constant 0 : i32
    return %arg0, %c0_i32, %c0_i32_0 : i32, i32, i32
  }
  func.func @transform_3(%arg0: i32) -> (i32, i32, i32) {
    %c0_i32 = arith.constant 0 : i32
    %c0_i32_0 = arith.constant 0 : i32
    %c0_i32_1 = arith.constant 0 : i32
    %c0_i32_2 = arith.constant 0 : i32
    return %c0_i32, %c0_i32_0, %c0_i32_1 : i32, i32, i32
  }
  func.func @transform_4(%arg0: i32) -> (i32, i32, i32) {
    %c0_i32 = arith.constant 0 : i32
    %c0_i32_0 = arith.constant 0 : i32
    %c0_i32_1 = arith.constant 0 : i32
    %c0_i32_2 = arith.constant 0 : i32
    return %c0_i32, %c0_i32_0, %c0_i32_1 : i32, i32, i32
  }
  func.func @transform_5(%arg0: i32) -> (i32, i32, i32) {
    %c0_i32 = arith.constant 0 : i32
    %c0_i32_0 = arith.constant 0 : i32
    %c0_i32_1 = arith.constant 0 : i32
    %c0_i32_2 = arith.constant 0 : i32
    return %c0_i32, %c0_i32_0, %c0_i32_1 : i32, i32, i32
  }
  func.func @transform_6(%arg0: i32) -> (i32, i32) {
    %c0_i32 = arith.constant 0 : i32
    %c0_i32_0 = arith.constant 0 : i32
    %c0_i32_1 = arith.constant 0 : i32
    return %c0_i32, %c0_i32_0 : i32, i32
  }
  func.func @transform_7(%arg0: i32) -> (i32, i32, i32) {
    %c0_i32 = arith.constant 0 : i32
    %c0_i32_0 = arith.constant 0 : i32
    %c0_i32_1 = arith.constant 0 : i32
    return %arg0, %c0_i32, %c0_i32_0 : i32, i32, i32
  }
}

</mosaic_0001>

<bundles_post_ra>
// kernel: tpu_custom_call.1
= control target key start
LH: loop header
LB: loop body
LE: loop exit
PB: predicated region body
PF: predicated region fallthrough
CT: control target
= control target key end

     0   :  { %12 = vsyncpa [#allocation3], 0  ;;  %s7062_s0 = inlined_call_operand.hbm [shape: bf16[2,256,256], index: 0, kind: input, shape index: {}]   ;;  %s7063_s1 = inlined_call_operand.vmem [shape: bf16[16,256], index: 1, kind: input, shape index: {}]   ;;  %s7064_s2 = inlined_call_operand.vmem [shape: bf16[2,256,32], index: 2, kind: input, shape index: {}]   ;;  %s7065_s3 = inlined_call_operand.vmem [shape: bf16[5,32,32], index: 3, kind: input, shape index: {}]   ;;  %s7066_s4 = inlined_call_operand.vmem [shape: bf16[5,32,32], index: 4, kind: input, shape index: {}]   ;;  %s7067_s5 = inlined_call_operand.vmem [shape: bf16[5,32,32], index: 5, kind: input, shape index: {}]   ;;  %s7068_s6 = inlined_call_operand.vmem [shape: bf16[32,8], index: 6, kind: input, shape index: {}]   ;;  %s7069_s7 = inlined_call_operand.vmem [shape: f32[2,16,8], index: 7, kind: output, shape index: {}]  }
   0x1   :  { %14 = vsyncpa [#allocation3 + $0x1], 0  ;;  %s5673_s24 = smov 0   ;;  %s5675_s25 = smov 0  }
   0x2   :  { %s5677_s26 = smov 0   ;;  %s5679_s27 = smov 0  }
   0x3 LB: > { %s5692_s28 = sadd.s32 4294967295, %s5629_s27   ;;  %s5695_s29 = sadd.s32 1, %s5629_s27   ;;  %s5629_s27 = sphi %s5679_s27, %s7233_s27   ;;  %s5625_s26 = sphi %s5677_s26, %s7232_s26   ;;  %s5621_s25 = sphi %s5675_s25, %s7231_s25   ;;  %s5617_s24 = sphi %s5673_s24, %s7230_s24  }
   0x4   : > { %s24_s30 = ssub.s32 %s5629_s27, %s5695_s29  ;;  %s27_s8 = sadd.s32 1, %s5625_s26 }
   0x5   : > { %p25_p0 = scmp.eq.s32.totalorder %s24_s30, 0  ;;  %p34_p1 = scmp.ne.s32.totalorder %s5625_s26, %s5621_s25 }
   0x6   : > { %p35_p2 = scmp.eq.s32.totalorder %s5629_s27, 0  ;;  %p40_p3 = scmp.ne.s32.totalorder %s5621_s25, %s5617_s24 }
   0x7   : > { %s5705_s9 = scalar_select %p25_p0, %s5625_s26, %s27_s8  }
   0x8   : > { %p5707_p4 = por %p35_p2, %p34_p1  ;;  %p41_p5 = scmp.eq.s32.totalorder %s5692_s28, 0 }
   0x9   : > { %p5522_p6 = scmp.lt.s32.totalorder %s5629_s27, 2  ;;  %s236_s12 = sand.u32 1, %s5625_s26  }
   0xa   : > { %p5713_p7 = por %p41_p5, %p40_p3  ;;  %s4878_s13 = sshll.u32 %s236_s12, 8 }
   0xb   : > { %s5431_s14 = sshll.u32 %s5629_s27, 8  ;;  %s240_s18 = scalar_lea.vmem [#allocation2], %s4878_s13 }
   0xc   : > { %s245_s17 = scalar_lea.hbm %s7062_s0, %s5431_s14  ;;  %s248_s19 = sshll.u32 %s240_s18, 4  ;;  %s249_s19 = int_to_ptr.vmem [resolvable:$true] %s248_s19 }
   0xd   : > { %s246_s20 = sshll.u32 %s245_s17, 4  ;;  %p5724_p8 = pnand %p5522_p6, %p5707_p4  ;;  %s247_s20 = int_to_ptr.hbm [resolvable:$true] %s246_s20 }
   0xe   : > { %p4881_p9 = scmp.ge.s32.totalorder %s5629_s27, 1  ;;  %s237_s22 = scalar_lea.sflag [#allocation3], %s236_s12 }
   0xf   : > { %s5565_s23 = sshra.s32 %s247_s20, 4  ;;  %p5569_p11 = pneg %p5724_p8  ;;  %s5566_s23 = int_to_ptr.hbm [resolvable:$true] %s5565_s23 }
  0x10   : > { %s5567_s24 = scalar_lea.hbm %s5566_s23, 256  ;;  %s5572_s13 = scalar_lea.hbm %s7062_s0, 512 }
  0x11   : > { %p5568_p10 = scmp.ne.s32.totalorder %s5566_s23, %s5567_s24  ;;  %p5573_p0 = scmp.lt.s32.totalorder %s5566_s23, %s7062_s0 }
  0x12   : > { %p5574_p1 = scmp.lt.s32.totalorder %s5572_s13, %s5567_s24 }
  0x13   : > { %p5570_p12 = pnand %p5569_p11, %p5568_p10 }
  0x14   : > { %p5575_p2 = por %p5574_p1, %p5573_p0 }
  0x15   : > { %p5571_p13 = pneg %p5570_p12 }
  0x17   : > { %p5576_p3 = pnand %p5575_p2, %p5571_p13 }
  0x19   : > { %5579 = shalt.err (!%p5576_p3)
}
  0x1a   : > { %s5631_s12 = smov 128   ;;  %s5632_s15 = smov 8  }
  0x1b   : > { %5521 = dma.hbm_to_vmem [thread:$0]  (!%p5724_p8), %s247_s20, 4096, %s249_s19, %s237_s22, %s5631_s12, %s5631_s12, %s5632_s15  }
  0x1c   : > { %p264_p4 = scmp.lt.s32.totalorder %s5629_s27, 3 }
  0x1e   : > { %p265_p5 = pnand %p4881_p9, %p264_p4 }
  0x20   : > { %268 = sbr.rel (%p265_p5) target bundleno = 4286 (0x10be), region = 48 }
  0x25   : > { %s270_s16 = sand.u32 1, %s5621_s25  }
  0x26   : > { %s4882_s17 = sshll.u32 %s270_s16, 8  ;;  %s271_s18 = scalar_lea.sflag [#allocation3], %s270_s16 }
  0x27   : > { %s5743_s23 = scalar_lea.vmem [#allocation2], %s4882_s17 }
  0x28   : > { %5612 = dma.done.wait (%p5713_p7), %s271_s18, 4096  }
  0x29   : > { %5614 = vsyncadd (%p5713_p7), %s271_s18, 4294963200  ;;  %p311_p6 = scmp.lt.s32.totalorder %s5692_s28, 1  ;;  %v4889_v16 = vld [vmem:[%s5743_s23] sm:$0xf]  ;;  %v5435_v17 = vld [vmem:[%s5743_s23 + $0x4] sm:$0xf0] }
  0x2a   : > { %v5434_v18 = vld [vmem:[%s5743_s23 + $0x4] sm:$0xf]  ;;  %v4891_v19 = vld [vmem:[%s5743_s23 + $0x8] sm:$0xf0]  ;;  %v5779_v20 = vor.u32 %v5435_v17, %v4889_v16  ;;  %v4897_v22 = vld [vmem:[%s5743_s23 + $0x10] sm:$0xf] }
  0x2b   : > { %s7235_s28 = smov (!%p311_p6, %s5692_s28), 1  ;;  %v5781_v21 = vor.u32 %v5434_v18, %v4891_v19  ;;  %v5437_v23 = vld [vmem:[%s5743_s23 + $0x14] sm:$0xf0]  ;;  %v5436_v24 = vld [vmem:[%s5743_s23 + $0x14] sm:$0xf]  ;;  %v5485_v58 = vld [vmem:[%s7065_s3 + $0x8] sm:$0xff] }
  0x2c   : > { %s5432_s27 = sshll.u32 %s7235_s28, 7  ;;  %7126 = vst [vmem:[#allocation5_spill] sm:$0xff] %v5779_v20  ;;  %v4899_v25 = vld [vmem:[%s5743_s23 + $0x18] sm:$0xf0]  ;;  %v5789_v26 = vor.u32 %v5437_v23, %v4897_v22  ;;  %v4905_v28 = vld [vmem:[%s5743_s23 + $0x20] sm:$0xf]  ;;  %973 = vmatpush.bf16.msra.mxu2 %v5485_v58 }
  0x2d   : > { %s5757_s21 = scalar_lea.vmem %s7064_s2, %s5432_s27  ;;  %v5791_v27 = vor.u32 %v5436_v24, %v4899_v25  ;;  %v5439_v29 = vld [vmem:[%s5743_s23 + $0x24] sm:$0xf0]  ;;  %v5438_v30 = vld [vmem:[%s5743_s23 + $0x24] sm:$0xf]  ;;  %v4907_v31 = vld [vmem:[%s5743_s23 + $0x28] sm:$0xf0] }
  0x2e   : > { %v5475_v0 = vld [vmem:[%s5757_s21 + $0x38] sm:$0xff]  ;;  %v5474_v2 = vld [vmem:[%s5757_s21 + $0x30] sm:$0xff]  ;;  %v5473_v4 = vld [vmem:[%s5757_s21 + $0x28] sm:$0xff]  ;;  %7127 = vst [vmem:[#allocation6_spill] sm:$0xff] %v5789_v26  ;;  %v5799_v32 = vor.u32 %v5439_v29, %v4905_v28  ;;  %v5801_v33 = vor.u32 %v5438_v30, %v4907_v31  ;;  %vm918_vm0 = vcmask 261120   ;;  %vm4767_vm1 = vcmask 64512  }
  0x2f   : > { %v5483_v1 = vld [vmem:[%s5757_s21 + $0x78] sm:$0xff]  ;;  %708 = vmatpush.bf16.msra.mxu0 %v5475_v0  ;;  %v5482_v3 = vld [vmem:[%s5757_s21 + $0x70] sm:$0xff]  ;;  %v5481_v5 = vld [vmem:[%s5757_s21 + $0x68] sm:$0xff]  ;;  %s5433_s11 = sshll.u32 %s7235_s28, 4 }
  0x30   : > { %797 = vmatpush.bf16.msra.mxu1 %v5483_v1  ;;  %v5472_v6 = vld [vmem:[%s5757_s21 + $0x20] sm:$0xff]  ;;  %v5471_v8 = vld [vmem:[%s5757_s21 + $0x18] sm:$0xff]  ;;  %v5470_v10 = vld [vmem:[%s5757_s21 + $0x10] sm:$0xff]  ;;  %7128 = vst [vmem:[#allocation7_spill] sm:$0xff] %v5799_v32  ;;  %s320_s30 = scalar_lea.vmem %s7069_s7, %s5433_s11 }
  0x31   : > { %v5480_v7 = vld [vmem:[%s5757_s21 + $0x60] sm:$0xff]  ;;  %v5479_v9 = vld [vmem:[%s5757_s21 + $0x58] sm:$0xff]  ;;  %v5478_v11 = vld [vmem:[%s5757_s21 + $0x50] sm:$0xff] }
  0x32   : > { %v5469_v12 = vld [vmem:[%s5757_s21 + $0x8] sm:$0xff]  ;;  %v5468_v14 = vld [vmem:[%s5757_s21] sm:$0xff]  ;;  %v4913_v34 = vld [vmem:[%s5743_s23 + $0x30] sm:$0xf] }
  0x33   : > { %709 = vmatpush.bf16.msra.mxu0 %v5474_v2  ;;  %v5477_v13 = vld [vmem:[%s5757_s21 + $0x48] sm:$0xff]  ;;  %v5476_v15 = vld [vmem:[%s5757_s21 + $0x40] sm:$0xff]  ;;  %v5441_v35 = vld [vmem:[%s5743_s23 + $0x34] sm:$0xf0] }
  0x34   : > { %798 = vmatpush.bf16.msra.mxu1 %v5482_v3  ;;  %v5440_v36 = vld [vmem:[%s5743_s23 + $0x34] sm:$0xf]  ;;  %v4915_v37 = vld [vmem:[%s5743_s23 + $0x38] sm:$0xf0]  ;;  %v5809_v38 = vor.u32 %v5441_v35, %v4913_v34  ;;  %v4921_v40 = vld [vmem:[%s5743_s23 + $0x40] sm:$0xf] }
  0x35   : > { %v5811_v39 = vor.u32 %v5440_v36, %v4915_v37  ;;  %v5443_v41 = vld [vmem:[%s5743_s23 + $0x44] sm:$0xf0]  ;;  %v5442_v42 = vld [vmem:[%s5743_s23 + $0x44] sm:$0xf]  ;;  %v4923_v43 = vld [vmem:[%s5743_s23 + $0x48] sm:$0xf0] }
  0x36   : > { %7129 = vst [vmem:[#allocation8_spill] sm:$0xff] %v5809_v38  ;;  %v5819_v44 = vor.u32 %v5443_v41, %v4921_v40  ;;  %v5821_v45 = vor.u32 %v5442_v42, %v4923_v43  ;;  %v4929_v46 = vld [vmem:[%s5743_s23 + $0x50] sm:$0xf]  ;;  %v5445_v47 = vld [vmem:[%s5743_s23 + $0x54] sm:$0xf0]  ;;  %v5484_v59 = vld [vmem:[%s7065_s3] sm:$0xff] }
  0x37   : > { %710 = vmatpush.bf16.msra.mxu0 %v5473_v4  ;;  %v5444_v48 = vld [vmem:[%s5743_s23 + $0x54] sm:$0xf]  ;;  %v4931_v49 = vld [vmem:[%s5743_s23 + $0x58] sm:$0xf0]  ;;  %v5829_v50 = vor.u32 %v5445_v47, %v4929_v46  ;;  %v4937_v52 = vld [vmem:[%s5743_s23 + $0x60] sm:$0xf]  ;;  %974 = vmatpush.bf16.msra.mxu2 %v5484_v59 }
  0x38   : > { %799 = vmatpush.bf16.msra.mxu1 %v5481_v5  ;;  %7130 = vst [vmem:[#allocation9_spill] sm:$0xff] %v5819_v44  ;;  %v5831_v51 = vor.u32 %v5444_v48, %v4931_v49  ;;  %v5447_v53 = vld [vmem:[%s5743_s23 + $0x64] sm:$0xf0]  ;;  %v5446_v54 = vld [vmem:[%s5743_s23 + $0x64] sm:$0xf] }
  0x39   : > { %7131 = vst [vmem:[#allocation10_spill] sm:$0xff] %v5829_v50  ;;  %v4939_v55 = vld [vmem:[%s5743_s23 + $0x68] sm:$0xf0]  ;;  %v5839_v56 = vor.u32 %v5447_v53, %v4937_v52  ;;  %v4945_v60 = vld [vmem:[%s5743_s23 + $0x70] sm:$0xf]  ;;  %v356_v2 = vld [vmem:[%s5757_s21] sm:$0xff]  }
  0x3a   : > { %7132 = vst [vmem:[#allocation11_spill] sm:$0xff] %v5831_v51  ;;  %v5841_v57 = vor.u32 %v5446_v54, %v4939_v55  ;;  %v5449_v61 = vld [vmem:[%s5743_s23 + $0x74] sm:$0xf0]  ;;  %v5448_v62 = vld [vmem:[%s5743_s23 + $0x74] sm:$0xf]  ;;  %v358_v23 = vld [vmem:[%s5757_s21 + $0x8] sm:$0xff]  }
  0x3b   : > { %711 = vmatpush.bf16.msra.mxu0 %v5472_v6  ;;  %7133 = vst [vmem:[#allocation12_spill] sm:$0xff] %v5839_v56  ;;  %v4947_v63 = vld [vmem:[%s5743_s23 + $0x78] sm:$0xf0]  ;;  %v5855_v0 = vor.u32 %v5449_v61, %v4945_v60  ;;  %v4953_v3 = vld [vmem:[%s5743_s23 + $0x80] sm:$0xf]  ;;  %v390_v31 = vunpack.c.l.bf16 %v358_v23  ;;  %v391_v40 = vunpack.c.h.bf16 %v358_v23  ;;  %v360_v53 = vld [vmem:[%s5757_s21 + $0x10] sm:$0xff]  }
  0x3c   : > { %800 = vmatpush.bf16.msra.mxu1 %v5480_v7  ;;  %7134 = vst [vmem:[#allocation13_spill] sm:$0xff] %v5841_v57  ;;  %v5857_v1 = vor.u32 %v5448_v62, %v4947_v63  ;;  %v5451_v4 = vld [vmem:[%s5743_s23 + $0x84] sm:$0xf0]  ;;  %v5450_v5 = vld [vmem:[%s5743_s23 + $0x84] sm:$0xf]  ;;  %v388_v7 = vunpack.c.l.bf16 %v356_v2  ;;  %v392_v61 = vunpack.c.l.bf16 %v360_v53 }
  0x3d   : > { %v4955_v6 = vld [vmem:[%s5743_s23 + $0x88] sm:$0xf0]  ;;  %v4961_v24 = vld [vmem:[%s5743_s23 + $0x90] sm:$0xf]  ;;  %v5453_v25 = vld [vmem:[%s5743_s23 + $0x94] sm:$0xf0] }
  0x3e   : > { %7135 = vst [vmem:[#allocation14_spill] sm:$0xff] %v5857_v1  ;;  %v5452_v28 = vld [vmem:[%s5743_s23 + $0x94] sm:$0xf]  ;;  %v4963_v29 = vld [vmem:[%s5743_s23 + $0x98] sm:$0xf0]  ;;  %v5878_v34 = vor.u32 %v5453_v25, %v4961_v24  ;;  %v422_v41 = vmul.f32 17.0, %v390_v31 }
  0x3f   : > { %712 = vmatpush.bf16.msra.mxu0 %v5471_v8  ;;  %v5866_v8 = vor.u32 %v5451_v4, %v4953_v3  ;;  %v5880_v35 = vor.u32 %v5452_v28, %v4963_v29  ;;  %v423_v42 = vmul.f32 17.0, %v391_v40  ;;  %v4969_v54 = vld [vmem:[%s5743_s23 + $0xa0] sm:$0xf]  ;;  %v5455_v55 = vld [vmem:[%s5743_s23 + $0xa4] sm:$0xf0]  ;;  %v393_v4 = vunpack.c.h.bf16 %v360_v53 }
  0x40   : > { %801 = vmatpush.bf16.msra.mxu1 %v5479_v9  ;;  %v5868_v9 = vor.u32 %v5450_v5, %v4955_v6  ;;  %v5454_v58 = vld [vmem:[%s5743_s23 + $0xa4] sm:$0xf]  ;;  %v4971_v59 = vld [vmem:[%s5743_s23 + $0xa8] sm:$0xf0]  ;;  %v5890_v62 = vor.u32 %v5455_v55, %v4969_v54  ;;  %v424_v5 = vmul.f32 17.0, %v392_v61 }
  0x41   : > { %7137 = vst [vmem:[#allocation16_spill] sm:$0xff] %v5880_v35  ;;  %v5892_v63 = vor.u32 %v5454_v58, %v4971_v59  ;;  %v425_v6 = vmul.f32 17.0, %v393_v4  ;;  %v4987_v53 = vld [vmem:[%s5743_s23 + $0xc8] sm:$0xf0] }
  0x42   : > { %7136 = vst [vmem:[#allocation15_spill] sm:$0xff] %v5868_v9 }
  0x43   : > { %713 = vmatpush.bf16.msra.mxu0 %v5470_v10 }
  0x44   : > { %802 = vmatpush.bf16.msra.mxu1 %v5478_v11 }
  0x47   : > { %714 = vmatpush.bf16.msra.mxu0 %v5469_v12  ;;  %v389_v12 = vunpack.c.h.bf16 %v356_v2 }
  0x48   : > { %803 = vmatpush.bf16.msra.mxu1 %v5477_v13  ;;  %v420_v13 = vmul.f32 17.0, %v388_v7 }
  0x4b   : > { %715 = vmatpush.bf16.msra.mxu0 %v5468_v14  ;;  %v421_v14 = vmul.f32 17.0, %v389_v12 }
  0x4c   : > { %804 = vmatpush.bf16.msra.mxu1 %v5476_v15 }
  0x4e   : > { %716 = vmatmul.bf16.vlgmr.msra.gmra.mxu0 %v5779_v20 }
  0x4f   : > { %805 = vmatmul.bf16.vlgmr.msra.gmra.mxu1 %v5781_v21 }
  0x5e   : > { %721 = vmatmul.bf16.gmra.mxu0 %v5789_v26 }
  0x5f   : > { %810 = vmatmul.bf16.gmra.mxu1 %v5791_v27 }
  0x6e   : > { %726 = vmatmul.bf16.gmra.mxu0 %v5799_v32 }
  0x6f   : > { %815 = vmatmul.bf16.gmra.mxu1 %v5801_v33 }
  0x7e   : > { %731 = vmatmul.bf16.gmra.mxu0 %v5809_v38 }
  0x7f   : > { %820 = vmatmul.bf16.gmra.mxu1 %v5811_v39 }
  0x8e   : > { %736 = vmatmul.bf16.gmra.mxu0 %v5819_v44 }
  0x8f   : > { %825 = vmatmul.bf16.gmra.mxu1 %v5821_v45 }
  0x9e   : > { %741 = vmatmul.bf16.gmra.mxu0 %v5829_v50 }
  0x9f   : > { %830 = vmatmul.bf16.gmra.mxu1 %v5831_v51 }
  0xae   : > { %746 = vmatmul.bf16.gmra.mxu0 %v5839_v56 }
  0xaf   : > { %835 = vmatmul.bf16.gmra.mxu1 %v5841_v57 }
  0xbe   : > { %751 = vmatmul.bf16.gmra.mxu0 %v5855_v0 }
  0xbf   : > { %840 = vmatmul.bf16.gmra.mxu1 %v5857_v1 }
  0xcb   : > { %v717_v10 = vpop.f32.mrf.mxu0 }
  0xcc   : > { %v806_v11 = vpop.f32.mrf.mxu1  ;;  %v718_v15 = vadd.f32 %v717_v10, %v420_v13 }
  0xce   : > { %756 = vmatmul.bf16.gmra.mxu0 %v5866_v8  ;;  %v807_v19 = vadd.f32 %v806_v11, %v718_v15  ;;  %v362_v15 = vld [vmem:[%s5757_s21 + $0x18] sm:$0xff]  }
  0xcf   : > { %845 = vmatmul.bf16.gmra.mxu1 %v5868_v9  ;;  %v394_v23 = vunpack.c.l.bf16 %v362_v15 }
  0xd1   : > { %v426_v31 = vmul.f32 17.0, %v394_v23 }
  0xd3   : > { %v719_v16 = vpop.f32.mrf.mxu0 }
  0xd4   : > { %v808_v17 = vpop.f32.mrf.mxu1  ;;  %v720_v18 = vadd.f32 %v719_v16, %v421_v14  ;;  %v4977_v16 = vld [vmem:[%s5743_s23 + $0xb0] sm:$0xf] }
  0xd6   : > { %v809_v22 = vadd.f32 %v808_v17, %v720_v18  ;;  %v5457_v17 = vld [vmem:[%s5743_s23 + $0xb4] sm:$0xf0]  ;;  %v5456_v18 = vld [vmem:[%s5743_s23 + $0xb4] sm:$0xf] }
  0xd7   : > { %v5902_v24 = vor.u32 %v5457_v17, %v4977_v16  ;;  %v5460_v16 = vld [vmem:[%s5743_s23 + $0xd4] sm:$0xf]  ;;  %v4995_v17 = vld [vmem:[%s5743_s23 + $0xd8] sm:$0xf0] }
  0xd8   : > { %v886_v30 = vpack.c.bf16 %v809_v22, %v807_v19  ;;  %v4979_v19 = vld [vmem:[%s5743_s23 + $0xb8] sm:$0xf0]  ;;  %v5928_v23 = vor.u32 %v5460_v16, %v4995_v17  ;;  %v5009_v16 = vld [vmem:[%s5743_s23 + $0xf0] sm:$0xf]  ;;  %v5465_v17 = vld [vmem:[%s5743_s23 + $0xf4] sm:$0xf0] }
  0xd9   : > { %v5904_v25 = vor.u32 %v5456_v18, %v4979_v19 }
  0xda   : > { %5087 = vmatmul.msk.bf16.vlgmr.msra.gmra.mxu2 %vm918_vm0, %v886_v30  ;;  %v395_v30 = vunpack.c.h.bf16 %v362_v15  ;;  %v5461_v15 = vld [vmem:[%s5743_s23 + $0xd4] sm:$0xf0]  ;;  %7139 = vst [vmem:[#allocation18_spill] sm:$0xff] %v5928_v23 }
  0xdb   : > { %v722_v36 = vpop.f32.mrf.mxu0  ;;  %7138 = vst [vmem:[#allocation17_spill] sm:$0xff] %v5904_v25 }
  0xdc   : > { %v811_v37 = vpop.f32.mrf.mxu1  ;;  %v723_v43 = vadd.f32 %v722_v36, %v422_v41  ;;  %v427_v36 = vmul.f32 17.0, %v395_v30 }
  0xde   : > { %761 = vmatmul.bf16.gmra.mxu0 %v5878_v34  ;;  %v812_v49 = vadd.f32 %v811_v37, %v723_v43 }
  0xdf   : > { %850 = vmatmul.bf16.gmra.mxu1 %v5880_v35 }
  0xe3   : > { %v724_v46 = vpop.f32.mrf.mxu0 }
  0xe4   : > { %v813_v47 = vpop.f32.mrf.mxu1  ;;  %v725_v48 = vadd.f32 %v724_v46, %v423_v42 }
  0xe6   : > { %v814_v52 = vadd.f32 %v813_v47, %v725_v48  ;;  %v364_v47 = vld [vmem:[%s5757_s21 + $0x20] sm:$0xff]  }
  0xe7   : > { %v4985_v48 = vld [vmem:[%s5743_s23 + $0xc0] sm:$0xf]  ;;  %v396_v55 = vunpack.c.l.bf16 %v364_v47 }
  0xe8   : > { %v887_v60 = vpack.c.bf16 %v814_v52, %v812_v49  ;;  %v5459_v49 = vld [vmem:[%s5743_s23 + $0xc4] sm:$0xf0]  ;;  %v5458_v52 = vld [vmem:[%s5743_s23 + $0xc4] sm:$0xf] }
  0xe9   : > { %v5914_v58 = vor.u32 %v5459_v49, %v4985_v48  ;;  %v5916_v59 = vor.u32 %v5458_v52, %v4987_v53  ;;  %v5001_v48 = vld [vmem:[%s5743_s23 + $0xe0] sm:$0xf]  ;;  %v5463_v49 = vld [vmem:[%s5743_s23 + $0xe4] sm:$0xf0]  ;;  %v5462_v52 = vld [vmem:[%s5743_s23 + $0xe4] sm:$0xf] }
  0xea   : > { %5088 = vmatmul.msk.bf16.gmra.mxu2 %vm918_vm0, %v887_v60  ;;  %v5003_v53 = vld [vmem:[%s5743_s23 + $0xe8] sm:$0xf0] }
  0xeb   : > { %v727_v2 = vpop.f32.mrf.mxu0 }
  0xec   : > { %v816_v3 = vpop.f32.mrf.mxu1  ;;  %v728_v7 = vadd.f32 %v727_v2, %v424_v5  ;;  %v397_v2 = vunpack.c.h.bf16 %v364_v47  ;;  %v368_v47 = vld [vmem:[%s5757_s21 + $0x30] sm:$0xff]  }
  0xee   : > { %766 = vmatmul.bf16.gmra.mxu0 %v5890_v62  ;;  %v817_v13 = vadd.f32 %v816_v3, %v728_v7  ;;  %v428_v3 = vmul.f32 17.0, %v396_v55  ;;  %v429_v4 = vmul.f32 17.0, %v397_v2  ;;  %v400_v55 = vunpack.c.l.bf16 %v368_v47 }
  0xef   : > { %855 = vmatmul.bf16.gmra.mxu1 %v5892_v63 }
  0xf3   : > { %v729_v10 = vpop.f32.mrf.mxu0 }
  0xf4   : > { %v818_v11 = vpop.f32.mrf.mxu1  ;;  %v730_v12 = vadd.f32 %v729_v10, %v425_v6 }
  0xf6   : > { %v819_v14 = vadd.f32 %v818_v11, %v730_v12 }
  0xf8   : > { %v888_v22 = vpack.c.bf16 %v819_v14, %v817_v13  ;;  %v366_v13 = vld [vmem:[%s5757_s21 + $0x28] sm:$0xff]   ;;  %v4993_v14 = vld [vmem:[%s5743_s23 + $0xd0] sm:$0xf] }
  0xf9   : > { %v398_v19 = vunpack.c.l.bf16 %v366_v13  ;;  %v399_v30 = vunpack.c.h.bf16 %v366_v13 }
  0xfa   : > { %5089 = vmatmul.msk.bf16.gmra.mxu2 %vm918_vm0, %v888_v22  ;;  %v5926_v22 = vor.u32 %v5461_v15, %v4993_v14  ;;  %v370_v15 = vld [vmem:[%s5757_s21 + $0x38] sm:$0xff]  }
  0xfb   : > { %v732_v28 = vpop.f32.mrf.mxu0 }
  0xfc   : > { %v821_v29 = vpop.f32.mrf.mxu1  ;;  %v733_v37 = vadd.f32 %v732_v28, %v426_v31  ;;  %v430_v31 = vmul.f32 17.0, %v398_v19  ;;  %v5011_v19 = vld [vmem:[%s5743_s23 + $0xf8] sm:$0xf0] }
  0xfe   : > { %771 = vmatmul.bf16.gmra.mxu0 %v5902_v24  ;;  %v822_v43 = vadd.f32 %v821_v29, %v733_v37 }
  0xff   : > { %860 = vmatmul.bf16.gmra.mxu1 %v5904_v25 }
 0x103   : > { %v734_v40 = vpop.f32.mrf.mxu0 }
 0x104   : > { %v823_v41 = vpop.f32.mrf.mxu1  ;;  %v735_v42 = vadd.f32 %v734_v40, %v427_v36  ;;  %v431_v36 = vmul.f32 17.0, %v399_v30  ;;  %v5950_v30 = vor.u32 %v5465_v17, %v5009_v16  ;;  %v374_v17 = vld [vmem:[%s5757_s21 + $0x48] sm:$0xff]  }
 0x106   : > { %v824_v46 = vadd.f32 %v823_v41, %v735_v42  ;;  %7142 = vst [vmem:[#allocation21_spill] sm:$0xff] %v5950_v30 }
 0x108   : > { %v889_v54 = vpack.c.bf16 %v824_v46, %v822_v43 }
 0x10a   : > { %5090 = vmatmul.msk.bf16.gmra.mxu2 %vm918_vm0, %v889_v54 }
 0x10b   : > { %v737_v60 = vpop.f32.mrf.mxu0 }
 0x10c   : > { %v826_v61 = vpop.f32.mrf.mxu1  ;;  %v738_v5 = vadd.f32 %v737_v60, %v428_v3  ;;  %v5938_v60 = vor.u32 %v5463_v49, %v5001_v48 }
 0x10e   : > { %776 = vmatmul.bf16.gmra.mxu0 %v5914_v58  ;;  %v827_v11 = vadd.f32 %v826_v61, %v738_v5  ;;  %7140 = vst [vmem:[#allocation19_spill] sm:$0xff] %v5938_v60  ;;  %v5940_v61 = vor.u32 %v5462_v52, %v5003_v53  ;;  %v432_v5 = vmul.f32 17.0, %v400_v55  ;;  %v5486_v52 = vld [vmem:[%s7066_s4] sm:$0xff] }
 0x10f   : > { %865 = vmatmul.bf16.gmra.mxu1 %v5916_v59  ;;  %v372_v55 = vld [vmem:[%s5757_s21 + $0x40] sm:$0xff]  }
 0x110   : > { %7141 = vst [vmem:[#allocation20_spill] sm:$0xff] %v5940_v61 }
 0x113   : > { %v739_v6 = vpop.f32.mrf.mxu0 }
 0x114   : > { %v828_v7 = vpop.f32.mrf.mxu1  ;;  %v740_v10 = vadd.f32 %v739_v6, %v429_v4  ;;  %v401_v4 = vunpack.c.h.bf16 %v368_v47 }
 0x116   : > { %v829_v12 = vadd.f32 %v828_v7, %v740_v10  ;;  %v433_v6 = vmul.f32 17.0, %v401_v4 }
 0x118   : > { %v890_v18 = vpack.c.bf16 %v829_v12, %v827_v11 }
 0x11a   : > { %5091 = vmatmul.msk.bf16.gmra.mxu2 %vm918_vm0, %v890_v18  ;;  %v5464_v18 = vld [vmem:[%s5743_s23 + $0xf4] sm:$0xf] }
 0x11b   : > { %v742_v28 = vpop.f32.mrf.mxu0 }
 0x11c   : > { %v831_v29 = vpop.f32.mrf.mxu1  ;;  %v743_v37 = vadd.f32 %v742_v28, %v430_v31  ;;  %v5952_v31 = vor.u32 %v5464_v18, %v5011_v19  ;;  %v406_v19 = vunpack.c.l.bf16 %v374_v17 }
 0x11e   : > { %781 = vmatmul.bf16.gmra.mxu0 %v5926_v22  ;;  %v832_v43 = vadd.f32 %v831_v29, %v743_v37  ;;  %v402_v29 = vunpack.c.l.bf16 %v370_v15  ;;  %7143 = vst [vmem:[#allocation22_spill] sm:$0xff] %v5952_v31 }
 0x11f   : > { %870 = vmatmul.bf16.gmra.mxu1 %v5928_v23 }
 0x123   : > { %v744_v40 = vpop.f32.mrf.mxu0 }
 0x124   : > { %v833_v41 = vpop.f32.mrf.mxu1  ;;  %v745_v42 = vadd.f32 %v744_v40, %v431_v36  ;;  %v403_v40 = vunpack.c.h.bf16 %v370_v15 }
 0x126   : > { %v834_v46 = vadd.f32 %v833_v41, %v745_v42  ;;  %v434_v41 = vmul.f32 17.0, %v402_v29  ;;  %v435_v42 = vmul.f32 17.0, %v403_v40  ;;  %v438_v40 = vmul.f32 17.0, %v406_v19 }
 0x128   : > { %v891_v54 = vpack.c.bf16 %v834_v46, %v832_v43  ;;  %v5487_v43 = vld [vmem:[%s7066_s4 + $0x8] sm:$0xff] }
 0x129   : > { %1174 = vmatpush.bf16.msra.mxu3 %v5487_v43 }
 0x12a   : > { %5092 = vmatmul.msk.bf16.gmra.mxu2 %vm918_vm0, %v891_v54 }
 0x12b   : > { %v747_v2 = vpop.f32.mrf.mxu0 }
 0x12c   : > { %v836_v3 = vpop.f32.mrf.mxu1  ;;  %v748_v7 = vadd.f32 %v747_v2, %v432_v5 }
 0x12d   : > { %1175 = vmatpush.bf16.msra.mxu3 %v5486_v52 }
 0x12e   : > { %786 = vmatmul.bf16.gmra.mxu0 %v5938_v60  ;;  %v837_v13 = vadd.f32 %v836_v3, %v748_v7  ;;  %v404_v3 = vunpack.c.l.bf16 %v372_v55 }
 0x12f   : > { %875 = vmatmul.bf16.gmra.mxu1 %v5940_v61 }
 0x130   : > { %v436_v7 = vmul.f32 17.0, %v404_v3 }
 0x133   : > { %v749_v10 = vpop.f32.mrf.mxu0 }
 0x134   : > { %v838_v11 = vpop.f32.mrf.mxu1  ;;  %v750_v12 = vadd.f32 %v749_v10, %v433_v6  ;;  %v405_v6 = vunpack.c.h.bf16 %v372_v55  ;;  %v376_v55 = vld [vmem:[%s5757_s21 + $0x50] sm:$0xff]  }
 0x136   : > { %v839_v14 = vadd.f32 %v838_v11, %v750_v12  ;;  %v437_v10 = vmul.f32 17.0, %v405_v6 }
 0x138   : > { %v892_v28 = vpack.c.bf16 %v839_v14, %v837_v13 }
 0x13a   : > { %5093 = vmatmul.msk.bf16.gmra.mxu2 %vm918_vm0, %v892_v28 }
 0x13b   : > { %v752_v36 = vpop.f32.mrf.mxu0 }
 0x13c   : > { %v841_v37 = vpop.f32.mrf.mxu1  ;;  %v753_v46 = vadd.f32 %v752_v36, %v434_v41  ;;  %v407_v36 = vunpack.c.h.bf16 %v374_v17 }
 0x13e   : > { %791 = vmatmul.bf16.gmra.mxu0 %v5950_v30  ;;  %v842_v53 = vadd.f32 %v841_v37, %v753_v46  ;;  %v439_v41 = vmul.f32 17.0, %v407_v36  ;;  %v378_v36 = vld [vmem:[%s5757_s21 + $0x58] sm:$0xff]  }
 0x13f   : > { %880 = vmatmul.bf16.gmra.mxu1 %v5952_v31 }
 0x143   : > { %v754_v47 = vpop.f32.mrf.mxu0 }
 0x144   : > { %v843_v48 = vpop.f32.mrf.mxu1  ;;  %v755_v49 = vadd.f32 %v754_v47, %v435_v42 }
 0x146   : > { %v844_v54 = vadd.f32 %v843_v48, %v755_v49 }
 0x148   : > { %v893_v2 = vpack.c.bf16 %v844_v54, %v842_v53 }
 0x14a   : > { %5094 = vmatmul.msk.bf16.gmra.mxu2 %vm918_vm0, %v893_v2 }
 0x14b   : > { %v757_v4 = vpop.f32.mrf.mxu0 }
 0x14c   : > { %v846_v5 = vpop.f32.mrf.mxu1  ;;  %v758_v11 = vadd.f32 %v757_v4, %v436_v7  ;;  %v408_v4 = vunpack.c.l.bf16 %v376_v55  ;;  %v409_v7 = vunpack.c.h.bf16 %v376_v55 }
 0x14e   : > { %v847_v15 = vadd.f32 %v846_v5, %v758_v11  ;;  %v440_v11 = vmul.f32 17.0, %v408_v4 }
 0x153   : > { %v759_v12 = vpop.f32.mrf.mxu0 }
 0x154   : > { %v848_v13 = vpop.f32.mrf.mxu1  ;;  %v760_v14 = vadd.f32 %v759_v12, %v437_v10  ;;  %v441_v12 = vmul.f32 17.0, %v409_v7  ;;  %v380_v7 = vld [vmem:[%s5757_s21 + $0x60] sm:$0xff]  }
 0x156   : > { %v849_v16 = vadd.f32 %v848_v13, %v760_v14 }
 0x158   : > { %v894_v18 = vpack.c.bf16 %v849_v16, %v847_v15 }
 0x15a   : > { %5095 = vmatmul.msk.bf16.gmra.mxu2 %vm918_vm0, %v894_v18 }
 0x15b   : > { %v762_v28 = vpop.f32.mrf.mxu0 }
 0x15c   : > { %v851_v29 = vpop.f32.mrf.mxu1  ;;  %v763_v42 = vadd.f32 %v762_v28, %v438_v40 }
 0x15d   : > { %v976_v37 = vpop.f32.mrf.mxu2 }
 0x15e   : > { %v852_v49 = vadd.f32 %v851_v29, %v763_v42  ;;  %v1056_v52 = vmax.f32 %v976_v37, 0.0 }
 0x163   : > { %v764_v43 = vpop.f32.mrf.mxu0 }
 0x164   : > { %v853_v46 = vpop.f32.mrf.mxu1  ;;  %v765_v47 = vadd.f32 %v764_v43, %v439_v41  ;;  %v410_v41 = vunpack.c.l.bf16 %v378_v36 }
 0x165   : > { %v978_v48 = vpop.f32.mrf.mxu2 }
 0x166   : > { %v854_v53 = vadd.f32 %v853_v46, %v765_v47  ;;  %v1057_v54 = vmax.f32 %v978_v48, 0.0  ;;  %v411_v46 = vunpack.c.h.bf16 %v378_v36  ;;  %v442_v48 = vmul.f32 17.0, %v410_v41 }
 0x168   : > { %v895_v2 = vpack.c.bf16 %v854_v53, %v852_v49  ;;  %v1088_v3 = vpack.c.bf16 %v1057_v54, %v1056_v52  ;;  %v443_v49 = vmul.f32 17.0, %v411_v46  ;;  %v382_v46 = vld [vmem:[%s5757_s21 + $0x68] sm:$0xff]  }
 0x16a   : > { %5096 = vmatmul.msk.bf16.gmra.mxu2 %vm918_vm0, %v895_v2  ;;  %5111 = vmatmul.msk.bf16.vlgmr.msra.gmra.mxu3 %vm918_vm0, %v1088_v3 }
 0x16b   : > { %v767_v5 = vpop.f32.mrf.mxu0 }
 0x16c   : > { %v856_v6 = vpop.f32.mrf.mxu1  ;;  %v768_v13 = vadd.f32 %v767_v5, %v440_v11 }
 0x16d   : > { %v981_v10 = vpop.f32.mrf.mxu2 }
 0x16e   : > { %v857_v18 = vadd.f32 %v856_v6, %v768_v13  ;;  %v1058_v19 = vmax.f32 %v981_v10, 0.0 }
 0x173   : > { %v769_v14 = vpop.f32.mrf.mxu0 }
 0x174   : > { %v858_v15 = vpop.f32.mrf.mxu1  ;;  %v770_v16 = vadd.f32 %v769_v14, %v441_v12  ;;  %v412_v12 = vunpack.c.l.bf16 %v380_v7 }
 0x175   : > { %v983_v17 = vpop.f32.mrf.mxu2 }
 0x176   : > { %v859_v28 = vadd.f32 %v858_v15, %v770_v16  ;;  %v1059_v29 = vmax.f32 %v983_v17, 0.0  ;;  %v413_v15 = vunpack.c.h.bf16 %v380_v7  ;;  %v444_v17 = vmul.f32 17.0, %v412_v12 }
 0x178   : > { %v896_v37 = vpack.c.bf16 %v859_v28, %v857_v18  ;;  %v1089_v40 = vpack.c.bf16 %v1059_v29, %v1058_v19  ;;  %v445_v18 = vmul.f32 17.0, %v413_v15  ;;  %v384_v15 = vld [vmem:[%s5757_s21 + $0x70] sm:$0xff]  }
 0x17a   : > { %5097 = vmatmul.msk.bf16.gmra.mxu2 %vm918_vm0, %v896_v37  ;;  %5112 = vmatmul.msk.bf16.gmra.mxu3 %vm918_vm0, %v1089_v40 }
 0x17b   : > { %v772_v42 = vpop.f32.mrf.mxu0 }
 0x17c   : > { %v861_v43 = vpop.f32.mrf.mxu1  ;;  %v773_v52 = vadd.f32 %v772_v42, %v442_v48 }
 0x17d   : > { %v986_v47 = vpop.f32.mrf.mxu2 }
 0x17e   : > { %v862_v3 = vadd.f32 %v861_v43, %v773_v52  ;;  %v1060_v4 = vmax.f32 %v986_v47, 0.0 }
 0x183   : > { %v774_v53 = vpop.f32.mrf.mxu0 }
 0x184   : > { %v863_v54 = vpop.f32.mrf.mxu1  ;;  %v775_v55 = vadd.f32 %v774_v53, %v443_v49  ;;  %v414_v49 = vunpack.c.l.bf16 %v382_v46 }
 0x185   : > { %v988_v2 = vpop.f32.mrf.mxu2 }
 0x186   : > { %v864_v5 = vadd.f32 %v863_v54, %v775_v55  ;;  %v1061_v6 = vmax.f32 %v988_v2, 0.0  ;;  %v415_v54 = vunpack.c.h.bf16 %v382_v46  ;;  %v446_v2 = vmul.f32 17.0, %v414_v49 }
 0x188   : > { %v897_v10 = vpack.c.bf16 %v864_v5, %v862_v3  ;;  %v1090_v11 = vpack.c.bf16 %v1061_v6, %v1060_v4  ;;  %v447_v3 = vmul.f32 17.0, %v415_v54  ;;  %v386_v54 = vld [vmem:[%s5757_s21 + $0x78] sm:$0xff]  }
 0x18a   : > { %5098 = vmatmul.msk.bf16.gmra.mxu2 %vm918_vm0, %v897_v10  ;;  %5113 = vmatmul.msk.bf16.gmra.mxu3 %vm918_vm0, %v1090_v11 }
 0x18b   : > { %v777_v13 = vpop.f32.mrf.mxu0 }
 0x18c   : > { %v866_v14 = vpop.f32.mrf.mxu1  ;;  %v778_v19 = vadd.f32 %v777_v13, %v444_v17 }
 0x18d   : > { %v991_v16 = vpop.f32.mrf.mxu2 }
 0x18e   : > { %v867_v40 = vadd.f32 %v866_v14, %v778_v19  ;;  %v1062_v41 = vmax.f32 %v991_v16, 0.0 }
 0x193   : > { %v779_v28 = vpop.f32.mrf.mxu0 }
 0x194   : > { %v868_v29 = vpop.f32.mrf.mxu1  ;;  %v780_v36 = vadd.f32 %v779_v28, %v445_v18  ;;  %v416_v18 = vunpack.c.l.bf16 %v384_v15 }
 0x195   : > { %v993_v37 = vpop.f32.mrf.mxu2 }
 0x196   : > { %v869_v42 = vadd.f32 %v868_v29, %v780_v36  ;;  %v1063_v43 = vmax.f32 %v993_v37, 0.0  ;;  %v417_v29 = vunpack.c.h.bf16 %v384_v15  ;;  %v448_v37 = vmul.f32 17.0, %v416_v18 }
 0x198   : > { %v898_v47 = vpack.c.bf16 %v869_v42, %v867_v40  ;;  %v1091_v48 = vpack.c.bf16 %v1063_v43, %v1062_v41  ;;  %v449_v40 = vmul.f32 17.0, %v417_v29 }
 0x19a   : > { %5099 = vmatmul.msk.bf16.gmra.mxu2 %vm918_vm0, %v898_v47  ;;  %5114 = vmatmul.msk.bf16.gmra.mxu3 %vm918_vm0, %v1091_v48 }
 0x19b   : > { %v782_v52 = vpop.f32.mrf.mxu0 }
 0x19c   : > { %v871_v53 = vpop.f32.mrf.mxu1  ;;  %v783_v4 = vadd.f32 %v782_v52, %v446_v2 }
 0x19d   : > { %v996_v55 = vpop.f32.mrf.mxu2 }
 0x19e   : > { %v872_v11 = vadd.f32 %v871_v53, %v783_v4  ;;  %v1064_v12 = vmax.f32 %v996_v55, 0.0 }
 0x1a3   : > { %v784_v5 = vpop.f32.mrf.mxu0 }
 0x1a4   : > { %v873_v6 = vpop.f32.mrf.mxu1  ;;  %v785_v7 = vadd.f32 %v784_v5, %v447_v3  ;;  %v418_v3 = vunpack.c.l.bf16 %v386_v54 }
 0x1a5   : > { %v998_v10 = vpop.f32.mrf.mxu2 }
 0x1a6   : > { %v874_v13 = vadd.f32 %v873_v6, %v785_v7  ;;  %v1065_v14 = vmax.f32 %v998_v10, 0.0  ;;  %v419_v6 = vunpack.c.h.bf16 %v386_v54  ;;  %v450_v10 = vmul.f32 17.0, %v418_v3 }
 0x1a8   : > { %v899_v16 = vpack.c.bf16 %v874_v13, %v872_v11  ;;  %v1092_v17 = vpack.c.bf16 %v1065_v14, %v1064_v12  ;;  %v451_v11 = vmul.f32 17.0, %v419_v6 }
 0x1aa   : > { %5100 = vmatmul.msk.bf16.gmra.mxu2 %vm918_vm0, %v899_v16  ;;  %5115 = vmatmul.msk.bf16.gmra.mxu3 %vm918_vm0, %v1092_v17 }
 0x1ab   : > { %v787_v19 = vpop.f32.mrf.mxu0 }
 0x1ac   : > { %v876_v28 = vpop.f32.mrf.mxu1  ;;  %v788_v41 = vadd.f32 %v787_v19, %v448_v37 }
 0x1ad   : > { %v1001_v36 = vpop.f32.mrf.mxu2 }
 0x1ae   : > { %v877_v48 = vadd.f32 %v876_v28, %v788_v41  ;;  %v1066_v49 = vmax.f32 %v1001_v36, 0.0 }
 0x1b3   : > { %v789_v42 = vpop.f32.mrf.mxu0 }
 0x1b4   : > { %v878_v43 = vpop.f32.mrf.mxu1  ;;  %v790_v46 = vadd.f32 %v789_v42, %v449_v40 }
 0x1b5   : > { %v1003_v47 = vpop.f32.mrf.mxu2 }
 0x1b6   : > { %v879_v52 = vadd.f32 %v878_v43, %v790_v46  ;;  %v1067_v53 = vmax.f32 %v1003_v47, 0.0 }
 0x1b8   : > { %v900_v55 = vpack.c.bf16 %v879_v52, %v877_v48  ;;  %v1093_v2 = vpack.c.bf16 %v1067_v53, %v1066_v49 }
 0x1ba   : > { %5101 = vmatmul.msk.bf16.gmra.mxu2 %vm918_vm0, %v900_v55  ;;  %5116 = vmatmul.msk.bf16.gmra.mxu3 %vm918_vm0, %v1093_v2 }
 0x1bb   : > { %v792_v4 = vpop.f32.mrf.mxu0 }
 0x1bc   : > { %v881_v5 = vpop.f32.mrf.mxu1  ;;  %v793_v12 = vadd.f32 %v792_v4, %v450_v10 }
 0x1bd   : > { %v1006_v7 = vpop.f32.mrf.mxu2 }
 0x1be   : > { %v882_v17 = vadd.f32 %v881_v5, %v793_v12  ;;  %v1068_v18 = vmax.f32 %v1006_v7, 0.0 }
 0x1c3   : > { %v794_v13 = vpop.f32.mrf.mxu0 }
 0x1c4   : > { %v795_v14 = vadd.f32 %v794_v13, %v451_v11  ;;  %v883_v15 = vpop.f32.mrf.mxu1 }
 0x1c5   : > { %v1008_v16 = vpop.f32.mrf.mxu2 }
 0x1c6   : > { %v884_v19 = vadd.f32 %v883_v15, %v795_v14  ;;  %v1069_v28 = vmax.f32 %v1008_v16, 0.0 }
 0x1c8   : > { %v901_v29 = vpack.c.bf16 %v884_v19, %v882_v17  ;;  %v1094_v36 = vpack.c.bf16 %v1069_v28, %v1068_v18 }
 0x1ca   : > { %5102 = vmatmul.msk.bf16.gmra.mxu2 %vm918_vm0, %v901_v29  ;;  %5117 = vmatmul.msk.bf16.gmra.mxu3 %vm918_vm0, %v1094_v36 }
 0x1cd   : > { %v1011_v37 = vpop.f32.mrf.mxu2 }
 0x1ce   : > { %v1070_v41 = vmax.f32 %v1011_v37, 0.0 }
 0x1d5   : > { %v1013_v40 = vpop.f32.mrf.mxu2 }
 0x1d6   : > { %v1071_v42 = vmax.f32 %v1013_v40, 0.0 }
 0x1d8   : > { %v1095_v43 = vpack.c.bf16 %v1071_v42, %v1070_v41 }
 0x1da   : > { %5118 = vmatmul.msk.bf16.gmra.mxu3 %vm918_vm0, %v1095_v43 }
 0x1dd   : > { %v1016_v46 = vpop.f32.mrf.mxu2 }
 0x1de   : > { %v1072_v48 = vmax.f32 %v1016_v46, 0.0 }
 0x1e5   : > { %v1018_v47 = vpop.f32.mrf.mxu2 }
 0x1e6   : > { %v1073_v49 = vmax.f32 %v1018_v47, 0.0 }
 0x1e8   : > { %v1096_v52 = vpack.c.bf16 %v1073_v49, %v1072_v48 }
 0x1ea   : > { %5119 = vmatmul.msk.bf16.gmra.mxu3 %vm918_vm0, %v1096_v52 }
 0x1ed   : > { %v1021_v53 = vpop.f32.mrf.mxu2  ;;  %v1177_v54 = vpop.f32.mrf.mxu3 }
 0x1ee   : > { %v1257_v55 = vmax.f32 %v1177_v54, 0.0  ;;  %v1074_v4 = vmax.f32 %v1021_v53, 0.0 }
 0x1f0   : > { %v5988_v5 = vpack.c.bf16 %v1257_v55, %v1257_v55 }
 0x1f2   : > { %v1363_v12 = vunpack.c.l.b16 %v5988_v5 }
 0x1f5   : > { %v1023_v2 = vpop.f32.mrf.mxu2  ;;  %v1179_v3 = vpop.f32.mrf.mxu3 }
 0x1f6   : > { %v1075_v6 = vmax.f32 %v1023_v2, 0.0  ;;  %v1258_v7 = vmax.f32 %v1179_v3, 0.0 }
 0x1f8   : > { %v1097_v10 = vpack.c.bf16 %v1075_v6, %v1074_v4  ;;  %v5990_v11 = vpack.c.bf16 %v1258_v7, %v1258_v7 }
 0x1fa   : > { %5120 = vmatmul.msk.bf16.gmra.mxu3 %vm918_vm0, %v1097_v10  ;;  %v1364_v13 = vunpack.c.l.b16 %v5990_v11 }
 0x1fc   : > { %v5995_v14 = vpack.c.b16 %v1364_v13, %v1363_v12 }
 0x1fd   : > { %v1026_v15 = vpop.f32.mrf.mxu2  ;;  %v1182_v16 = vpop.f32.mrf.mxu3 }
 0x1fe   : > { %v1259_v17 = vmax.f32 %v1182_v16, 0.0  ;;  %v1076_v28 = vmax.f32 %v1026_v15, 0.0 }
 0x200   : > { %v5997_v29 = vpack.c.bf16 %v1259_v17, %v1259_v17 }
 0x202   : > { %v1365_v42 = vunpack.c.l.b16 %v5997_v29 }
 0x205   : > { %v1028_v18 = vpop.f32.mrf.mxu2  ;;  %v1184_v19 = vpop.f32.mrf.mxu3 }
 0x206   : > { %v1077_v36 = vmax.f32 %v1028_v18, 0.0  ;;  %v1260_v37 = vmax.f32 %v1184_v19, 0.0 }
 0x208   : > { %v1098_v40 = vpack.c.bf16 %v1077_v36, %v1076_v28  ;;  %v5999_v41 = vpack.c.bf16 %v1260_v37, %v1260_v37 }
 0x20a   : > { %5121 = vmatmul.msk.bf16.gmra.mxu3 %vm918_vm0, %v1098_v40  ;;  %v1366_v43 = vunpack.c.l.b16 %v5999_v41 }
 0x20c   : > { %v6004_v46 = vpack.c.b16 %v1366_v43, %v1365_v42 }
 0x20d   : > { %v1031_v47 = vpop.f32.mrf.mxu2  ;;  %v1187_v48 = vpop.f32.mrf.mxu3 }
 0x20e   : > { %v1261_v49 = vmax.f32 %v1187_v48, 0.0  ;;  %v1078_v54 = vmax.f32 %v1031_v47, 0.0 }
 0x210   : > { %v6006_v55 = vpack.c.bf16 %v1261_v49, %v1261_v49 }
 0x212   : > { %v1367_v7 = vunpack.c.l.b16 %v6006_v55 }
 0x215   : > { %v1033_v52 = vpop.f32.mrf.mxu2  ;;  %v1189_v53 = vpop.f32.mrf.mxu3 }
 0x216   : > { %v1079_v2 = vmax.f32 %v1033_v52, 0.0  ;;  %v1262_v3 = vmax.f32 %v1189_v53, 0.0 }
 0x218   : > { %v1099_v4 = vpack.c.bf16 %v1079_v2, %v1078_v54  ;;  %v6008_v6 = vpack.c.bf16 %v1262_v3, %v1262_v3 }
 0x21a   : > { %5122 = vmatmul.msk.bf16.gmra.mxu3 %vm918_vm0, %v1099_v4  ;;  %v1368_v10 = vunpack.c.l.b16 %v6008_v6 }
 0x21c   : > { %v6013_v12 = vpack.c.b16 %v1368_v10, %v1367_v7 }
 0x21d   : > { %v1036_v13 = vpop.f32.mrf.mxu2  ;;  %v1192_v15 = vpop.f32.mrf.mxu3 }
 0x21e   : > { %v1263_v16 = vmax.f32 %v1192_v15, 0.0  ;;  %v1080_v19 = vmax.f32 %v1036_v13, 0.0 }
 0x220   : > { %v6015_v28 = vpack.c.bf16 %v1263_v16, %v1263_v16 }
 0x222   : > { %v1369_v43 = vunpack.c.l.b16 %v6015_v28 }
 0x225   : > { %v1038_v17 = vpop.f32.mrf.mxu2  ;;  %v1194_v18 = vpop.f32.mrf.mxu3 }
 0x226   : > { %v1081_v36 = vmax.f32 %v1038_v17, 0.0  ;;  %v1264_v37 = vmax.f32 %v1194_v18, 0.0 }
 0x228   : > { %v1100_v40 = vpack.c.bf16 %v1081_v36, %v1080_v19  ;;  %v6017_v42 = vpack.c.bf16 %v1264_v37, %v1264_v37 }
 0x22a   : > { %5123 = vmatmul.msk.bf16.gmra.mxu3 %vm918_vm0, %v1100_v40  ;;  %v1370_v47 = vunpack.c.l.b16 %v6017_v42 }
 0x22c   : > { %v6022_v48 = vpack.c.b16 %v1370_v47, %v1369_v43 }
 0x22d   : > { %v1041_v49 = vpop.f32.mrf.mxu2  ;;  %v1197_v52 = vpop.f32.mrf.mxu3 }
 0x22e   : > { %v1082_v2 = vmax.f32 %v1041_v49, 0.0 }
 0x235   : > { %v1043_v53 = vpop.f32.mrf.mxu2  ;;  %v1199_v54 = vpop.f32.mrf.mxu3 }
 0x236   : > { %v1083_v3 = vmax.f32 %v1043_v53, 0.0 }
 0x238   : > { %v1101_v4 = vpack.c.bf16 %v1083_v3, %v1082_v2 }
 0x23a   : > { %5124 = vmatmul.msk.bf16.gmra.mxu3 %vm918_vm0, %v1101_v4 }
 0x23d   : > { %v1046_v7 = vpop.f32.mrf.mxu2  ;;  %v1202_v10 = vpop.f32.mrf.mxu3 }
 0x23e   : > { %v1084_v16 = vmax.f32 %v1046_v7, 0.0 }
 0x245   : > { %v1048_v13 = vpop.f32.mrf.mxu2  ;;  %v1204_v15 = vpop.f32.mrf.mxu3 }
 0x246   : > { %v1085_v17 = vmax.f32 %v1048_v13, 0.0  ;;  %v1268_v13 = vmax.f32 %v1204_v15, 0.0  ;;  %v1265_v15 = vmax.f32 %v1197_v52, 0.0 }
 0x248   : > { %v1102_v18 = vpack.c.bf16 %v1085_v17, %v1084_v16 }
 0x24a   : > { %5125 = vmatmul.msk.bf16.gmra.mxu3 %vm918_vm0, %v1102_v18  ;;  %v1267_v18 = vmax.f32 %v1202_v10, 0.0 }
 0x24d   : > { %v1051_v19 = vpop.f32.mrf.mxu2  ;;  %v1207_v36 = vpop.f32.mrf.mxu3 }
 0x24e   : > { %v1086_v43 = vmax.f32 %v1051_v19, 0.0  ;;  %v1269_v31 = vmax.f32 %v1207_v36, 0.0 }
 0x250   : > { %v6033_v23 = vpack.c.bf16 %v1269_v31, %v1269_v31 }
 0x252   : > { %7147 = vst [vmem:[#allocation26_spill] sm:$0xff] %v6033_v23 }
 0x255   : > { %v1053_v37 = vpop.f32.mrf.mxu2  ;;  %v1209_v40 = vpop.f32.mrf.mxu3 }
 0x256   : > { %v1087_v47 = vmax.f32 %v1053_v37, 0.0  ;;  %v1270_v3 = vmax.f32 %v1209_v40, 0.0 }
 0x258   : > { %v1103_v49 = vpack.c.bf16 %v1087_v47, %v1086_v43  ;;  %v6029_v16 = vpack.c.bf16 %v1270_v3, %v1270_v3  ;;  %v1266_v43 = vmax.f32 %v1199_v54, 0.0  ;;  %v6037_v47 = vpack.c.bf16 %v1268_v13, %v1268_v13 }
 0x259   : > { %v6048_v54 = vpack.c.bf16 %v1265_v15, %v1265_v15 }
 0x25a   : > { %5126 = vmatmul.msk.bf16.gmra.mxu3 %vm918_vm0, %v1103_v49  ;;  %7145 = vst [vmem:[#allocation24_spill] sm:$0xff] %v6029_v16  ;;  %v1376_v36 = vunpack.c.l.b16 %v6029_v16  ;;  %v6045_v31 = vpack.c.bf16 %v1266_v43, %v1266_v43  ;;  %v1374_v3 = vunpack.c.l.b16 %v6037_v47 }
 0x25c   : > { %v1372_v52 = vunpack.c.l.b16 %v6045_v31 }
 0x25d   : > { %v1212_v53 = vpop.f32.mrf.mxu3 }
 0x25e   : > { %v1271_v2 = vmax.f32 %v1212_v53, 0.0  ;;  %v6042_v53 = vpack.c.bf16 %v1267_v18, %v1267_v18  ;;  %v1371_v18 = vunpack.c.l.b16 %v6048_v54 }
 0x260   : > { %v6027_v61 = vpack.c.bf16 %v1271_v2, %v1271_v2  ;;  %v1375_v2 = vunpack.c.l.b16 %v6033_v23 }
 0x262   : > { %7144 = vst [vmem:[#allocation23_spill] sm:$0xff] %v6027_v61  ;;  %v1377_v19 = vunpack.c.l.b16 %v6027_v61  ;;  %v1401_v10 = vpack.c.b16 %v1376_v36, %v1375_v2 }
 0x265   : > { %v1214_v4 = vpop.f32.mrf.mxu3 }
 0x266   : > { %v1272_v7 = vmax.f32 %v1214_v4, 0.0  ;;  %v1373_v4 = vunpack.c.l.b16 %v6042_v53 }
 0x268   : > { %v6031_v17 = vpack.c.bf16 %v1272_v7, %v1272_v7  ;;  %v1400_v7 = vpack.c.b16 %v1374_v3, %v1373_v4 }
 0x26a   : > { %7146 = vst [vmem:[#allocation25_spill] sm:$0xff] %v6031_v17  ;;  %v1378_v37 = vunpack.c.l.b16 %v6031_v17 }
 0x26c   : > { %v1402_v40 = vpack.c.b16 %v1378_v37, %v1377_v19  ;;  %v1399_v19 = vpack.c.b16 %v1372_v52, %v1371_v18 }
 0x26d   : > { %v6040_v49 = vpop.f32.mrf.mxu3 }
 0x26e   : > { %1427 = vmatpush.bf16.msrb.mxu2 %v1402_v40  ;;  %1524 = vmatpush.bf16.msrb.mxu0 %v1402_v40 }
 0x272   : > { %1428 = vmatpush.bf16.msrb.mxu2 %v1401_v10  ;;  %1525 = vmatpush.bf16.msrb.mxu0 %v1401_v10 }
 0x275   : > { %v6052_v13 = vpop.f32.mrf.mxu3 }
 0x276   : > { %1429 = vmatpush.bf16.msrb.mxu2 %v1400_v7  ;;  %1526 = vmatpush.bf16.msrb.mxu0 %v1400_v7 }
 0x27a   : > { %1430 = vmatpush.bf16.msrb.mxu2 %v1399_v19  ;;  %1527 = vmatpush.bf16.msrb.mxu0 %v1399_v19 }
 0x27d   : > { %v6055_v37 = vpop.f32.mrf.mxu3 }
 0x27e   : > { %1431 = vmatpush.bf16.msrb.mxu2 %v6022_v48  ;;  %1528 = vmatpush.bf16.msrb.mxu0 %v6022_v48 }
 0x282   : > { %1432 = vmatpush.bf16.msrb.mxu2 %v6013_v12  ;;  %1529 = vmatpush.bf16.msrb.mxu0 %v6013_v12 }
 0x285   : > { %v6061_v43 = vpop.f32.mrf.mxu3 }
 0x286   : > { %1433 = vmatpush.bf16.msrb.mxu2 %v6004_v46  ;;  %1530 = vmatpush.bf16.msrb.mxu0 %v6004_v46 }
 0x28a   : > { %1434 = vmatpush.bf16.msrb.mxu2 %v5995_v14  ;;  %1531 = vmatpush.bf16.msrb.mxu0 %v5995_v14 }
 0x28d   : > { %v6067_v40 = vpop.f32.mrf.mxu3  ;;  %1532 = vmatmul.bf16.vlgmr.msrb.gmra.mxu0 %v5779_v20 }
 0x295   : > { %v1229_v36 = vpop.f32.mrf.mxu3 }
 0x29d   : > { %v1232_v48 = vpop.f32.mrf.mxu3  ;;  %1537 = vmatmul.bf16.gmra.mxu0 %v5789_v26 }
 0x2a5   : > { %v1234_v15 = vpop.f32.mrf.mxu3 }
 0x2ad   : > { %v1237_v12 = vpop.f32.mrf.mxu3  ;;  %1542 = vmatmul.bf16.gmra.mxu0 %v5799_v32 }
 0x2b5   : > { %v1239_v2 = vpop.f32.mrf.mxu3 }
 0x2bd   : > { %v1242_v10 = vpop.f32.mrf.mxu3  ;;  %1547 = vmatmul.bf16.gmra.mxu0 %v5809_v38 }
 0x2be   : > { %v1283_v38 = vmax.f32 %v1242_v10, 0.0  ;;  %v1280_v10 = vmax.f32 %v1234_v15, 0.0  ;;  %v1277_v15 = vmax.f32 %v6067_v40, 0.0  ;;  %v1274_v40 = vmax.f32 %v6052_v13, 0.0 }
 0x2c5   : > { %v1244_v46 = vpop.f32.mrf.mxu3 }
 0x2c6   : > { %v1284_v32 = vmax.f32 %v1244_v46, 0.0  ;;  %v1281_v46 = vmax.f32 %v1237_v12, 0.0 }
 0x2cd   : > { %v1247_v3 = vpop.f32.mrf.mxu3  ;;  %1552 = vmatmul.bf16.gmra.mxu0 %v5819_v44 }
 0x2ce   : > { %v1285_v19 = vmax.f32 %v1247_v3, 0.0 }
 0x2d0   : > { %v6081_v16 = vpack.c.bf16 %v1285_v19, %v1285_v19  ;;  %v6095_v19 = vpack.c.bf16 %v1281_v46, %v1281_v46 }
 0x2d5   : > { %v1249_v14 = vpop.f32.mrf.mxu3 }
 0x2d6   : > { %v1286_v52 = vmax.f32 %v1249_v14, 0.0 }
 0x2d8   : > { %v6077_v17 = vpack.c.bf16 %v1286_v52, %v1286_v52 }
 0x2da   : > { %v1392_v3 = vunpack.c.l.b16 %v6077_v17 }
 0x2dd   : > { %v1252_v4 = vpop.f32.mrf.mxu3  ;;  %1557 = vmatmul.bf16.gmra.mxu0 %v5829_v50  ;;  %v1282_v50 = vmax.f32 %v1239_v2, 0.0 }
 0x2de   : > { %v1287_v7 = vmax.f32 %v1252_v4, 0.0  ;;  %v6085_v4 = vpack.c.bf16 %v1284_v32, %v1284_v32  ;;  %v1279_v32 = vmax.f32 %v1232_v48, 0.0  ;;  %v1276_v48 = vmax.f32 %v6061_v43, 0.0 }
 0x2df   : > { %v6092_v52 = vpack.c.bf16 %v1282_v50, %v1282_v50 }
 0x2e0   : > { %v6075_v26 = vpack.c.bf16 %v1287_v7, %v1287_v7  ;;  %v6089_v7 = vpack.c.bf16 %v1283_v38, %v1283_v38  ;;  %v1390_v2 = vunpack.c.l.b16 %v6085_v4  ;;  %v6098_v38 = vpack.c.bf16 %v1280_v10, %v1280_v10 }
 0x2e1   : > { %v6102_v50 = vpack.c.bf16 %v1279_v32, %v1279_v32  ;;  %v6110_v10 = vpack.c.bf16 %v1277_v15, %v1277_v15 }
 0x2e2   : > { %v1393_v44 = vunpack.c.l.b16 %v6075_v26 }
 0x2e5   : > { %v1254_v18 = vpop.f32.mrf.mxu3 }
 0x2e6   : > { %v1288_v20 = vmax.f32 %v1254_v18, 0.0 }
 0x2e8   : > { %v6079_v61 = vpack.c.bf16 %v1288_v20, %v1288_v20  ;;  %v1391_v20 = vunpack.c.l.b16 %v6081_v16 }
 0x2ea   : > { %v1394_v23 = vunpack.c.l.b16 %v6079_v61  ;;  %v1409_v18 = vpack.c.b16 %v1392_v3, %v1391_v20  ;;  %v1275_v20 = vmax.f32 %v6055_v37, 0.0  ;;  %v1383_v37 = vunpack.c.l.b16 %v6110_v10 }
 0x2ec   : > { %v1410_v14 = vpack.c.b16 %v1394_v23, %v1393_v44  ;;  %v1389_v44 = vunpack.c.l.b16 %v6089_v7  ;;  %v1278_v23 = vmax.f32 %v1229_v36, 0.0  ;;  %v1386_v36 = vunpack.c.l.b16 %v6098_v38 }
 0x2ed   : > { %1562 = vmatmul.bf16.gmra.mxu0 %v5839_v56  ;;  %v1388_v56 = vunpack.c.l.b16 %v6092_v52 }
 0x2ee   : > { %1441 = vmatpush.bf16.msrb.mxu3 %v1410_v14  ;;  %1613 = vmatpush.bf16.msrb.mxu1 %v1410_v14  ;;  %v1408_v12 = vpack.c.b16 %v1390_v2, %v1389_v44  ;;  %v1387_v14 = vunpack.c.l.b16 %v6095_v19  ;;  %v6106_v3 = vpack.c.bf16 %v1278_v23, %v1278_v23  ;;  %v6114_v2 = vpack.c.bf16 %v1276_v48, %v1276_v48 }
 0x2ef   : > { %v6119_v44 = vpack.c.bf16 %v1275_v20, %v1275_v20  ;;  %v6122_v23 = vpack.c.bf16 %v1274_v40, %v1274_v40 }
 0x2f0   : > { %v1407_v46 = vpack.c.b16 %v1388_v56, %v1387_v14  ;;  %v1384_v43 = vunpack.c.l.b16 %v6106_v3  ;;  %v1273_v56 = vmax.f32 %v6040_v49, 0.0  ;;  %v1382_v13 = vunpack.c.l.b16 %v6114_v2 }
 0x2f1   : > { %v1381_v14 = vunpack.c.l.b16 %v6119_v44  ;;  %v1380_v49 = vunpack.c.l.b16 %v6122_v23 }
 0x2f2   : > { %1442 = vmatpush.bf16.msrb.mxu3 %v1409_v18  ;;  %1614 = vmatpush.bf16.msrb.mxu1 %v1409_v18  ;;  %v1385_v18 = vunpack.c.l.b16 %v6102_v50  ;;  %v6125_v15 = vpack.c.bf16 %v1273_v56, %v1273_v56 }
 0x2f3   : > { %v1404_v48 = vpack.c.b16 %v1382_v13, %v1381_v14 }
 0x2f4   : > { %v1406_v32 = vpack.c.b16 %v1386_v36, %v1385_v18  ;;  %v1379_v36 = vunpack.c.l.b16 %v6125_v15 }
 0x2f6   : > { %1443 = vmatpush.bf16.msrb.mxu3 %v1408_v12  ;;  %1615 = vmatpush.bf16.msrb.mxu1 %v1408_v12  ;;  %v1405_v12 = vpack.c.b16 %v1384_v43, %v1383_v37  ;;  %v1403_v20 = vpack.c.b16 %v1380_v49, %v1379_v36  ;;  %v1461_v43 = vunpack.c.l.bf16 %v5990_v11  ;;  %v1463_v49 = vunpack.c.l.bf16 %v5999_v41 }
 0x2f8   : > { %v1493_v56 = vmul.f32 33.0, %v1461_v43 }
 0x2fa   : > { %1444 = vmatpush.bf16.msrb.mxu3 %v1407_v46  ;;  %1616 = vmatpush.bf16.msrb.mxu1 %v1407_v46  ;;  %v1460_v46 = vunpack.c.l.bf16 %v5988_v5  ;;  %v1462_v5 = vunpack.c.l.bf16 %v5997_v29  ;;  %v1465_v29 = vunpack.c.l.bf16 %v6008_v6  ;;  %v5129_v6 = vld [vmem:[%s7063_s1] sm:$0xf] }
 0x2fc   : > { %v1492_v18 = vmul.f32 33.0, %v1460_v46  ;;  %v1494_v13 = vmul.f32 33.0, %v1462_v5  ;;  %v1495_v46 = vmul.f32 33.0, %v1463_v49 }
 0x2fd   : > { %1567 = vmatmul.bf16.gmra.mxu0 %v5855_v0 }
 0x2fe   : > { %1445 = vmatpush.bf16.msrb.mxu3 %v1406_v32  ;;  %1617 = vmatpush.bf16.msrb.mxu1 %v1406_v32 }
 0x302   : > { %1446 = vmatpush.bf16.msrb.mxu3 %v1405_v12  ;;  %1618 = vmatpush.bf16.msrb.mxu1 %v1405_v12 }
 0x306   : > { %1447 = vmatpush.bf16.msrb.mxu3 %v1404_v48  ;;  %1619 = vmatpush.bf16.msrb.mxu1 %v1404_v48 }
 0x30a   : > { %1448 = vmatpush.bf16.msrb.mxu3 %v1403_v20  ;;  %v1533_v40 = vpop.f32.mrf.mxu0  ;;  %1620 = vmatpush.bf16.msrb.mxu1 %v1403_v20 }
 0x30b   : > { %v1534_v32 = vadd.f32 %v1533_v40, %v1492_v18  ;;  %v1464_v18 = vunpack.c.l.bf16 %v6006_v55  ;;  %v1467_v55 = vunpack.c.l.bf16 %v6017_v42 }
 0x30d   : > { %1572 = vmatmul.bf16.gmra.mxu0 %v5866_v8  ;;  %1621 = vmatmul.bf16.vlgmr.msrb.gmra.mxu1 %v5781_v21  ;;  %v1496_v11 = vmul.f32 33.0, %v1464_v18 }
 0x312   : > { %v1535_v37 = vpop.f32.mrf.mxu0 }
 0x313   : > { %v1536_v12 = vadd.f32 %v1535_v37, %v1493_v56  ;;  %v1497_v56 = vmul.f32 33.0, %v1465_v29 }
 0x31a   : > { %v1538_v14 = vpop.f32.mrf.mxu0 }
 0x31b   : > { %v1539_v48 = vadd.f32 %v1538_v14, %v1494_v13  ;;  %v1466_v13 = vunpack.c.l.bf16 %v6015_v28  ;;  %v5467_v28 = vld [vmem:[%s7063_s1 + $0x4] sm:$0xf0] }
 0x31c   : > { %v6157_v42 = vor.u32 %v5467_v28, %v5129_v6 }
 0x31d   : > { %1577 = vmatmul.bf16.gmra.mxu0 %v5878_v34  ;;  %1626 = vmatmul.bf16.gmra.mxu1 %v5791_v27  ;;  %v1498_v41 = vmul.f32 33.0, %v1466_v13 }
 0x31e   : > { %7148 = vst [vmem:[#allocation27_spill] sm:$0xff] %v6157_v42  ;;  %1435 = vmatmul.bf16.vlgmr.msrb.gmra.mxu2 %v6157_v42 }
 0x322   : > { %v1540_v36 = vpop.f32.mrf.mxu0 }
 0x323   : > { %v1541_v20 = vadd.f32 %v1540_v36, %v1495_v46  ;;  %v1499_v46 = vmul.f32 33.0, %v1467_v55 }
 0x32a   : > { %v1543_v40 = vpop.f32.mrf.mxu0 }
 0x32b   : > { %v1544_v43 = vadd.f32 %v1543_v40, %v1496_v11  ;;  %v5466_v11 = vld [vmem:[%s7063_s1 + $0x4] sm:$0xf]  ;;  %v5131_v40 = vld [vmem:[%s7063_s1 + $0x8] sm:$0xf0] }
 0x32c   : > { %v6162_v29 = vor.u32 %v5466_v11, %v5131_v40 }
 0x32d   : > { %1582 = vmatmul.bf16.gmra.mxu0 %v5890_v62  ;;  %1631 = vmatmul.bf16.gmra.mxu1 %v5801_v33 }
 0x32e   : > { %1449 = vmatmul.bf16.vlgmr.msrb.gmra.mxu3 %v6162_v29 }
 0x332   : > { %v1545_v37 = vpop.f32.mrf.mxu0 }
 0x333   : > { %v1546_v5 = vadd.f32 %v1545_v37, %v1497_v56  ;;  %v5491_v56 = vld [vmem:[%s7065_s3 + $0x18] sm:$0xff]  ;;  %v5490_v37 = vld [vmem:[%s7065_s3 + $0x10] sm:$0xff] }
 0x334   : > { %1789 = vmatpush.bf16.msra.mxu2 %v5491_v56 }
 0x338   : > { %1790 = vmatpush.bf16.msra.mxu2 %v5490_v37 }
 0x33a   : > { %v1548_v14 = vpop.f32.mrf.mxu0 }
 0x33b   : > { %v1549_v49 = vadd.f32 %v1548_v14, %v1498_v41 }
 0x33d   : > { %1587 = vmatmul.bf16.gmra.mxu0 %v5902_v24  ;;  %1636 = vmatmul.bf16.gmra.mxu1 %v5811_v39 }
 0x342   : > { %v1550_v36 = vpop.f32.mrf.mxu0 }
 0x343   : > { %v1551_v18 = vadd.f32 %v1550_v36, %v1499_v46 }
 0x34a   : > { %v1553_v36 = vpop.f32.mrf.mxu0 }
 0x34d   : > { %1592 = vmatmul.bf16.gmra.mxu0 %v5914_v58  ;;  %1641 = vmatmul.bf16.gmra.mxu1 %v5821_v45 }
 0x352   : > { %v1555_v28 = vpop.f32.mrf.mxu0 }
 0x35d   : > { %1597 = vmatmul.bf16.gmra.mxu0 %v5926_v22  ;;  %1646 = vmatmul.bf16.gmra.mxu1 %v5831_v51 }
 0x36d   : > { %1602 = vmatmul.bf16.gmra.mxu0 %v5938_v60  ;;  %1651 = vmatmul.bf16.gmra.mxu1 %v5841_v57 }
 0x37d   : > { %1607 = vmatmul.bf16.gmra.mxu0 %v5950_v30  ;;  %1656 = vmatmul.bf16.gmra.mxu1 %v5857_v1  ;;  %v1558_v30 = vpop.f32.mrf.mxu0 }
 0x38a   : > { %v1622_v13 = vpop.f32.mrf.mxu1 }
 0x38b   : > { %v1623_v14 = vadd.f32 %v1622_v13, %v1534_v32 }
 0x38d   : > { %1661 = vmatmul.bf16.gmra.mxu1 %v5868_v9 }
 0x392   : > { %v1624_v41 = vpop.f32.mrf.mxu1 }
 0x393   : > { %v1625_v55 = vadd.f32 %v1624_v41, %v1536_v12  ;;  %v1560_v41 = vpop.f32.mrf.mxu0 }
 0x395   : > { %v1702_v46 = vpack.c.bf16 %v1625_v55, %v1623_v14 }
 0x397   : > { %5147 = vmatmul.msk.bf16.vlgmr.msra.gmra.mxu2 %vm918_vm0, %v1702_v46 }
 0x39a   : > { %v1627_v6 = vpop.f32.mrf.mxu1 }
 0x39b   : > { %v1628_v40 = vadd.f32 %v1627_v6, %v1539_v48  ;;  %v1563_v46 = vpop.f32.mrf.mxu0 }
 0x39d   : > { %1666 = vmatmul.bf16.gmra.mxu1 %v5880_v35 }
 0x3a2   : > { %v1629_v11 = vpop.f32.mrf.mxu1 }
 0x3a3   : > { %v1630_v56 = vadd.f32 %v1629_v11, %v1541_v20 }
 0x3a5   : > { %v1703_v37 = vpack.c.bf16 %v1630_v56, %v1628_v40  ;;  %v1565_v40 = vpop.f32.mrf.mxu0 }
 0x3a7   : > { %5148 = vmatmul.msk.bf16.gmra.mxu2 %vm918_vm0, %v1703_v37  ;;  %v1468_v37 = vunpack.c.l.bf16 %v6048_v54  ;;  %v1471_v54 = vunpack.c.l.bf16 %v6037_v47  ;;  %v5488_v47 = vld [vmem:[%s7067_s5] sm:$0xff] }
 0x3aa   : > { %v1632_v1 = vpop.f32.mrf.mxu1 }
 0x3ab   : > { %v1633_v12 = vadd.f32 %v1632_v1, %v1544_v43  ;;  %v1469_v1 = vunpack.c.l.bf16 %v6045_v31  ;;  %v1500_v43 = vmul.f32 33.0, %v1468_v37  ;;  %v7149_v31 = vld [vmem:[#allocation18_spill] sm:$0xff] }
 0x3ad   : > { %1671 = vmatmul.bf16.gmra.mxu1 %v5892_v63 }
 0x3b2   : > { %v1634_v32 = vpop.f32.mrf.mxu1 }
 0x3b3   : > { %v1635_v13 = vadd.f32 %v1634_v32, %v1546_v5  ;;  %v1501_v5 = vmul.f32 33.0, %v1469_v1  ;;  %v1554_v32 = vadd.f32 %v1553_v36, %v1500_v43 }
 0x3b5   : > { %v1704_v14 = vpack.c.bf16 %v1635_v13, %v1633_v12  ;;  %v1556_v12 = vadd.f32 %v1555_v28, %v1501_v5 }
 0x3b7   : > { %5149 = vmatmul.msk.bf16.gmra.mxu2 %vm918_vm0, %v1704_v14  ;;  %v1568_v14 = vpop.f32.mrf.mxu0 }
 0x3ba   : > { %v1637_v55 = vpop.f32.mrf.mxu1 }
 0x3bb   : > { %v1638_v20 = vadd.f32 %v1637_v55, %v1549_v49 }
 0x3bd   : > { %1676 = vmatmul.bf16.gmra.mxu1 %v5904_v25 }
 0x3c2   : > { %v1639_v48 = vpop.f32.mrf.mxu1 }
 0x3c3   : > { %v1640_v6 = vadd.f32 %v1639_v48, %v1551_v18  ;;  %v1470_v48 = vunpack.c.l.bf16 %v6042_v53 }
 0x3c5   : > { %v1705_v11 = vpack.c.bf16 %v1640_v6, %v1638_v20  ;;  %v1570_v20 = vpop.f32.mrf.mxu0  ;;  %v1502_v6 = vmul.f32 33.0, %v1470_v48 }
 0x3c7   : > { %5150 = vmatmul.msk.bf16.gmra.mxu2 %vm918_vm0, %v1705_v11  ;;  %v1503_v11 = vmul.f32 33.0, %v1471_v54  ;;  %v1559_v37 = vadd.f32 %v1558_v30, %v1502_v6  ;;  %v7150_v30 = vld [vmem:[#allocation26_spill] sm:$0xff] }
 0x3c9   : > { %v1561_v36 = vadd.f32 %v1560_v41, %v1503_v11  ;;  %v1472_v41 = vunpack.c.l.bf16 %v7150_v30 }
 0x3ca   : > { %v1642_v56 = vpop.f32.mrf.mxu1 }
 0x3cb   : > { %v1643_v25 = vadd.f32 %v1642_v56, %v1554_v32  ;;  %v7151_v32 = vld [vmem:[#allocation24_spill] sm:$0xff] }
 0x3cd   : > { %1681 = vmatmul.bf16.gmra.mxu1 %v5916_v59  ;;  %v1573_v5 = vpop.f32.mrf.mxu0 }
 0x3d2   : > { %v1644_v13 = vpop.f32.mrf.mxu1 }
 0x3d3   : > { %v1645_v49 = vadd.f32 %v1644_v13, %v1556_v12  ;;  %v1473_v12 = vunpack.c.l.bf16 %v7151_v32  ;;  %v7152_v13 = vld [vmem:[#allocation20_spill] sm:$0xff] }
 0x3d5   : > { %v1706_v18 = vpack.c.bf16 %v1645_v49, %v1643_v25  ;;  %v5489_v25 = vld [vmem:[%s7067_s5 + $0x8] sm:$0xff]  ;;  %v1504_v49 = vmul.f32 33.0, %v1472_v41  ;;  %v1575_v54 = vpop.f32.mrf.mxu0 }
 0x3d6   : > { %2318 = vmatpush.bf16.msra.mxu1 %v5489_v25  ;;  %v7153_v25 = vld [vmem:[#allocation23_spill] sm:$0xff] }
 0x3d7   : > { %5151 = vmatmul.msk.bf16.gmra.mxu2 %vm918_vm0, %v1706_v18  ;;  %v1505_v18 = vmul.f32 33.0, %v1473_v12 }
 0x3d9   : > { %v1566_v48 = vadd.f32 %v1565_v40, %v1505_v18  ;;  %v7155_v40 = vld [vmem:[#allocation22_spill] sm:$0xff] }
 0x3da   : > { %v1647_v55 = vpop.f32.mrf.mxu1  ;;  %2319 = vmatpush.bf16.msra.mxu1 %v5488_v47  ;;  %v7154_v47 = vld [vmem:[#allocation25_spill] sm:$0xff] }
 0x3db   : > { %v1648_v1 = vadd.f32 %v1647_v55, %v1559_v37  ;;  %v1564_v55 = vadd.f32 %v1563_v46, %v1504_v49  ;;  %v1475_v30 = vunpack.c.l.bf16 %v7154_v47  ;;  %v5493_v46 = vld [vmem:[%s7066_s4 + $0x18] sm:$0xff] }
 0x3dc   : > { %1991 = vmatpush.bf16.msra.mxu3 %v5493_v46 }
 0x3dd   : > { %1686 = vmatmul.bf16.gmra.mxu1 %v7149_v31  ;;  %v1578_v32 = vpop.f32.mrf.mxu0  ;;  %v1507_v41 = vmul.f32 33.0, %v1475_v30 }
 0x3df   : > { %v1571_v49 = vadd.f32 %v1570_v20, %v1507_v41  ;;  %v1477_v20 = vunpack.c.l.bf16 %v6122_v23  ;;  %v1479_v23 = vunpack.c.l.bf16 %v6114_v2  ;;  %v1480_v2 = vunpack.c.l.bf16 %v6110_v10 }
 0x3e2   : > { %v1649_v28 = vpop.f32.mrf.mxu1 }
 0x3e3   : > { %v1650_v43 = vadd.f32 %v1649_v28, %v1561_v36  ;;  %v1436_v28 = vpop.f32.mrf.mxu2 }
 0x3e5   : > { %v1707_v56 = vpack.c.bf16 %v1650_v43, %v1648_v1  ;;  %v1450_v1 = vpop.f32.mrf.mxu3 }
 0x3e7   : > { %5152 = vmatmul.msk.bf16.gmra.mxu2 %vm918_vm0, %v1707_v56  ;;  %v1474_v56 = vunpack.c.l.bf16 %v7153_v25  ;;  %v1451_v25 = vadd.f32 %v1450_v1, %v1436_v28 }
 0x3ea   : > { %v1652_v53 = vpop.f32.mrf.mxu1 }
 0x3eb   : > { %v1653_v11 = vadd.f32 %v1652_v53, %v1564_v55  ;;  %v1506_v53 = vmul.f32 33.0, %v1474_v56  ;;  %v1438_v18 = vpop.f32.mrf.mxu2 }
 0x3ed   : > { %1691 = vmatmul.bf16.gmra.mxu1 %v7152_v13  ;;  %v1569_v12 = vadd.f32 %v1568_v14, %v1506_v53  ;;  %v1476_v14 = vunpack.c.l.bf16 %v6125_v15  ;;  %v1509_v53 = vmul.f32 33.0, %v1477_v20  ;;  %v1478_v15 = vunpack.c.l.bf16 %v6119_v44 }
 0x3ef   : > { %v1508_v46 = vmul.f32 33.0, %v1476_v14 }
 0x3f2   : > { %v1654_v6 = vpop.f32.mrf.mxu1 }
 0x3f3   : > { %v1655_v37 = vadd.f32 %v1654_v6, %v1566_v48  ;;  %v1452_v48 = vpop.f32.mrf.mxu3  ;;  %v5492_v6 = vld [vmem:[%s7066_s4 + $0x10] sm:$0xff] }
 0x3f4   : > { %1992 = vmatpush.bf16.msra.mxu3 %v5492_v6  ;;  %v1453_v13 = vadd.f32 %v1452_v48, %v1438_v18  ;;  %v1510_v6 = vmul.f32 33.0, %v1478_v15 }
 0x3f5   : > { %v1708_v36 = vpack.c.bf16 %v1655_v37, %v1653_v11 }
 0x3f6   : > { %v1455_v56 = vpack.c.bf16 %v1453_v13, %v1451_v25 }
 0x3f7   : > { %5153 = vmatmul.msk.bf16.gmra.mxu2 %vm918_vm0, %v1708_v36  ;;  %v1580_v36 = vpop.f32.mrf.mxu0 }
 0x3fa   : > { %v1657_v43 = vpop.f32.mrf.mxu1 }
 0x3fb   : > { %v1658_v11 = vadd.f32 %v1657_v43, %v1569_v12  ;;  %v1574_v43 = vadd.f32 %v1573_v5, %v1508_v46  ;;  %v1576_v12 = vadd.f32 %v1575_v54, %v1509_v53 }
 0x3fd   : > { %1696 = vmatmul.bf16.gmra.mxu1 %v7155_v40  ;;  %v7166_v40 = vld [vmem:[#allocation9_spill] sm:$0xff] }
 0x3ff   : > { %v1583_v41 = vpop.f32.mrf.mxu0 }
 0x402   : > { %v1659_v55 = vpop.f32.mrf.mxu1 }
 0x403   : > { %v1660_v37 = vadd.f32 %v1659_v55, %v1571_v49 }
 0x405   : > { %v1709_v47 = vpack.c.bf16 %v1660_v37, %v1658_v11  ;;  %v1511_v11 = vmul.f32 33.0, %v1479_v23  ;;  %v1579_v37 = vadd.f32 %v1578_v32, %v1510_v6  ;;  %v1481_v32 = vunpack.c.l.bf16 %v6106_v3 }
 0x407   : > { %5154 = vmatmul.msk.bf16.gmra.mxu2 %vm918_vm0, %v1709_v47  ;;  %v1585_v18 = vpop.f32.mrf.mxu0  ;;  %v1581_v25 = vadd.f32 %v1580_v36, %v1511_v11 }
 0x40a   : > { %v1662_v30 = vpop.f32.mrf.mxu1 }
 0x40b   : > { %v1663_v55 = vadd.f32 %v1662_v30, %v1574_v43 }
 0x40d   : > { %5212 = vmatmul.msk.bf16.vlgmr.msra.gmra.mxu1 %vm918_vm0, %v1455_v56 }
 0x40f   : > { %v1588_v54 = vpop.f32.mrf.mxu0 }
 0x412   : > { %v1664_v49 = vpop.f32.mrf.mxu1 }
 0x413   : > { %v1665_v28 = vadd.f32 %v1664_v49, %v1576_v12  ;;  %v1512_v12 = vmul.f32 33.0, %v1480_v2  ;;  %v1513_v49 = vmul.f32 33.0, %v1481_v32 }
 0x415   : > { %v1710_v1 = vpack.c.bf16 %v1665_v28, %v1663_v55  ;;  %v1584_v55 = vadd.f32 %v1583_v41, %v1512_v12  ;;  %v1586_v28 = vadd.f32 %v1585_v18, %v1513_v49  ;;  %v1483_v41 = vunpack.c.l.bf16 %v6098_v38 }
 0x416   : > { %v1484_v38 = vunpack.c.l.bf16 %v6095_v19 }
 0x417   : > { %5155 = vmatmul.msk.bf16.gmra.mxu2 %vm918_vm0, %v1710_v1  ;;  %v1590_v36 = vpop.f32.mrf.mxu0 }
 0x41a   : > { %v1667_v13 = vpop.f32.mrf.mxu1  ;;  %v1792_v48 = vpop.f32.mrf.mxu2 }
 0x41b   : > { %v1668_v56 = vadd.f32 %v1667_v13, %v1579_v37  ;;  %v1872_v30 = vmax.f32 %v1792_v48, 0.0 }
 0x422   : > { %v1669_v47 = vpop.f32.mrf.mxu1  ;;  %v1794_v5 = vpop.f32.mrf.mxu2 }
 0x423   : > { %v1670_v14 = vadd.f32 %v1669_v47, %v1581_v25  ;;  %v1873_v20 = vmax.f32 %v1794_v5, 0.0  ;;  %v1593_v25 = vpop.f32.mrf.mxu0  ;;  %v1482_v47 = vunpack.c.l.bf16 %v6102_v50  ;;  %v1515_v5 = vmul.f32 33.0, %v1483_v41 }
 0x424   : > { %v1486_v41 = vunpack.c.l.bf16 %v6089_v7 }
 0x425   : > { %v1711_v46 = vpack.c.bf16 %v1670_v14, %v1668_v56  ;;  %v1904_v53 = vpack.c.bf16 %v1873_v20, %v1872_v30  ;;  %v1514_v18 = vmul.f32 33.0, %v1482_v47  ;;  %v1591_v30 = vadd.f32 %v1590_v36, %v1515_v5 }
 0x427   : > { %5156 = vmatmul.msk.bf16.gmra.mxu2 %vm918_vm0, %v1711_v46  ;;  %5175 = vmatmul.msk.bf16.vlgmr.msra.gmra.mxu3 %vm918_vm0, %v1904_v53  ;;  %v1589_v56 = vadd.f32 %v1588_v54, %v1514_v18  ;;  %v1485_v54 = vunpack.c.l.bf16 %v6092_v52  ;;  %v1518_v18 = vmul.f32 33.0, %v1486_v41 }
 0x42a   : > { %v1672_v44 = vpop.f32.mrf.mxu1  ;;  %v1797_v43 = vpop.f32.mrf.mxu2 }
 0x42b   : > { %v1673_v48 = vadd.f32 %v1672_v44, %v1584_v55  ;;  %v1874_v15 = vmax.f32 %v1797_v43, 0.0  ;;  %v1595_v14 = vpop.f32.mrf.mxu0  ;;  %v1516_v55 = vmul.f32 33.0, %v1484_v38  ;;  %v1489_v38 = vunpack.c.l.bf16 %v6077_v17 }
 0x42c   : > { %v1490_v17 = vunpack.c.l.bf16 %v6075_v26 }
 0x432   : > { %v1674_v1 = vpop.f32.mrf.mxu1  ;;  %v1799_v13 = vpop.f32.mrf.mxu2 }
 0x433   : > { %v1675_v23 = vadd.f32 %v1674_v1, %v1586_v28  ;;  %v1875_v6 = vmax.f32 %v1799_v13, 0.0  ;;  %v1598_v36 = vpop.f32.mrf.mxu0  ;;  %v1517_v28 = vmul.f32 33.0, %v1485_v54  ;;  %v1594_v1 = vadd.f32 %v1593_v25, %v1516_v55 }
 0x434   : > { %v1487_v25 = vunpack.c.l.bf16 %v6085_v4 }
 0x435   : > { %v1712_v11 = vpack.c.bf16 %v1675_v23, %v1673_v48  ;;  %v1905_v37 = vpack.c.bf16 %v1875_v6, %v1874_v15  ;;  %v1596_v13 = vadd.f32 %v1595_v14, %v1517_v28 }
 0x436   : > { %v1519_v5 = vmul.f32 33.0, %v1487_v25 }
 0x437   : > { %5157 = vmatmul.msk.bf16.gmra.mxu2 %vm918_vm0, %v1712_v11  ;;  %5176 = vmatmul.msk.bf16.gmra.mxu3 %vm918_vm0, %v1905_v37 }
 0x43a   : > { %v1677_v10 = vpop.f32.mrf.mxu1  ;;  %v1802_v3 = vpop.f32.mrf.mxu2 }
 0x43b   : > { %v1678_v53 = vadd.f32 %v1677_v10, %v1589_v56  ;;  %v1876_v44 = vmax.f32 %v1802_v3, 0.0  ;;  %v1600_v10 = vpop.f32.mrf.mxu0 }
 0x43c   : > { %v1601_v14 = vadd.f32 %v1600_v10, %v1519_v5 }
 0x442   : > { %v1679_v20 = vpop.f32.mrf.mxu1  ;;  %v1804_v46 = vpop.f32.mrf.mxu2 }
 0x443   : > { %v1680_v43 = vadd.f32 %v1679_v20, %v1591_v30  ;;  %v1877_v2 = vmax.f32 %v1804_v46, 0.0  ;;  %v1603_v56 = vpop.f32.mrf.mxu0  ;;  %v1599_v30 = vadd.f32 %v1598_v36, %v1518_v18  ;;  %v1521_v36 = vmul.f32 33.0, %v1489_v38 }
 0x445   : > { %v1713_v32 = vpack.c.bf16 %v1680_v43, %v1678_v53  ;;  %v1906_v12 = vpack.c.bf16 %v1877_v2, %v1876_v44 }
 0x447   : > { %5158 = vmatmul.msk.bf16.gmra.mxu2 %vm918_vm0, %v1713_v32  ;;  %5177 = vmatmul.msk.bf16.gmra.mxu3 %vm918_vm0, %v1906_v12 }
 0x44a   : > { %v1682_v50 = vpop.f32.mrf.mxu1  ;;  %v1807_v49 = vpop.f32.mrf.mxu2 }
 0x44b   : > { %v1683_v23 = vadd.f32 %v1682_v50, %v1594_v1  ;;  %v1878_v6 = vmax.f32 %v1807_v49, 0.0  ;;  %v1605_v7 = vpop.f32.mrf.mxu0  ;;  %v1488_v49 = vunpack.c.l.bf16 %v6081_v16 }
 0x44c   : > { %v1606_v28 = vadd.f32 %v1605_v7, %v1521_v36 }
 0x44d   : > { %v1520_v54 = vmul.f32 33.0, %v1488_v49 }
 0x44f   : > { %v1604_v55 = vadd.f32 %v1603_v56, %v1520_v54 }
 0x452   : > { %v1684_v48 = vpop.f32.mrf.mxu1  ;;  %v1809_v15 = vpop.f32.mrf.mxu2 }
 0x453   : > { %v1685_v11 = vadd.f32 %v1684_v48, %v1596_v13  ;;  %v1879_v37 = vmax.f32 %v1809_v15, 0.0 }
 0x455   : > { %v1714_v3 = vpack.c.bf16 %v1685_v11, %v1683_v23  ;;  %v1907_v47 = vpack.c.bf16 %v1879_v37, %v1878_v6  ;;  %v1608_v11 = vpop.f32.mrf.mxu0 }
 0x457   : > { %5159 = vmatmul.msk.bf16.gmra.mxu2 %vm918_vm0, %v1714_v3  ;;  %5178 = vmatmul.msk.bf16.gmra.mxu3 %vm918_vm0, %v1907_v47  ;;  %v1491_v47 = vunpack.c.l.bf16 %v6079_v61 }
 0x459   : > { %v1523_v41 = vmul.f32 33.0, %v1491_v47 }
 0x45a   : > { %v1687_v19 = vpop.f32.mrf.mxu1  ;;  %v1812_v52 = vpop.f32.mrf.mxu2 }
 0x45b   : > { %v1688_v53 = vadd.f32 %v1687_v19, %v1599_v30  ;;  %v1880_v44 = vmax.f32 %v1812_v52, 0.0  ;;  %v1522_v52 = vmul.f32 33.0, %v1490_v17 }
 0x45d   : > { %v1610_v19 = vpop.f32.mrf.mxu0  ;;  %v1609_v25 = vadd.f32 %v1608_v11, %v1522_v52 }
 0x45e   : > { %v1611_v18 = vadd.f32 %v1610_v19, %v1523_v41 }
 0x462   : > { %v1689_v20 = vpop.f32.mrf.mxu1  ;;  %v1814_v46 = vpop.f32.mrf.mxu2 }
 0x463   : > { %v1690_v43 = vadd.f32 %v1689_v20, %v1601_v14  ;;  %v1881_v2 = vmax.f32 %v1814_v46, 0.0 }
 0x465   : > { %v1715_v32 = vpack.c.bf16 %v1690_v43, %v1688_v53  ;;  %v1908_v12 = vpack.c.bf16 %v1881_v2, %v1880_v44 }
 0x467   : > { %5160 = vmatmul.msk.bf16.gmra.mxu2 %vm918_vm0, %v1715_v32  ;;  %5179 = vmatmul.msk.bf16.gmra.mxu3 %vm918_vm0, %v1908_v12 }
 0x46a   : > { %v1692_v50 = vpop.f32.mrf.mxu1  ;;  %v1817_v4 = vpop.f32.mrf.mxu2 }
 0x46b   : > { %v1693_v48 = vadd.f32 %v1692_v50, %v1604_v55  ;;  %v1882_v15 = vmax.f32 %v1817_v4, 0.0 }
 0x472   : > { %v1694_v1 = vpop.f32.mrf.mxu1  ;;  %v1819_v13 = vpop.f32.mrf.mxu2 }
 0x473   : > { %v1695_v23 = vadd.f32 %v1694_v1, %v1606_v28  ;;  %v1883_v6 = vmax.f32 %v1819_v13, 0.0 }
 0x475   : > { %v1716_v37 = vpack.c.bf16 %v1695_v23, %v1693_v48  ;;  %v1909_v10 = vpack.c.bf16 %v1883_v6, %v1882_v15 }
 0x477   : > { %5161 = vmatmul.msk.bf16.gmra.mxu2 %vm918_vm0, %v1716_v37  ;;  %5180 = vmatmul.msk.bf16.gmra.mxu3 %vm918_vm0, %v1909_v10 }
 0x47a   : > { %v1697_v16 = vpop.f32.mrf.mxu1  ;;  %v1822_v3 = vpop.f32.mrf.mxu2 }
 0x47b   : > { %v1698_v30 = vadd.f32 %v1697_v16, %v1609_v25  ;;  %v1884_v14 = vmax.f32 %v1822_v3, 0.0 }
 0x482   : > { %v1699_v5 = vpop.f32.mrf.mxu1  ;;  %v1824_v56 = vpop.f32.mrf.mxu2 }
 0x483   : > { %v1700_v20 = vadd.f32 %v1699_v5, %v1611_v18  ;;  %v1885_v46 = vmax.f32 %v1824_v56, 0.0 }
 0x485   : > { %v1717_v53 = vpack.c.bf16 %v1700_v20, %v1698_v30  ;;  %v1910_v44 = vpack.c.bf16 %v1885_v46, %v1884_v14 }
 0x487   : > { %5162 = vmatmul.msk.bf16.gmra.mxu2 %vm918_vm0, %v1717_v53  ;;  %5181 = vmatmul.msk.bf16.gmra.mxu3 %vm918_vm0, %v1910_v44 }
 0x48a   : > { %v1827_v26 = vpop.f32.mrf.mxu2 }
 0x48b   : > { %v1886_v61 = vmax.f32 %v1827_v26, 0.0 }
 0x492   : > { %v1829_v43 = vpop.f32.mrf.mxu2 }
 0x493   : > { %v1887_v2 = vmax.f32 %v1829_v43, 0.0 }
 0x495   : > { %v1911_v32 = vpack.c.bf16 %v1887_v2, %v1886_v61 }
 0x497   : > { %5182 = vmatmul.msk.bf16.gmra.mxu3 %vm918_vm0, %v1911_v32 }
 0x49a   : > { %v1832_v12 = vpop.f32.mrf.mxu2 }
 0x49b   : > { %v1888_v50 = vmax.f32 %v1832_v12, 0.0 }
 0x4a2   : > { %v1834_v7 = vpop.f32.mrf.mxu2 }
 0x4a3   : > { %v1889_v4 = vmax.f32 %v1834_v7, 0.0 }
 0x4a5   : > { %v1912_v49 = vpack.c.bf16 %v1889_v4, %v1888_v50 }
 0x4a7   : > { %5183 = vmatmul.msk.bf16.gmra.mxu3 %vm918_vm0, %v1912_v49 }
 0x4aa   : > { %v1837_v38 = vpop.f32.mrf.mxu2  ;;  %v1994_v54 = vpop.f32.mrf.mxu3 }
 0x4ab   : > { %v2074_v36 = vmax.f32 %v1994_v54, 0.0  ;;  %v1890_v1 = vmax.f32 %v1837_v38, 0.0 }
 0x4ad   : > { %v6248_v13 = vpack.c.bf16 %v2074_v36, %v2074_v36 }
 0x4af   : > { %v2170_v11 = vunpack.c.l.b16 %v6248_v13 }
 0x4b2   : > { %v1839_v55 = vpop.f32.mrf.mxu2  ;;  %v1996_v28 = vpop.f32.mrf.mxu3 }
 0x4b3   : > { %v1891_v48 = vmax.f32 %v1839_v55, 0.0  ;;  %v2075_v15 = vmax.f32 %v1996_v28, 0.0 }
 0x4b5   : > { %v1913_v23 = vpack.c.bf16 %v1891_v48, %v1890_v1  ;;  %v6250_v6 = vpack.c.bf16 %v2075_v15, %v2075_v15 }
 0x4b7   : > { %v2171_v37 = vunpack.c.l.b16 %v6250_v6  ;;  %5184 = vmatmul.msk.bf16.gmra.mxu3 %vm918_vm0, %v1913_v23 }
 0x4b9   : > { %v6255_v10 = vpack.c.b16 %v2171_v37, %v2170_v11 }
 0x4ba   : > { %v1842_v16 = vpop.f32.mrf.mxu2  ;;  %v1999_v3 = vpop.f32.mrf.mxu3 }
 0x4bb   : > { %v2076_v17 = vmax.f32 %v1999_v3, 0.0  ;;  %v1892_v52 = vmax.f32 %v1842_v16, 0.0 }
 0x4bd   : > { %v6257_v41 = vpack.c.bf16 %v2076_v17, %v2076_v17 }
 0x4bf   : > { %v2172_v30 = vunpack.c.l.b16 %v6257_v41 }
 0x4c2   : > { %v1844_v47 = vpop.f32.mrf.mxu2  ;;  %v2001_v19 = vpop.f32.mrf.mxu3 }
 0x4c3   : > { %v1893_v25 = vmax.f32 %v1844_v47, 0.0  ;;  %v2077_v18 = vmax.f32 %v2001_v19, 0.0 }
 0x4c5   : > { %v1914_v5 = vpack.c.bf16 %v1893_v25, %v1892_v52  ;;  %v6259_v56 = vpack.c.bf16 %v2077_v18, %v2077_v18 }
 0x4c7   : > { %v2173_v14 = vunpack.c.l.b16 %v6259_v56  ;;  %5185 = vmatmul.msk.bf16.gmra.mxu3 %vm918_vm0, %v1914_v5 }
 0x4c9   : > { %v6264_v20 = vpack.c.b16 %v2173_v14, %v2172_v30 }
 0x4ca   : > { %v1847_v46 = vpop.f32.mrf.mxu2  ;;  %v2004_v53 = vpop.f32.mrf.mxu3 }
 0x4cb   : > { %v2078_v44 = vmax.f32 %v2004_v53, 0.0  ;;  %v1894_v61 = vmax.f32 %v1847_v46, 0.0 }
 0x4cd   : > { %v6266_v2 = vpack.c.bf16 %v2078_v44, %v2078_v44 }
 0x4cf   : > { %v2174_v4 = vunpack.c.l.b16 %v6266_v2 }
 0x4d2   : > { %v1849_v26 = vpop.f32.mrf.mxu2  ;;  %v2006_v43 = vpop.f32.mrf.mxu3 }
 0x4d3   : > { %v1895_v32 = vmax.f32 %v1849_v26, 0.0  ;;  %v2079_v12 = vmax.f32 %v2006_v43, 0.0 }
 0x4d5   : > { %v1915_v7 = vpack.c.bf16 %v1895_v32, %v1894_v61  ;;  %v6268_v50 = vpack.c.bf16 %v2079_v12, %v2079_v12 }
 0x4d7   : > { %v2175_v49 = vunpack.c.l.b16 %v6268_v50  ;;  %5186 = vmatmul.msk.bf16.gmra.mxu3 %vm918_vm0, %v1915_v7 }
 0x4d9   : > { %v6273_v38 = vpack.c.b16 %v2175_v49, %v2174_v4 }
 0x4da   : > { %v1852_v54 = vpop.f32.mrf.mxu2  ;;  %v2009_v36 = vpop.f32.mrf.mxu3 }
 0x4db   : > { %v2080_v55 = vmax.f32 %v2009_v36, 0.0  ;;  %v1896_v48 = vmax.f32 %v1852_v54, 0.0 }
 0x4dd   : > { %v6275_v15 = vpack.c.bf16 %v2080_v55, %v2080_v55 }
 0x4df   : > { %v2176_v3 = vunpack.c.l.b16 %v6275_v15 }
 0x4e2   : > { %v1854_v28 = vpop.f32.mrf.mxu2  ;;  %v2011_v1 = vpop.f32.mrf.mxu3 }
 0x4e3   : > { %v1897_v23 = vmax.f32 %v1854_v28, 0.0  ;;  %v2081_v11 = vmax.f32 %v2011_v1, 0.0 }
 0x4e5   : > { %v1916_v37 = vpack.c.bf16 %v1897_v23, %v1896_v48  ;;  %v6277_v16 = vpack.c.bf16 %v2081_v11, %v2081_v11 }
 0x4e7   : > { %v2177_v17 = vunpack.c.l.b16 %v6277_v16  ;;  %5187 = vmatmul.msk.bf16.gmra.mxu3 %vm918_vm0, %v1916_v37 }
 0x4e9   : > { %v6282_v47 = vpack.c.b16 %v2177_v17, %v2176_v3 }
 0x4ea   : > { %v1857_v19 = vpop.f32.mrf.mxu2  ;;  %v2014_v52 = vpop.f32.mrf.mxu3 }
 0x4eb   : > { %v1898_v5 = vmax.f32 %v1857_v19, 0.0 }
 0x4f2   : > { %v1859_v25 = vpop.f32.mrf.mxu2  ;;  %v2016_v18 = vpop.f32.mrf.mxu3 }
 0x4f3   : > { %v1899_v30 = vmax.f32 %v1859_v25, 0.0 }
 0x4f5   : > { %v1917_v14 = vpack.c.bf16 %v1899_v30, %v1898_v5 }
 0x4f7   : > { %5188 = vmatmul.msk.bf16.gmra.mxu3 %vm918_vm0, %v1917_v14 }
 0x4fa   : > { %v1862_v46 = vpop.f32.mrf.mxu2  ;;  %v2019_v53 = vpop.f32.mrf.mxu3 }
 0x4fb   : > { %v1900_v43 = vmax.f32 %v1862_v46, 0.0  ;;  %v2084_v5 = vmax.f32 %v2019_v53, 0.0 }
 0x502   : > { %v1864_v44 = vpop.f32.mrf.mxu2  ;;  %v2021_v26 = vpop.f32.mrf.mxu3 }
 0x503   : > { %v1901_v61 = vmax.f32 %v1864_v44, 0.0  ;;  %v2085_v17 = vmax.f32 %v2021_v26, 0.0  ;;  %v2083_v44 = vmax.f32 %v2016_v18, 0.0  ;;  %v2082_v26 = vmax.f32 %v2014_v52, 0.0 }
 0x505   : > { %v1918_v32 = vpack.c.bf16 %v1901_v61, %v1900_v43  ;;  %v6297_v43 = vpack.c.bf16 %v2085_v17, %v2085_v17  ;;  %v6305_v53 = vpack.c.bf16 %v2083_v44, %v2083_v44 }
 0x507   : > { %5189 = vmatmul.msk.bf16.gmra.mxu3 %vm918_vm0, %v1918_v32 }
 0x50a   : > { %v1867_v12 = vpop.f32.mrf.mxu2  ;;  %v2024_v7 = vpop.f32.mrf.mxu3 }
 0x50b   : > { %v1902_v54 = vmax.f32 %v1867_v12, 0.0  ;;  %v2086_v11 = vmax.f32 %v2024_v7, 0.0  ;;  %v6302_v7 = vpack.c.bf16 %v2084_v5, %v2084_v5 }
 0x50d   : > { %v6293_v30 = vpack.c.bf16 %v2086_v11, %v2086_v11  ;;  %v2180_v18 = vunpack.c.l.b16 %v6302_v7 }
 0x512   : > { %v1869_v4 = vpop.f32.mrf.mxu2  ;;  %v2026_v49 = vpop.f32.mrf.mxu3 }
 0x513   : > { %v1903_v36 = vmax.f32 %v1869_v4, 0.0  ;;  %v2087_v48 = vmax.f32 %v2026_v49, 0.0  ;;  %v2182_v4 = vunpack.c.l.b16 %v6293_v30  ;;  %v2181_v49 = vunpack.c.l.b16 %v6297_v43 }
 0x515   : > { %v1919_v55 = vpack.c.bf16 %v1903_v36, %v1902_v54  ;;  %v6289_v19 = vpack.c.bf16 %v2087_v48, %v2087_v48  ;;  %v6308_v36 = vpack.c.bf16 %v2082_v26, %v2082_v26 }
 0x517   : > { %5190 = vmatmul.msk.bf16.gmra.mxu3 %vm918_vm0, %v1919_v55  ;;  %v2183_v61 = vunpack.c.l.b16 %v6289_v19  ;;  %v2179_v55 = vunpack.c.l.b16 %v6305_v53  ;;  %v2178_v52 = vunpack.c.l.b16 %v6308_v36 }
 0x519   : > { %v2208_v54 = vpack.c.b16 %v2183_v61, %v2182_v4  ;;  %v2206_v48 = vpack.c.b16 %v2179_v55, %v2178_v52 }
 0x51a   : > { %v2029_v28 = vpop.f32.mrf.mxu3 }
 0x51b   : > { %v2088_v1 = vmax.f32 %v2029_v28, 0.0  ;;  %v2207_v28 = vpack.c.b16 %v2181_v49, %v2180_v18  ;;  %v7160_v49 = vld [vmem:[#allocation7_spill] sm:$0xff]  ;;  %v7161_v18 = vld [vmem:[#allocation8_spill] sm:$0xff] }
 0x51d   : > { %v6287_v37 = vpack.c.bf16 %v2088_v1, %v2088_v1 }
 0x51f   : > { %7156 = vst [vmem:[#allocation18_spill] sm:$0xff] %v6287_v37  ;;  %v2184_v14 = vunpack.c.l.b16 %v6287_v37 }
 0x522   : > { %v2031_v23 = vpop.f32.mrf.mxu3 }
 0x523   : > { %v2089_v3 = vmax.f32 %v2031_v23, 0.0 }
 0x525   : > { %v6291_v25 = vpack.c.bf16 %v2089_v3, %v2089_v3 }
 0x527   : > { %7157 = vst [vmem:[#allocation26_spill] sm:$0xff] %v6291_v25  ;;  %v2185_v46 = vunpack.c.l.b16 %v6291_v25 }
 0x529   : > { %v2209_v32 = vpack.c.b16 %v2185_v46, %v2184_v14  ;;  %v7158_v46 = vld [vmem:[#allocation5_spill] sm:$0xff] }
 0x52a   : > { %v6300_v12 = vpop.f32.mrf.mxu3 }
 0x52b   : > { %2234 = vmatpush.bf16.msrb.mxu2 %v2209_v32 }
 0x52f   : > { %2235 = vmatpush.bf16.msrb.mxu2 %v2208_v54 }
 0x532   : > { %v6312_v1 = vpop.f32.mrf.mxu3 }
 0x533   : > { %2236 = vmatpush.bf16.msrb.mxu2 %v2207_v28 }
 0x537   : > { %2237 = vmatpush.bf16.msrb.mxu2 %v2206_v48 }
 0x53a   : > { %v6315_v23 = vpop.f32.mrf.mxu3 }
 0x53b   : > { %2238 = vmatpush.bf16.msrb.mxu2 %v6282_v47 }
 0x53f   : > { %2239 = vmatpush.bf16.msrb.mxu2 %v6273_v38 }
 0x542   : > { %v6319_v11 = vpop.f32.mrf.mxu3 }
 0x543   : > { %2240 = vmatpush.bf16.msrb.mxu2 %v6264_v20 }
 0x547   : > { %2241 = vmatpush.bf16.msrb.mxu2 %v6255_v10 }
 0x54a   : > { %v6323_v3 = vpop.f32.mrf.mxu3  ;;  %2242 = vmatmul.bf16.vlgmr.msrb.gmra.mxu2 %v6157_v42 }
 0x54b   : > { %2390 = vmatpush.bf16.msra.mxu2 %v2209_v32  ;;  %v7159_v32 = vld [vmem:[#allocation6_spill] sm:$0xff] }
 0x54f   : > { %2391 = vmatpush.bf16.msra.mxu2 %v2208_v54 }
 0x552   : > { %v2046_v17 = vpop.f32.mrf.mxu3 }
 0x553   : > { %2392 = vmatpush.bf16.msra.mxu2 %v2207_v28 }
 0x557   : > { %2393 = vmatpush.bf16.msra.mxu2 %v2206_v48 }
 0x55a   : > { %v2049_v5 = vpop.f32.mrf.mxu3 }
 0x55b   : > { %2394 = vmatpush.bf16.msra.mxu2 %v6282_v47 }
 0x55f   : > { %2395 = vmatpush.bf16.msra.mxu2 %v6273_v38 }
 0x562   : > { %v2051_v14 = vpop.f32.mrf.mxu3 }
 0x563   : > { %2396 = vmatpush.bf16.msra.mxu2 %v6264_v20 }
 0x567   : > { %2397 = vmatpush.bf16.msra.mxu2 %v6255_v10 }
 0x56a   : > { %2398 = vmatmul.bf16.vlgmr.msra.gmra.mxu2 %v7158_v46  ;;  %v2054_v44 = vpop.f32.mrf.mxu3 }
 0x572   : > { %v2056_v61 = vpop.f32.mrf.mxu3 }
 0x57a   : > { %2403 = vmatmul.bf16.gmra.mxu2 %v7159_v32  ;;  %v2059_v26 = vpop.f32.mrf.mxu3 }
 0x57b   : > { %v2100_v25 = vmax.f32 %v2059_v26, 0.0  ;;  %v2097_v26 = vmax.f32 %v2051_v14, 0.0 }
 0x582   : > { %v2061_v4 = vpop.f32.mrf.mxu3 }
 0x583   : > { %v2101_v42 = vmax.f32 %v2061_v4, 0.0  ;;  %v2098_v4 = vmax.f32 %v2054_v44, 0.0 }
 0x58a   : > { %2408 = vmatmul.bf16.gmra.mxu2 %v7160_v49  ;;  %v2064_v54 = vpop.f32.mrf.mxu3 }
 0x58b   : > { %v2102_v52 = vmax.f32 %v2064_v54, 0.0 }
 0x58d   : > { %v6340_v37 = vpack.c.bf16 %v2102_v52, %v2102_v52 }
 0x58f   : > { %7165 = vst [vmem:[#allocation28_spill] sm:$0xff] %v6340_v37 }
 0x592   : > { %v2066_v47 = vpop.f32.mrf.mxu3 }
 0x593   : > { %v2103_v20 = vmax.f32 %v2066_v47, 0.0  ;;  %v2099_v47 = vmax.f32 %v2056_v61, 0.0  ;;  %v2095_v61 = vmax.f32 %v2046_v17, 0.0  ;;  %v2092_v17 = vmax.f32 %v6315_v23, 0.0 }
 0x595   : > { %v6336_v46 = vpack.c.bf16 %v2103_v20, %v2103_v20  ;;  %v6348_v20 = vpack.c.bf16 %v2100_v25, %v2100_v25  ;;  %v6351_v52 = vpack.c.bf16 %v2099_v47, %v2099_v47 }
 0x597   : > { %7163 = vst [vmem:[#allocation23_spill] sm:$0xff] %v6336_v46  ;;  %v2199_v54 = vunpack.c.l.b16 %v6336_v46  ;;  %v2195_v25 = vunpack.c.l.b16 %v6351_v52  ;;  %v2090_v46 = vmax.f32 %v6300_v12, 0.0 }
 0x59a   : > { %2413 = vmatmul.bf16.gmra.mxu2 %v7161_v18  ;;  %v2069_v38 = vpop.f32.mrf.mxu3 }
 0x59b   : > { %v2104_v55 = vmax.f32 %v2069_v38, 0.0  ;;  %v6345_v38 = vpack.c.bf16 %v2101_v42, %v2101_v42  ;;  %v2196_v42 = vunpack.c.l.b16 %v6348_v20 }
 0x59d   : > { %v6334_v10 = vpack.c.bf16 %v2104_v55, %v2104_v55 }
 0x59f   : > { %7162 = vst [vmem:[#allocation24_spill] sm:$0xff] %v6334_v10  ;;  %v2200_v49 = vunpack.c.l.b16 %v6334_v10  ;;  %v2096_v10 = vmax.f32 %v2049_v5, 0.0  ;;  %v2093_v5 = vmax.f32 %v6319_v11, 0.0 }
 0x5a1   : > { %v6361_v14 = vpack.c.bf16 %v2096_v10, %v2096_v10  ;;  %v2091_v10 = vmax.f32 %v6312_v1, 0.0 }
 0x5a2   : > { %v2071_v28 = vpop.f32.mrf.mxu3 }
 0x5a3   : > { %v2105_v48 = vmax.f32 %v2071_v28, 0.0  ;;  %v2198_v28 = vunpack.c.l.b16 %v6340_v37  ;;  %v6378_v37 = vpack.c.bf16 %v2092_v17, %v2092_v17 }
 0x5a5   : > { %v6338_v32 = vpack.c.bf16 %v2105_v48, %v2105_v48  ;;  %v2197_v48 = vunpack.c.l.b16 %v6345_v38  ;;  %v2188_v1 = vunpack.c.l.b16 %v6378_v37 }
 0x5a7   : > { %7164 = vst [vmem:[#allocation25_spill] sm:$0xff] %v6338_v32  ;;  %v2201_v18 = vunpack.c.l.b16 %v6338_v32  ;;  %v2216_v32 = vpack.c.b16 %v2199_v54, %v2198_v28  ;;  %v2215_v44 = vpack.c.b16 %v2197_v48, %v2196_v42  ;;  %v6365_v54 = vpack.c.bf16 %v2095_v61, %v2095_v61 }
 0x5a8   : > { %v2192_v48 = vunpack.c.l.b16 %v6361_v14  ;;  %v6374_v42 = vpack.c.bf16 %v2093_v5, %v2093_v5 }
 0x5a9   : > { %v2217_v55 = vpack.c.b16 %v2201_v18, %v2200_v49  ;;  %v6357_v49 = vpack.c.bf16 %v2097_v26, %v2097_v26  ;;  %v2094_v18 = vmax.f32 %v6323_v3, 0.0  ;;  %v7167_v3 = vld [vmem:[#allocation10_spill] sm:$0xff]  ;;  %v2191_v11 = vunpack.c.l.b16 %v6365_v54 }
 0x5aa   : > { %2418 = vmatmul.bf16.gmra.mxu2 %v7166_v40  ;;  %v6354_v40 = vpack.c.bf16 %v2098_v4, %v2098_v4 }
 0x5ab   : > { %2248 = vmatpush.bf16.msrb.mxu3 %v2217_v55  ;;  %v2193_v4 = vunpack.c.l.b16 %v6357_v49  ;;  %v6369_v26 = vpack.c.bf16 %v2094_v18, %v2094_v18  ;;  %v2189_v18 = vunpack.c.l.b16 %v6374_v42 }
 0x5ac   : > { %v2194_v47 = vunpack.c.l.b16 %v6354_v40 }
 0x5ad   : > { %v2213_v61 = vpack.c.b16 %v2193_v4, %v2192_v48  ;;  %v2190_v23 = vunpack.c.l.b16 %v6369_v26  ;;  %v2211_v4 = vpack.c.b16 %v2189_v18, %v2188_v1  ;;  %v7168_v48 = vld [vmem:[#allocation12_spill] sm:$0xff] }
 0x5ae   : > { %v2214_v28 = vpack.c.b16 %v2195_v25, %v2194_v47  ;;  %v6381_v25 = vpack.c.bf16 %v2091_v10, %v2091_v10 }
 0x5af   : > { %2249 = vmatpush.bf16.msrb.mxu3 %v2216_v32  ;;  %v2212_v47 = vpack.c.b16 %v2191_v11, %v2190_v23  ;;  %v2326_v11 = vunpack.c.l.bf16 %v6248_v13 }
 0x5b0   : > { %v2187_v5 = vunpack.c.l.b16 %v6381_v25 }
 0x5b3   : > { %2250 = vmatpush.bf16.msrb.mxu3 %v2215_v44 }
 0x5b7   : > { %2251 = vmatpush.bf16.msrb.mxu3 %v2214_v28 }
 0x5ba   : > { %2423 = vmatmul.bf16.gmra.mxu2 %v7167_v3  ;;  %v6384_v3 = vpack.c.bf16 %v2090_v46, %v2090_v46 }
 0x5bb   : > { %2252 = vmatpush.bf16.msrb.mxu3 %v2213_v61 }
 0x5bc   : > { %v2186_v12 = vunpack.c.l.b16 %v6384_v3 }
 0x5be   : > { %v2210_v17 = vpack.c.b16 %v2187_v5, %v2186_v12 }
 0x5bf   : > { %2253 = vmatpush.bf16.msrb.mxu3 %v2212_v47 }
 0x5c3   : > { %2254 = vmatpush.bf16.msrb.mxu3 %v2211_v4 }
 0x5c7   : > { %2255 = vmatpush.bf16.msrb.mxu3 %v2210_v17 }
 0x5ca   : > { %2428 = vmatmul.bf16.gmra.mxu2 %v7168_v48  ;;  %2256 = vmatmul.bf16.vlgmr.msrb.gmra.mxu3 %v6162_v29 }
 0x5cb   : > { %2479 = vmatpush.bf16.msra.mxu3 %v2217_v55  ;;  %v2358_v55 = vmul.f32 33.0, %v2326_v11 }
 0x5cd   : > { %v2243_v46 = vpop.f32.mrf.mxu2 }
 0x5cf   : > { %2480 = vmatpush.bf16.msra.mxu3 %v2216_v32  ;;  %v2327_v32 = vunpack.c.l.bf16 %v6250_v6 }
 0x5d3   : > { %2481 = vmatpush.bf16.msra.mxu3 %v2215_v44  ;;  %v2359_v44 = vmul.f32 33.0, %v2327_v32  ;;  %v2331_v32 = vunpack.c.l.bf16 %v6268_v50  ;;  %v5495_v50 = vld [vmem:[%s7067_s5 + $0x18] sm:$0xff] }
 0x5d4   : > { %2289 = vmatpush.bf16.msra.mxu0 %v5495_v50 }
 0x5d5   : > { %v2245_v10 = vpop.f32.mrf.mxu2 }
 0x5d7   : > { %2482 = vmatpush.bf16.msra.mxu3 %v2214_v28 }
 0x5da   : > { %2433 = vmatmul.bf16.gmra.mxu2 %v5855_v0 }
 0x5db   : > { %2483 = vmatpush.bf16.msra.mxu3 %v2213_v61  ;;  %v2328_v61 = vunpack.c.l.bf16 %v6257_v41 }
 0x5df   : > { %2484 = vmatpush.bf16.msra.mxu3 %v2212_v47  ;;  %v2360_v47 = vmul.f32 33.0, %v2328_v61 }
 0x5e3   : > { %2485 = vmatpush.bf16.msra.mxu3 %v2211_v4  ;;  %v2329_v4 = vunpack.c.l.bf16 %v6259_v56 }
 0x5e5   : > { %v2361_v12 = vmul.f32 33.0, %v2329_v4  ;;  %v2333_v4 = vunpack.c.l.bf16 %v6277_v16  ;;  %v5497_v16 = vld [vmem:[%s7065_s3 + $0x28] sm:$0xff] }
 0x5e7   : > { %2486 = vmatpush.bf16.msra.mxu3 %v2210_v17 }
 0x5ea   : > { %2438 = vmatmul.bf16.gmra.mxu2 %v5866_v8  ;;  %2487 = vmatmul.bf16.vlgmr.msra.gmra.mxu3 %v5781_v21 }
 0x5ed   : > { %v2399_v23 = vpop.f32.mrf.mxu2 }
 0x5ee   : > { %v2400_v18 = vadd.f32 %v2399_v23, %v2358_v55  ;;  %v2330_v55 = vunpack.c.l.bf16 %v6266_v2 }
 0x5f0   : > { %v2362_v6 = vmul.f32 33.0, %v2330_v55 }
 0x5f5   : > { %v2401_v28 = vpop.f32.mrf.mxu2 }
 0x5f6   : > { %v2402_v1 = vadd.f32 %v2401_v28, %v2359_v44  ;;  %v2363_v44 = vmul.f32 33.0, %v2331_v32 }
 0x5fa   : > { %2443 = vmatmul.bf16.gmra.mxu2 %v5878_v34  ;;  %2492 = vmatmul.bf16.gmra.mxu3 %v5791_v27 }
 0x5fd   : > { %v2404_v13 = vpop.f32.mrf.mxu2 }
 0x5fe   : > { %v2405_v5 = vadd.f32 %v2404_v13, %v2360_v47  ;;  %v2332_v47 = vunpack.c.l.bf16 %v6275_v15  ;;  %v5494_v15 = vld [vmem:[%s7067_s5 + $0x10] sm:$0xff] }
 0x5ff   : > { %2290 = vmatpush.bf16.msra.mxu0 %v5494_v15 }
 0x600   : > { %v2364_v56 = vmul.f32 33.0, %v2332_v47  ;;  %v7169_v47 = vld [vmem:[#allocation21_spill] sm:$0xff] }
 0x603   : > { %2655 = vmatpush.bf16.msrb.mxu0 %v5497_v16 }
 0x605   : > { %v2406_v17 = vpop.f32.mrf.mxu2 }
 0x606   : > { %v2407_v11 = vadd.f32 %v2406_v17, %v2361_v12  ;;  %v2365_v12 = vmul.f32 33.0, %v2333_v4 }
 0x60a   : > { %2448 = vmatmul.bf16.gmra.mxu2 %v5890_v62  ;;  %2497 = vmatmul.bf16.gmra.mxu3 %v5801_v33 }
 0x60d   : > { %v2409_v41 = vpop.f32.mrf.mxu2 }
 0x60e   : > { %v2410_v23 = vadd.f32 %v2409_v41, %v2362_v6  ;;  %v5496_v41 = vld [vmem:[%s7065_s3 + $0x20] sm:$0xff] }
 0x60f   : > { %2656 = vmatpush.bf16.msrb.mxu0 %v5496_v41 }
 0x615   : > { %v2411_v28 = vpop.f32.mrf.mxu2 }
 0x616   : > { %v2412_v61 = vadd.f32 %v2411_v28, %v2363_v44 }
 0x61a   : > { %2453 = vmatmul.bf16.gmra.mxu2 %v5902_v24  ;;  %2502 = vmatmul.bf16.gmra.mxu3 %v5811_v39 }
 0x61d   : > { %v2414_v2 = vpop.f32.mrf.mxu2 }
 0x61e   : > { %v2415_v13 = vadd.f32 %v2414_v2, %v2364_v56  ;;  %v7170_v56 = vld [vmem:[#allocation14_spill] sm:$0xff] }
 0x625   : > { %v2416_v17 = vpop.f32.mrf.mxu2 }
 0x626   : > { %v2417_v55 = vadd.f32 %v2416_v17, %v2365_v12 }
 0x62a   : > { %2458 = vmatmul.bf16.gmra.mxu2 %v5914_v58  ;;  %2507 = vmatmul.bf16.gmra.mxu3 %v5821_v45 }
 0x63a   : > { %2463 = vmatmul.bf16.gmra.mxu2 %v5926_v22  ;;  %2512 = vmatmul.bf16.gmra.mxu3 %v5831_v51 }
 0x64a   : > { %2468 = vmatmul.bf16.gmra.mxu2 %v5938_v60  ;;  %2517 = vmatmul.bf16.gmra.mxu3 %v5841_v57 }
 0x64d   : > { %v2257_v6 = vpop.f32.mrf.mxu3 }
 0x64e   : > { %v2258_v32 = vadd.f32 %v2257_v6, %v2243_v46  ;;  %v2419_v46 = vpop.f32.mrf.mxu2 }
 0x655   : > { %v2259_v44 = vpop.f32.mrf.mxu3 }
 0x656   : > { %v2260_v28 = vadd.f32 %v2259_v44, %v2245_v10  ;;  %v2421_v16 = vpop.f32.mrf.mxu2 }
 0x658   : > { %v2262_v2 = vpack.c.bf16 %v2260_v28, %v2258_v32 }
 0x65a   : > { %2473 = vmatmul.bf16.gmra.mxu2 %v7169_v47  ;;  %2522 = vmatmul.bf16.gmra.mxu3 %v7170_v56 }
 0x65b   : > { %5203 = vmatmul.msk.bf16.vlgmr.msra.gmra.mxu0 %vm918_vm0, %v2262_v2 }
 0x65e   : > { %v2424_v2 = vpop.f32.mrf.mxu2 }
 0x66a   : > { %2527 = vmatmul.bf16.gmra.mxu3 %v5868_v9 }
 0x66d   : > { %v2488_v4 = vpop.f32.mrf.mxu3 }
 0x66e   : > { %v2489_v17 = vadd.f32 %v2488_v4, %v2400_v18 }
 0x675   : > { %v2490_v12 = vpop.f32.mrf.mxu3 }
 0x676   : > { %v2491_v50 = vadd.f32 %v2490_v12, %v2402_v1 }
 0x678   : > { %v2568_v15 = vpack.c.bf16 %v2491_v50, %v2489_v17  ;;  %v2426_v17 = vpop.f32.mrf.mxu2  ;;  %v7171_v50 = vld [vmem:[#allocation17_spill] sm:$0xff] }
 0x67a   : > { %2532 = vmatmul.bf16.gmra.mxu3 %v5880_v35  ;;  %5225 = vmatmul.msk.bf16.vlgmr.msrb.gmra.mxu0 %vm918_vm0, %v2568_v15 }
 0x67d   : > { %v2493_v10 = vpop.f32.mrf.mxu3 }
 0x67e   : > { %v2494_v41 = vadd.f32 %v2493_v10, %v2405_v5 }
 0x680   : > { %v2429_v35 = vpop.f32.mrf.mxu2 }
 0x685   : > { %v2495_v6 = vpop.f32.mrf.mxu3 }
 0x686   : > { %v2496_v44 = vadd.f32 %v2495_v6, %v2407_v11 }
 0x688   : > { %v2569_v32 = vpack.c.bf16 %v2496_v44, %v2494_v41  ;;  %v2431_v41 = vpop.f32.mrf.mxu2 }
 0x68a   : > { %2537 = vmatmul.bf16.gmra.mxu3 %v5892_v63  ;;  %5226 = vmatmul.msk.bf16.gmra.mxu0 %vm918_vm0, %v2569_v32 }
 0x68d   : > { %v2498_v28 = vpop.f32.mrf.mxu3 }
 0x68e   : > { %v2499_v1 = vadd.f32 %v2498_v28, %v2410_v23  ;;  %v2334_v23 = vunpack.c.l.bf16 %v6308_v36  ;;  %v2337_v36 = vunpack.c.l.bf16 %v6297_v43 }
 0x690   : > { %v2366_v32 = vmul.f32 33.0, %v2334_v23 }
 0x695   : > { %v2500_v18 = vpop.f32.mrf.mxu3 }
 0x696   : > { %v2501_v4 = vadd.f32 %v2500_v18, %v2412_v61  ;;  %v2335_v61 = vunpack.c.l.bf16 %v6305_v53  ;;  %v2420_v18 = vadd.f32 %v2419_v46, %v2366_v32  ;;  %v7172_v32 = vld [vmem:[#allocation20_spill] sm:$0xff] }
 0x698   : > { %v2570_v12 = vpack.c.bf16 %v2501_v4, %v2499_v1  ;;  %v2367_v28 = vmul.f32 33.0, %v2335_v61 }
 0x69a   : > { %2542 = vmatmul.bf16.gmra.mxu3 %v7171_v50  ;;  %5227 = vmatmul.msk.bf16.gmra.mxu0 %vm918_vm0, %v2570_v12  ;;  %v2422_v1 = vadd.f32 %v2421_v16, %v2367_v28 }
 0x69d   : > { %v2503_v15 = vpop.f32.mrf.mxu3 }
 0x69e   : > { %v2504_v11 = vadd.f32 %v2503_v15, %v2415_v13  ;;  %v2434_v13 = vpop.f32.mrf.mxu2 }
 0x6a5   : > { %v2505_v5 = vpop.f32.mrf.mxu3 }
 0x6a6   : > { %v2506_v10 = vadd.f32 %v2505_v5, %v2417_v55  ;;  %v2336_v5 = vunpack.c.l.bf16 %v6302_v7  ;;  %v2339_v7 = vunpack.c.l.bf16 %v6289_v19  ;;  %v7174_v19 = vld [vmem:[#allocation18_spill] sm:$0xff] }
 0x6a8   : > { %v2571_v6 = vpack.c.bf16 %v2506_v10, %v2504_v11  ;;  %v2436_v11 = vpop.f32.mrf.mxu2  ;;  %v2368_v53 = vmul.f32 33.0, %v2336_v5  ;;  %v2369_v10 = vmul.f32 33.0, %v2337_v36  ;;  %v7173_v36 = vld [vmem:[#allocation22_spill] sm:$0xff] }
 0x6aa   : > { %2547 = vmatmul.bf16.gmra.mxu3 %v5916_v59  ;;  %5228 = vmatmul.msk.bf16.gmra.mxu0 %vm918_vm0, %v2571_v6  ;;  %v2425_v6 = vadd.f32 %v2424_v2, %v2368_v53  ;;  %v2427_v46 = vadd.f32 %v2426_v17, %v2369_v10  ;;  %v5499_v53 = vld [vmem:[%s7066_s4 + $0x28] sm:$0xff]  ;;  %v2340_v10 = vunpack.c.l.bf16 %v7174_v19 }
 0x6ab   : > { %2857 = vmatpush.bf16.msrb.mxu1 %v5499_v53 }
 0x6ad   : > { %v2508_v44 = vpop.f32.mrf.mxu3 }
 0x6ae   : > { %v2509_v12 = vadd.f32 %v2508_v44, %v2420_v18  ;;  %v2338_v18 = vunpack.c.l.bf16 %v6293_v30 }
 0x6b0   : > { %v2370_v43 = vmul.f32 33.0, %v2338_v18 }
 0x6b5   : > { %v2510_v4 = vpop.f32.mrf.mxu3 }
 0x6b6   : > { %v2511_v50 = vadd.f32 %v2510_v4, %v2422_v1  ;;  %v2371_v1 = vmul.f32 33.0, %v2339_v7  ;;  %v2430_v4 = vadd.f32 %v2429_v35, %v2370_v43 }
 0x6b8   : > { %v2572_v55 = vpack.c.bf16 %v2511_v50, %v2509_v12  ;;  %v2439_v50 = vpop.f32.mrf.mxu2  ;;  %v2432_v12 = vadd.f32 %v2431_v41, %v2371_v1 }
 0x6ba   : > { %2552 = vmatmul.bf16.gmra.mxu3 %v7149_v31  ;;  %5229 = vmatmul.msk.bf16.gmra.mxu0 %vm918_vm0, %v2572_v55 }
 0x6bd   : > { %v2513_v15 = vpop.f32.mrf.mxu3 }
 0x6be   : > { %v2514_v23 = vadd.f32 %v2513_v15, %v2425_v6  ;;  %v7175_v6 = vld [vmem:[#allocation26_spill] sm:$0xff] }
 0x6bf   : > { %v2341_v35 = vunpack.c.l.bf16 %v7175_v6 }
 0x6c0   : > { %v2441_v2 = vpop.f32.mrf.mxu2 }
 0x6c5   : > { %v2515_v16 = vpop.f32.mrf.mxu3 }
 0x6c6   : > { %v2516_v44 = vadd.f32 %v2515_v16, %v2427_v46  ;;  %v5498_v46 = vld [vmem:[%s7066_s4 + $0x20] sm:$0xff]  ;;  %v2372_v16 = vmul.f32 33.0, %v2340_v10 }
 0x6c7   : > { %2858 = vmatpush.bf16.msrb.mxu1 %v5498_v46 }
 0x6c8   : > { %v2573_v61 = vpack.c.bf16 %v2516_v44, %v2514_v23  ;;  %v2444_v41 = vpop.f32.mrf.mxu2  ;;  %v2373_v23 = vmul.f32 33.0, %v2341_v35  ;;  %v2435_v44 = vadd.f32 %v2434_v13, %v2372_v16 }
 0x6ca   : > { %2557 = vmatmul.bf16.gmra.mxu3 %v7172_v32  ;;  %5230 = vmatmul.msk.bf16.gmra.mxu0 %vm918_vm0, %v2573_v61  ;;  %v2437_v61 = vadd.f32 %v2436_v11, %v2373_v23 }
 0x6cd   : > { %v2518_v28 = vpop.f32.mrf.mxu3 }
 0x6ce   : > { %v2519_v55 = vadd.f32 %v2518_v28, %v2430_v4 }
 0x6d0   : > { %v2446_v4 = vpop.f32.mrf.mxu2 }
 0x6d5   : > { %v2520_v17 = vpop.f32.mrf.mxu3 }
 0x6d6   : > { %v2521_v15 = vadd.f32 %v2520_v17, %v2432_v12  ;;  %v2342_v17 = vunpack.c.l.bf16 %v6384_v3  ;;  %v2344_v3 = vunpack.c.l.bf16 %v6378_v37 }
 0x6d8   : > { %v2574_v5 = vpack.c.bf16 %v2521_v15, %v2519_v55  ;;  %v6458_v28 = vpop.f32.mrf.mxu0  ;;  %v2343_v55 = vunpack.c.l.bf16 %v6381_v25  ;;  %v2449_v13 = vpop.f32.mrf.mxu2  ;;  %v2345_v25 = vunpack.c.l.bf16 %v6374_v42  ;;  %v2346_v42 = vunpack.c.l.bf16 %v6369_v26 }
 0x6d9   : > { %7176 = vst [vmem:[#allocation18_spill] sm:$0xff] %v6458_v28 }
 0x6da   : > { %2562 = vmatmul.bf16.gmra.mxu3 %v7173_v36  ;;  %5231 = vmatmul.msk.bf16.gmra.mxu0 %vm918_vm0, %v2574_v5  ;;  %v2374_v5 = vmul.f32 33.0, %v2342_v17  ;;  %v2375_v53 = vmul.f32 33.0, %v2343_v55 }
 0x6dc   : > { %v2440_v11 = vadd.f32 %v2439_v50, %v2374_v5  ;;  %v2442_v19 = vadd.f32 %v2441_v2, %v2375_v53 }
 0x6dd   : > { %v2523_v30 = vpop.f32.mrf.mxu3 }
 0x6de   : > { %v2524_v7 = vadd.f32 %v2523_v30, %v2435_v44 }
 0x6e0   : > { %v6463_v15 = vpop.f32.mrf.mxu0  ;;  %v2451_v16 = vpop.f32.mrf.mxu2 }
 0x6e1   : > { %7177 = vst [vmem:[#allocation26_spill] sm:$0xff] %v6463_v15 }
 0x6e5   : > { %v2525_v18 = vpop.f32.mrf.mxu3 }
 0x6e6   : > { %v2526_v43 = vadd.f32 %v2525_v18, %v2437_v61 }
 0x6e8   : > { %v2575_v1 = vpack.c.bf16 %v2526_v43, %v2524_v7  ;;  %v2376_v7 = vmul.f32 33.0, %v2344_v3  ;;  %v2377_v43 = vmul.f32 33.0, %v2345_v25  ;;  %v2454_v5 = vpop.f32.mrf.mxu2 }
 0x6ea   : > { %5232 = vmatmul.msk.bf16.gmra.mxu0 %vm918_vm0, %v2575_v1  ;;  %v2445_v2 = vadd.f32 %v2444_v41, %v2376_v7  ;;  %v2447_v1 = vadd.f32 %v2446_v4, %v2377_v43  ;;  %v2378_v4 = vmul.f32 33.0, %v2346_v42  ;;  %v2348_v43 = vunpack.c.l.bf16 %v6361_v14 }
 0x6ec   : > { %v2450_v3 = vadd.f32 %v2449_v13, %v2378_v4  ;;  %v2380_v13 = vmul.f32 33.0, %v2348_v43 }
 0x6ed   : > { %v2528_v12 = vpop.f32.mrf.mxu3 }
 0x6ee   : > { %v2529_v6 = vadd.f32 %v2528_v12, %v2440_v11 }
 0x6f0   : > { %v2456_v41 = vpop.f32.mrf.mxu2 }
 0x6f5   : > { %v2530_v10 = vpop.f32.mrf.mxu3 }
 0x6f6   : > { %v2531_v30 = vadd.f32 %v2530_v10, %v2442_v19  ;;  %v2347_v19 = vunpack.c.l.bf16 %v6365_v54 }
 0x6f7   : > { %v2658_v35 = vpop.f32.mrf.mxu0 }
 0x6f8   : > { %v2576_v46 = vpack.c.bf16 %v2531_v30, %v2529_v6  ;;  %v2738_v61 = vmax.f32 %v2658_v35, 0.0  ;;  %v2379_v35 = vmul.f32 33.0, %v2347_v19  ;;  %v2459_v26 = vpop.f32.mrf.mxu2 }
 0x6fa   : > { %5233 = vmatmul.msk.bf16.gmra.mxu0 %vm918_vm0, %v2576_v46 }
 0x6fd   : > { %v2533_v23 = vpop.f32.mrf.mxu3 }
 0x6fe   : > { %v2534_v17 = vadd.f32 %v2533_v23, %v2445_v2  ;;  %v2452_v23 = vadd.f32 %v2451_v16, %v2379_v35 }
 0x6ff   : > { %v2660_v44 = vpop.f32.mrf.mxu0 }
 0x700   : > { %v2739_v18 = vmax.f32 %v2660_v44, 0.0 }
 0x702   : > { %v2770_v50 = vpack.c.bf16 %v2739_v18, %v2738_v61 }
 0x704   : > { %5253 = vmatmul.msk.bf16.vlgmr.msrb.gmra.mxu1 %vm918_vm0, %v2770_v50  ;;  %v2349_v50 = vunpack.c.l.bf16 %v6357_v49  ;;  %v2350_v49 = vunpack.c.l.bf16 %v6354_v40 }
 0x705   : > { %v2535_v12 = vpop.f32.mrf.mxu3 }
 0x706   : > { %v2536_v55 = vadd.f32 %v2535_v12, %v2447_v1  ;;  %v2381_v16 = vmul.f32 33.0, %v2349_v50 }
 0x707   : > { %v2663_v53 = vpop.f32.mrf.mxu0 }
 0x708   : > { %v2577_v11 = vpack.c.bf16 %v2536_v55, %v2534_v17  ;;  %v2740_v6 = vmax.f32 %v2663_v53, 0.0  ;;  %v2455_v55 = vadd.f32 %v2454_v5, %v2380_v13  ;;  %v2457_v53 = vadd.f32 %v2456_v41, %v2381_v16 }
 0x709   : > { %v2382_v41 = vmul.f32 33.0, %v2350_v49 }
 0x70a   : > { %5234 = vmatmul.msk.bf16.gmra.mxu0 %vm918_vm0, %v2577_v11  ;;  %v2461_v11 = vpop.f32.mrf.mxu2 }
 0x70d   : > { %v2538_v37 = vpop.f32.mrf.mxu3 }
 0x70e   : > { %v2539_v44 = vadd.f32 %v2538_v37, %v2450_v3 }
 0x70f   : > { %v2665_v10 = vpop.f32.mrf.mxu0 }
 0x710   : > { %v2741_v30 = vmax.f32 %v2665_v10, 0.0 }
 0x712   : > { %v2771_v46 = vpack.c.bf16 %v2741_v30, %v2740_v6  ;;  %v2351_v30 = vunpack.c.l.bf16 %v6351_v52  ;;  %v2464_v4 = vpop.f32.mrf.mxu2  ;;  %v2352_v52 = vunpack.c.l.bf16 %v6348_v20 }
 0x714   : > { %5254 = vmatmul.msk.bf16.gmra.mxu1 %vm918_vm0, %v2771_v46  ;;  %v2383_v3 = vmul.f32 33.0, %v2351_v30  ;;  %v7179_v30 = vld [vmem:[#allocation23_spill] sm:$0xff] }
 0x715   : > { %v2540_v25 = vpop.f32.mrf.mxu3 }
 0x716   : > { %v2541_v61 = vadd.f32 %v2540_v25, %v2452_v23  ;;  %v2460_v25 = vadd.f32 %v2459_v26, %v2382_v41  ;;  %v2384_v26 = vmul.f32 33.0, %v2352_v52  ;;  %v7180_v52 = vld [vmem:[#allocation24_spill] sm:$0xff] }
 0x717   : > { %v2668_v18 = vpop.f32.mrf.mxu0 }
 0x718   : > { %v2578_v7 = vpack.c.bf16 %v2541_v61, %v2539_v44  ;;  %v2742_v1 = vmax.f32 %v2668_v18, 0.0  ;;  %v2462_v44 = vadd.f32 %v2461_v11, %v2383_v3 }
 0x71a   : > { %5235 = vmatmul.msk.bf16.gmra.mxu0 %vm918_vm0, %v2578_v7  ;;  %v2466_v50 = vpop.f32.mrf.mxu2 }
 0x71d   : > { %v2543_v54 = vpop.f32.mrf.mxu3 }
 0x71e   : > { %v2544_v42 = vadd.f32 %v2543_v54, %v2455_v55 }
 0x71f   : > { %v2670_v2 = vpop.f32.mrf.mxu0 }
 0x720   : > { %v2743_v12 = vmax.f32 %v2670_v2, 0.0  ;;  %v2353_v2 = vunpack.c.l.bf16 %v6345_v38 }
 0x722   : > { %v2772_v17 = vpack.c.bf16 %v2743_v12, %v2742_v1  ;;  %v2385_v16 = vmul.f32 33.0, %v2353_v2  ;;  %v2469_v55 = vpop.f32.mrf.mxu2  ;;  %v2356_v2 = vunpack.c.l.bf16 %v7180_v52 }
 0x724   : > { %5255 = vmatmul.msk.bf16.gmra.mxu1 %vm918_vm0, %v2772_v17  ;;  %v2467_v11 = vadd.f32 %v2466_v50, %v2385_v16 }
 0x725   : > { %v2545_v37 = vpop.f32.mrf.mxu3 }
 0x726   : > { %v2546_v19 = vadd.f32 %v2545_v37, %v2457_v53  ;;  %v2465_v53 = vadd.f32 %v2464_v4, %v2384_v26 }
 0x727   : > { %v2673_v10 = vpop.f32.mrf.mxu0 }
 0x728   : > { %v2579_v6 = vpack.c.bf16 %v2546_v19, %v2544_v42  ;;  %v2744_v46 = vmax.f32 %v2673_v10, 0.0 }
 0x72a   : > { %5236 = vmatmul.msk.bf16.gmra.mxu0 %vm918_vm0, %v2579_v6  ;;  %v2471_v20 = vpop.f32.mrf.mxu2 }
 0x72d   : > { %v2548_v14 = vpop.f32.mrf.mxu3 }
 0x72e   : > { %v2549_v18 = vadd.f32 %v2548_v14, %v2460_v25  ;;  %v7178_v14 = vld [vmem:[#allocation28_spill] sm:$0xff] }
 0x72f   : > { %v2675_v35 = vpop.f32.mrf.mxu0  ;;  %v2354_v49 = vunpack.c.l.bf16 %v7178_v14  ;;  %v6494_v14 = vpop.f32.mrf.mxu1 }
 0x730   : > { %v2745_v5 = vmax.f32 %v2675_v35, 0.0  ;;  %v2355_v35 = vunpack.c.l.bf16 %v7179_v30  ;;  %7182 = vst [vmem:[#allocation28_spill] sm:$0xff] %v6494_v14 }
 0x731   : > { %v2386_v4 = vmul.f32 33.0, %v2354_v49 }
 0x732   : > { %v2773_v23 = vpack.c.bf16 %v2745_v5, %v2744_v46  ;;  %v2387_v3 = vmul.f32 33.0, %v2355_v35 }
 0x733   : > { %v2470_v25 = vadd.f32 %v2469_v55, %v2386_v4  ;;  %v2388_v55 = vmul.f32 33.0, %v2356_v2 }
 0x734   : > { %5256 = vmatmul.msk.bf16.gmra.mxu1 %vm918_vm0, %v2773_v23 }
 0x735   : > { %v2550_v61 = vpop.f32.mrf.mxu3 }
 0x736   : > { %v2551_v7 = vadd.f32 %v2550_v61, %v2462_v44  ;;  %v2472_v44 = vadd.f32 %v2471_v20, %v2387_v3 }
 0x737   : > { %v2678_v54 = vpop.f32.mrf.mxu0 }
 0x738   : > { %v2580_v43 = vpack.c.bf16 %v2551_v7, %v2549_v18  ;;  %v2746_v12 = vmax.f32 %v2678_v54, 0.0  ;;  %v2474_v54 = vpop.f32.mrf.mxu2 }
 0x73a   : > { %5237 = vmatmul.msk.bf16.gmra.mxu0 %vm918_vm0, %v2580_v43 }
 0x73d   : > { %v2553_v40 = vpop.f32.mrf.mxu3 }
 0x73e   : > { %v2554_v42 = vadd.f32 %v2553_v40, %v2465_v53 }
 0x73f   : > { %v2680_v1 = vpop.f32.mrf.mxu0 }
 0x740   : > { %v2747_v13 = vmax.f32 %v2680_v1, 0.0  ;;  %v7181_v1 = vld [vmem:[#allocation25_spill] sm:$0xff] }
 0x742   : > { %v2774_v17 = vpack.c.bf16 %v2747_v13, %v2746_v12  ;;  %v2357_v12 = vunpack.c.l.bf16 %v7181_v1 }
 0x744   : > { %5257 = vmatmul.msk.bf16.gmra.mxu1 %vm918_vm0, %v2774_v17  ;;  %v2476_v17 = vpop.f32.mrf.mxu2  ;;  %v2389_v53 = vmul.f32 33.0, %v2357_v12 }
 0x745   : > { %v2555_v37 = vpop.f32.mrf.mxu3 }
 0x746   : > { %v2556_v19 = vadd.f32 %v2555_v37, %v2467_v11  ;;  %v2475_v37 = vadd.f32 %v2474_v54, %v2388_v55 }
 0x747   : > { %v2683_v10 = vpop.f32.mrf.mxu0 }
 0x748   : > { %v2581_v6 = vpack.c.bf16 %v2556_v19, %v2554_v42  ;;  %v2748_v5 = vmax.f32 %v2683_v10, 0.0  ;;  %v2477_v42 = vadd.f32 %v2476_v17, %v2389_v53 }
 0x74a   : > { %5238 = vmatmul.msk.bf16.gmra.mxu0 %vm918_vm0, %v2581_v6 }
 0x74d   : > { %v2558_v38 = vpop.f32.mrf.mxu3 }
 0x74e   : > { %v2559_v18 = vadd.f32 %v2558_v38, %v2470_v25 }
 0x74f   : > { %v2685_v46 = vpop.f32.mrf.mxu0 }
 0x750   : > { %v2749_v41 = vmax.f32 %v2685_v46, 0.0 }
 0x752   : > { %v2775_v23 = vpack.c.bf16 %v2749_v41, %v2748_v5  ;;  %v6497_v41 = vpop.f32.mrf.mxu1 }
 0x753   : > { %7183 = vst [vmem:[#allocation23_spill] sm:$0xff] %v6497_v41 }
 0x754   : > { %5258 = vmatmul.msk.bf16.gmra.mxu1 %vm918_vm0, %v2775_v23 }
 0x755   : > { %v2560_v61 = vpop.f32.mrf.mxu3 }
 0x756   : > { %v2561_v7 = vadd.f32 %v2560_v61, %v2472_v44 }
 0x757   : > { %v2688_v43 = vpop.f32.mrf.mxu0 }
 0x758   : > { %v2582_v50 = vpack.c.bf16 %v2561_v7, %v2559_v18  ;;  %v2750_v26 = vmax.f32 %v2688_v43, 0.0 }
 0x75a   : > { %5239 = vmatmul.msk.bf16.gmra.mxu0 %vm918_vm0, %v2582_v50 }
 0x75d   : > { %v2563_v40 = vpop.f32.mrf.mxu3 }
 0x75e   : > { %v2564_v10 = vadd.f32 %v2563_v40, %v2475_v37 }
 0x75f   : > { %v2690_v13 = vpop.f32.mrf.mxu0 }
 0x760   : > { %v2751_v16 = vmax.f32 %v2690_v13, 0.0 }
 0x762   : > { %v2776_v11 = vpack.c.bf16 %v2751_v16, %v2750_v26 }
 0x764   : > { %5259 = vmatmul.msk.bf16.gmra.mxu1 %vm918_vm0, %v2776_v11 }
 0x765   : > { %v2565_v19 = vpop.f32.mrf.mxu3 }
 0x766   : > { %v2566_v6 = vadd.f32 %v2565_v19, %v2477_v42 }
 0x767   : > { %v2693_v20 = vpop.f32.mrf.mxu0 }
 0x768   : > { %v2583_v38 = vpack.c.bf16 %v2566_v6, %v2564_v10  ;;  %v2752_v30 = vmax.f32 %v2693_v20, 0.0 }
 0x76a   : > { %5240 = vmatmul.msk.bf16.gmra.mxu0 %vm918_vm0, %v2583_v38 }
 0x76f   : > { %v2695_v49 = vpop.f32.mrf.mxu0 }
 0x770   : > { %v2753_v35 = vmax.f32 %v2695_v49, 0.0 }
 0x772   : > { %v2777_v46 = vpack.c.bf16 %v2753_v35, %v2752_v30 }
 0x774   : > { %5260 = vmatmul.msk.bf16.gmra.mxu1 %vm918_vm0, %v2777_v46 }
 0x777   : > { %v2698_v5 = vpop.f32.mrf.mxu0 }
 0x778   : > { %v2754_v3 = vmax.f32 %v2698_v5, 0.0 }
 0x77f   : > { %v2700_v4 = vpop.f32.mrf.mxu0 }
 0x780   : > { %v2755_v23 = vmax.f32 %v2700_v4, 0.0 }
 0x781   : > { %v2860_v25 = vpop.f32.mrf.mxu1 }
 0x782   : > { %v2778_v44 = vpack.c.bf16 %v2755_v23, %v2754_v3  ;;  %v2940_v61 = vmax.f32 %v2860_v25, 0.0 }
 0x784   : > { %5261 = vmatmul.msk.bf16.gmra.mxu1 %vm918_vm0, %v2778_v44  ;;  %v6500_v54 = vpack.c.bf16 %v2940_v61, %v2940_v61 }
 0x786   : > { %v3036_v40 = vunpack.c.l.b16 %v6500_v54 }
 0x787   : > { %v2703_v18 = vpop.f32.mrf.mxu0 }
 0x788   : > { %v2756_v1 = vmax.f32 %v2703_v18, 0.0 }
 0x789   : > { %v2862_v7 = vpop.f32.mrf.mxu1 }
 0x78a   : > { %v2941_v43 = vmax.f32 %v2862_v7, 0.0 }
 0x78c   : > { %v6502_v50 = vpack.c.bf16 %v2941_v43, %v2941_v43 }
 0x78e   : > { %v3037_v52 = vunpack.c.l.b16 %v6502_v50 }
 0x78f   : > { %v2705_v2 = vpop.f32.mrf.mxu0 }
 0x790   : > { %v2757_v12 = vmax.f32 %v2705_v2, 0.0  ;;  %v6506_v13 = vpack.c.b16 %v3037_v52, %v3036_v40 }
 0x791   : > { %v2865_v26 = vpop.f32.mrf.mxu1 }
 0x792   : > { %v2779_v16 = vpack.c.bf16 %v2757_v12, %v2756_v1  ;;  %v2942_v17 = vmax.f32 %v2865_v26, 0.0 }
 0x794   : > { %5262 = vmatmul.msk.bf16.gmra.mxu1 %vm918_vm0, %v2779_v16  ;;  %v6509_v11 = vpack.c.bf16 %v2942_v17, %v2942_v17 }
 0x796   : > { %v3038_v19 = vunpack.c.l.b16 %v6509_v11 }
 0x797   : > { %v2708_v55 = vpop.f32.mrf.mxu0 }
 0x798   : > { %v2758_v20 = vmax.f32 %v2708_v55, 0.0 }
 0x799   : > { %v2867_v53 = vpop.f32.mrf.mxu1 }
 0x79a   : > { %v2943_v37 = vmax.f32 %v2867_v53, 0.0 }
 0x79c   : > { %v6511_v42 = vpack.c.bf16 %v2943_v37, %v2943_v37 }
 0x79e   : > { %v3039_v10 = vunpack.c.l.b16 %v6511_v42 }
 0x79f   : > { %v2710_v6 = vpop.f32.mrf.mxu0 }
 0x7a0   : > { %v2759_v38 = vmax.f32 %v2710_v6, 0.0  ;;  %v6515_v49 = vpack.c.b16 %v3039_v10, %v3038_v19 }
 0x7a1   : > { %v2870_v30 = vpop.f32.mrf.mxu1 }
 0x7a2   : > { %v2780_v35 = vpack.c.bf16 %v2759_v38, %v2758_v20  ;;  %v2944_v46 = vmax.f32 %v2870_v30, 0.0 }
 0x7a4   : > { %5263 = vmatmul.msk.bf16.gmra.mxu1 %vm918_vm0, %v2780_v35  ;;  %v6518_v3 = vpack.c.bf16 %v2944_v46, %v2944_v46 }
 0x7a6   : > { %v3040_v44 = vunpack.c.l.b16 %v6518_v3 }
 0x7a7   : > { %v2713_v5 = vpop.f32.mrf.mxu0 }
 0x7a8   : > { %v2760_v7 = vmax.f32 %v2713_v5, 0.0 }
 0x7a9   : > { %v2872_v4 = vpop.f32.mrf.mxu1 }
 0x7aa   : > { %v2945_v23 = vmax.f32 %v2872_v4, 0.0 }
 0x7ac   : > { %v6520_v25 = vpack.c.bf16 %v2945_v23, %v2945_v23 }
 0x7ae   : > { %v3041_v61 = vunpack.c.l.b16 %v6520_v25 }
 0x7af   : > { %v2715_v18 = vpop.f32.mrf.mxu0 }
 0x7b0   : > { %v2761_v43 = vmax.f32 %v2715_v18, 0.0  ;;  %v6524_v40 = vpack.c.b16 %v3041_v61, %v3040_v44 }
 0x7b1   : > { %v2875_v52 = vpop.f32.mrf.mxu1 }
 0x7b2   : > { %v2781_v2 = vpack.c.bf16 %v2761_v43, %v2760_v7  ;;  %v2946_v1 = vmax.f32 %v2875_v52, 0.0 }
 0x7b4   : > { %5264 = vmatmul.msk.bf16.gmra.mxu1 %vm918_vm0, %v2781_v2  ;;  %v6527_v16 = vpack.c.bf16 %v2946_v1, %v2946_v1 }
 0x7b6   : > { %v3042_v53 = vunpack.c.l.b16 %v6527_v16 }
 0x7b7   : > { %v2718_v12 = vpop.f32.mrf.mxu0 }
 0x7b8   : > { %v2762_v10 = vmax.f32 %v2718_v12, 0.0 }
 0x7b9   : > { %v2877_v26 = vpop.f32.mrf.mxu1 }
 0x7ba   : > { %v2947_v17 = vmax.f32 %v2877_v26, 0.0 }
 0x7bc   : > { %v6529_v55 = vpack.c.bf16 %v2947_v17, %v2947_v17 }
 0x7be   : > { %v3043_v37 = vunpack.c.l.b16 %v6529_v55 }
 0x7bf   : > { %v2720_v19 = vpop.f32.mrf.mxu0 }
 0x7c0   : > { %v2763_v6 = vmax.f32 %v2720_v19, 0.0  ;;  %v6533_v20 = vpack.c.b16 %v3043_v37, %v3042_v53 }
 0x7c1   : > { %v2880_v38 = vpop.f32.mrf.mxu1 }
 0x7c2   : > { %v2782_v30 = vpack.c.bf16 %v2763_v6, %v2762_v10 }
 0x7c4   : > { %5265 = vmatmul.msk.bf16.gmra.mxu1 %vm918_vm0, %v2782_v30 }
 0x7c7   : > { %v2723_v35 = vpop.f32.mrf.mxu0 }
 0x7c8   : > { %v2764_v4 = vmax.f32 %v2723_v35, 0.0 }
 0x7c9   : > { %v2882_v46 = vpop.f32.mrf.mxu1 }
 0x7cf   : > { %v2725_v5 = vpop.f32.mrf.mxu0 }
 0x7d0   : > { %v2765_v23 = vmax.f32 %v2725_v5, 0.0 }
 0x7d1   : > { %v2885_v44 = vpop.f32.mrf.mxu1 }
 0x7d2   : > { %v2783_v61 = vpack.c.bf16 %v2765_v23, %v2764_v4 }
 0x7d4   : > { %5266 = vmatmul.msk.bf16.gmra.mxu1 %vm918_vm0, %v2783_v61 }
 0x7d7   : > { %v2728_v18 = vpop.f32.mrf.mxu0 }
 0x7d8   : > { %v2766_v52 = vmax.f32 %v2728_v18, 0.0 }
 0x7d9   : > { %v2887_v7 = vpop.f32.mrf.mxu1 }
 0x7da   : > { %v2951_v18 = vmax.f32 %v2887_v7, 0.0  ;;  %v2948_v7 = vmax.f32 %v2880_v38, 0.0 }
 0x7df   : > { %v2730_v43 = vpop.f32.mrf.mxu0 }
 0x7e0   : > { %v2767_v2 = vmax.f32 %v2730_v43, 0.0 }
 0x7e1   : > { %v2890_v1 = vpop.f32.mrf.mxu1 }
 0x7e2   : > { %v2784_v12 = vpack.c.bf16 %v2767_v2, %v2766_v52  ;;  %v2952_v4 = vmax.f32 %v2890_v1, 0.0  ;;  %v2950_v2 = vmax.f32 %v2885_v44, 0.0 }
 0x7e4   : > { %5267 = vmatmul.msk.bf16.gmra.mxu1 %vm918_vm0, %v2784_v12  ;;  %v6545_v12 = vpack.c.bf16 %v2952_v4, %v2952_v4 }
 0x7e6   : > { %7187 = vst [vmem:[#allocation30_spill] sm:$0xff] %v6545_v12 }
 0x7e7   : > { %v2733_v26 = vpop.f32.mrf.mxu0 }
 0x7e8   : > { %v2768_v37 = vmax.f32 %v2733_v26, 0.0 }
 0x7e9   : > { %v2892_v17 = vpop.f32.mrf.mxu1 }
 0x7ea   : > { %v2953_v35 = vmax.f32 %v2892_v17, 0.0 }
 0x7ec   : > { %v6541_v43 = vpack.c.bf16 %v2953_v35, %v2953_v35 }
 0x7ee   : > { %7185 = vst [vmem:[#allocation25_spill] sm:$0xff] %v6541_v43  ;;  %v3049_v1 = vunpack.c.l.b16 %v6541_v43 }
 0x7ef   : > { %v2735_v53 = vpop.f32.mrf.mxu0 }
 0x7f0   : > { %v2769_v19 = vmax.f32 %v2735_v53, 0.0 }
 0x7f1   : > { %v2895_v10 = vpop.f32.mrf.mxu1 }
 0x7f2   : > { %v2785_v6 = vpack.c.bf16 %v2769_v19, %v2768_v37  ;;  %v2954_v30 = vmax.f32 %v2895_v10, 0.0  ;;  %v2949_v37 = vmax.f32 %v2882_v46, 0.0  ;;  %v6549_v19 = vpack.c.bf16 %v2951_v18, %v2951_v18 }
 0x7f3   : > { %v6560_v46 = vpack.c.bf16 %v2948_v7, %v2948_v7  ;;  %v7189_v7 = vld [vmem:[#allocation27_spill] sm:$0xff] }
 0x7f4   : > { %5268 = vmatmul.msk.bf16.gmra.mxu1 %vm918_vm0, %v2785_v6  ;;  %v6539_v23 = vpack.c.bf16 %v2954_v30, %v2954_v30  ;;  %v6554_v6 = vpack.c.bf16 %v2950_v2, %v2950_v2  ;;  %v3048_v30 = vunpack.c.l.b16 %v6545_v12  ;;  %v6557_v44 = vpack.c.bf16 %v2949_v37, %v2949_v37 }
 0x7f5   : > { %v3047_v35 = vunpack.c.l.b16 %v6549_v19  ;;  %v3044_v2 = vunpack.c.l.b16 %v6560_v46 }
 0x7f6   : > { %7184 = vst [vmem:[#allocation24_spill] sm:$0xff] %v6539_v23  ;;  %v3050_v26 = vunpack.c.l.b16 %v6539_v23  ;;  %v3046_v4 = vunpack.c.l.b16 %v6554_v6 }
 0x7f8   : > { %v3073_v38 = vpack.c.b16 %v3047_v35, %v3046_v4  ;;  %v7190_v35 = vld [vmem:[#allocation6_spill] sm:$0xff]  ;;  %v7191_v4 = vld [vmem:[#allocation7_spill] sm:$0xff] }
 0x7f9   : > { %v2897_v5 = vpop.f32.mrf.mxu1 }
 0x7fa   : > { %v2955_v61 = vmax.f32 %v2897_v5, 0.0  ;;  %v3074_v5 = vpack.c.b16 %v3049_v1, %v3048_v30 }
 0x7fc   : > { %v6543_v52 = vpack.c.bf16 %v2955_v61, %v2955_v61  ;;  %v3045_v61 = vunpack.c.l.b16 %v6557_v44 }
 0x7fe   : > { %7186 = vst [vmem:[#allocation29_spill] sm:$0xff] %v6543_v52  ;;  %v3051_v53 = vunpack.c.l.b16 %v6543_v52 }
 0x800   : > { %v3075_v17 = vpack.c.b16 %v3051_v53, %v3050_v26  ;;  %v3072_v26 = vpack.c.b16 %v3045_v61, %v3044_v2 }
 0x801   : > { %v6552_v10 = vpop.f32.mrf.mxu1 }
 0x802   : > { %3100 = vmatpush.bf16.msra.mxu0 %v3075_v17  ;;  %3229 = vmatpush.bf16.msrb.mxu3 %v3075_v17  ;;  %v7188_v17 = vld [vmem:[#allocation5_spill] sm:$0xff] }
 0x806   : > { %3101 = vmatpush.bf16.msra.mxu0 %v3074_v5  ;;  %3230 = vmatpush.bf16.msrb.mxu3 %v3074_v5 }
 0x809   : > { %v6564_v18 = vpop.f32.mrf.mxu1 }
 0x80a   : > { %3102 = vmatpush.bf16.msra.mxu0 %v3073_v38  ;;  %3231 = vmatpush.bf16.msrb.mxu3 %v3073_v38  ;;  %v7192_v38 = vld [vmem:[#allocation8_spill] sm:$0xff] }
 0x80e   : > { %3103 = vmatpush.bf16.msra.mxu0 %v3072_v26  ;;  %3232 = vmatpush.bf16.msrb.mxu3 %v3072_v26  ;;  %v7193_v26 = vld [vmem:[#allocation9_spill] sm:$0xff] }
 0x811   : > { %v6567_v53 = vpop.f32.mrf.mxu1 }
 0x812   : > { %3104 = vmatpush.bf16.msra.mxu0 %v6533_v20  ;;  %3233 = vmatpush.bf16.msrb.mxu3 %v6533_v20 }
 0x816   : > { %3105 = vmatpush.bf16.msra.mxu0 %v6524_v40  ;;  %3234 = vmatpush.bf16.msrb.mxu3 %v6524_v40 }
 0x819   : > { %v6573_v37 = vpop.f32.mrf.mxu1 }
 0x81a   : > { %3106 = vmatpush.bf16.msra.mxu0 %v6515_v49  ;;  %3235 = vmatpush.bf16.msrb.mxu3 %v6515_v49 }
 0x81e   : > { %3107 = vmatpush.bf16.msra.mxu0 %v6506_v13  ;;  %3236 = vmatpush.bf16.msrb.mxu3 %v6506_v13 }
 0x821   : > { %v6579_v1 = vpop.f32.mrf.mxu1  ;;  %3237 = vmatmul.bf16.vlgmr.msrb.gmra.mxu3 %v7188_v17  ;;  %3108 = vmatmul.bf16.vlgmr.msra.gmra.mxu0 %v7189_v7  ;;  %v7194_v17 = vld [vmem:[#allocation10_spill] sm:$0xff] }
 0x829   : > { %v2912_v20 = vpop.f32.mrf.mxu1 }
 0x831   : > { %v2915_v30 = vpop.f32.mrf.mxu1  ;;  %3242 = vmatmul.bf16.gmra.mxu3 %v7190_v35 }
 0x839   : > { %v2917_v40 = vpop.f32.mrf.mxu1 }
 0x841   : > { %v2920_v5 = vpop.f32.mrf.mxu1  ;;  %3247 = vmatmul.bf16.gmra.mxu3 %v7191_v4 }
 0x849   : > { %v2922_v61 = vpop.f32.mrf.mxu1 }
 0x851   : > { %v2925_v49 = vpop.f32.mrf.mxu1  ;;  %3252 = vmatmul.bf16.gmra.mxu3 %v7192_v38 }
 0x852   : > { %v2966_v38 = vmax.f32 %v2925_v49, 0.0 }
 0x859   : > { %v2927_v2 = vpop.f32.mrf.mxu1 }
 0x85a   : > { %v2967_v4 = vmax.f32 %v2927_v2, 0.0 }
 0x861   : > { %v2930_v13 = vpop.f32.mrf.mxu1  ;;  %3257 = vmatmul.bf16.gmra.mxu3 %v7193_v26 }
 0x862   : > { %v2968_v35 = vmax.f32 %v2930_v13, 0.0 }
 0x864   : > { %v6594_v43 = vpack.c.bf16 %v2968_v35, %v2968_v35  ;;  %v2963_v35 = vmax.f32 %v2917_v40, 0.0  ;;  %v2960_v40 = vmax.f32 %v6579_v1, 0.0  ;;  %v2957_v1 = vmax.f32 %v6564_v18, 0.0 }
 0x869   : > { %v2932_v41 = vpop.f32.mrf.mxu1 }
 0x86a   : > { %v2969_v14 = vmax.f32 %v2932_v41, 0.0 }
 0x86c   : > { %v6590_v23 = vpack.c.bf16 %v2969_v14, %v2969_v14  ;;  %v6602_v14 = vpack.c.bf16 %v2966_v38, %v2966_v38  ;;  %v6611_v38 = vpack.c.bf16 %v2963_v35, %v2963_v35  ;;  %v6623_v35 = vpack.c.bf16 %v2960_v40, %v2960_v40 }
 0x86e   : > { %v3065_v41 = vunpack.c.l.b16 %v6590_v23 }
 0x871   : > { %v2935_v15 = vpop.f32.mrf.mxu1  ;;  %3262 = vmatmul.bf16.gmra.mxu3 %v7194_v17  ;;  %v2965_v17 = vmax.f32 %v2922_v61, 0.0 }
 0x872   : > { %v2970_v7 = vmax.f32 %v2935_v15, 0.0  ;;  %v6598_v15 = vpack.c.bf16 %v2967_v4, %v2967_v4  ;;  %v2962_v4 = vmax.f32 %v2915_v30, 0.0  ;;  %v2959_v30 = vmax.f32 %v6573_v37, 0.0 }
 0x873   : > { %v6605_v49 = vpack.c.bf16 %v2965_v17, %v2965_v17 }
 0x874   : > { %v6588_v36 = vpack.c.bf16 %v2970_v7, %v2970_v7  ;;  %v3063_v2 = vunpack.c.l.b16 %v6598_v15  ;;  %v6615_v17 = vpack.c.bf16 %v2962_v4, %v2962_v4  ;;  %v2956_v4 = vmax.f32 %v6552_v10, 0.0 }
 0x876   : > { %v3066_v26 = vunpack.c.l.b16 %v6588_v36  ;;  %v6638_v40 = vpack.c.bf16 %v2956_v4, %v2956_v4 }
 0x879   : > { %v2937_v28 = vpop.f32.mrf.mxu1 }
 0x87a   : > { %v2971_v52 = vmax.f32 %v2937_v28, 0.0  ;;  %v2964_v28 = vmax.f32 %v2920_v5, 0.0  ;;  %v2961_v5 = vmax.f32 %v2912_v20, 0.0 }
 0x87c   : > { %v6592_v32 = vpack.c.bf16 %v2971_v52, %v2971_v52  ;;  %v3064_v52 = vunpack.c.l.b16 %v6594_v43  ;;  %v6608_v13 = vpack.c.bf16 %v2964_v28, %v2964_v28  ;;  %v3059_v28 = vunpack.c.l.b16 %v6611_v38 }
 0x87e   : > { %v3067_v12 = vunpack.c.l.b16 %v6592_v32  ;;  %v3082_v61 = vpack.c.b16 %v3065_v41, %v3064_v52  ;;  %v6619_v41 = vpack.c.bf16 %v2961_v5, %v2961_v5  ;;  %v2958_v52 = vmax.f32 %v6567_v53, 0.0 }
 0x87f   : > { %v3056_v53 = vunpack.c.l.b16 %v6623_v35  ;;  %v6635_v5 = vpack.c.bf16 %v2957_v1, %v2957_v1 }
 0x880   : > { %v3083_v7 = vpack.c.b16 %v3067_v12, %v3066_v26  ;;  %v3062_v12 = vunpack.c.l.b16 %v6602_v14  ;;  %v3061_v26 = vunpack.c.l.b16 %v6605_v49 }
 0x881   : > { %3267 = vmatmul.bf16.gmra.mxu3 %v7168_v48 }
 0x882   : > { %3114 = vmatpush.bf16.msra.mxu1 %v3083_v7  ;;  %3318 = vmatpush.bf16.msrb.mxu0 %v3083_v7  ;;  %v3081_v48 = vpack.c.b16 %v3063_v2, %v3062_v12  ;;  %v3060_v7 = vunpack.c.l.b16 %v6608_v13  ;;  %v3058_v2 = vunpack.c.l.b16 %v6615_v17  ;;  %v6632_v12 = vpack.c.bf16 %v2958_v52, %v2958_v52 }
 0x883   : > { %v3165_v52 = vunpack.c.l.bf16 %v6500_v54 }
 0x884   : > { %v3080_v20 = vpack.c.b16 %v3061_v26, %v3060_v7  ;;  %v3079_v37 = vpack.c.b16 %v3059_v28, %v3058_v2  ;;  %v3054_v7 = vunpack.c.l.b16 %v6632_v12  ;;  %v3052_v28 = vunpack.c.l.b16 %v6638_v40 }
 0x885   : > { %v3197_v2 = vmul.f32 33.0, %v3165_v52 }
 0x886   : > { %3115 = vmatpush.bf16.msra.mxu1 %v3082_v61  ;;  %3319 = vmatpush.bf16.msrb.mxu0 %v3082_v61  ;;  %v6627_v61 = vpack.c.bf16 %v2959_v30, %v2959_v30  ;;  %v3053_v30 = vunpack.c.l.b16 %v6635_v5 }
 0x888   : > { %v3055_v26 = vunpack.c.l.b16 %v6627_v61 }
 0x88a   : > { %3116 = vmatpush.bf16.msra.mxu1 %v3081_v48  ;;  %3320 = vmatpush.bf16.msrb.mxu0 %v3081_v48  ;;  %v3057_v48 = vunpack.c.l.b16 %v6619_v41  ;;  %v3077_v10 = vpack.c.b16 %v3055_v26, %v3054_v7 }
 0x88c   : > { %v3078_v18 = vpack.c.b16 %v3057_v48, %v3056_v53 }
 0x88e   : > { %3117 = vmatpush.bf16.msra.mxu1 %v3080_v20  ;;  %3321 = vmatpush.bf16.msrb.mxu0 %v3080_v20  ;;  %v3076_v20 = vpack.c.b16 %v3053_v30, %v3052_v28 }
 0x891   : > { %3272 = vmatmul.bf16.gmra.mxu3 %v5855_v0 }
 0x892   : > { %3118 = vmatpush.bf16.msra.mxu1 %v3079_v37  ;;  %3322 = vmatpush.bf16.msrb.mxu0 %v3079_v37  ;;  %v3166_v37 = vunpack.c.l.bf16 %v6502_v50 }
 0x894   : > { %v3198_v4 = vmul.f32 33.0, %v3166_v37  ;;  %v3170_v37 = vunpack.c.l.bf16 %v6520_v25  ;;  %v5501_v25 = vld [vmem:[%s7067_s5 + $0x28] sm:$0xff] }
 0x895   : > { %3155 = vmatpush.bf16.msrb.mxu2 %v5501_v25 }
 0x896   : > { %3119 = vmatpush.bf16.msra.mxu1 %v3078_v18  ;;  %3323 = vmatpush.bf16.msrb.mxu0 %v3078_v18  ;;  %v3167_v18 = vunpack.c.l.bf16 %v6509_v11 }
 0x898   : > { %v3199_v54 = vmul.f32 33.0, %v3167_v18 }
 0x89a   : > { %3120 = vmatpush.bf16.msra.mxu1 %v3077_v10  ;;  %3324 = vmatpush.bf16.msrb.mxu0 %v3077_v10  ;;  %v3168_v10 = vunpack.c.l.bf16 %v6511_v42 }
 0x89c   : > { %v3200_v28 = vmul.f32 33.0, %v3168_v10  ;;  %v3172_v10 = vunpack.c.l.bf16 %v6529_v55  ;;  %v5500_v55 = vld [vmem:[%s7067_s5 + $0x20] sm:$0xff] }
 0x89d   : > { %3156 = vmatpush.bf16.msrb.mxu2 %v5500_v55 }
 0x89e   : > { %3121 = vmatpush.bf16.msra.mxu1 %v3076_v20  ;;  %3325 = vmatpush.bf16.msrb.mxu0 %v3076_v20 }
 0x8a1   : > { %3122 = vmatmul.bf16.vlgmr.msra.gmra.mxu1 %v6162_v29  ;;  %3277 = vmatmul.bf16.gmra.mxu3 %v5866_v8 }
 0x8a2   : > { %3326 = vmatmul.bf16.vlgmr.msrb.gmra.mxu0 %v5781_v21 }
 0x8a4   : > { %v3238_v1 = vpop.f32.mrf.mxu3 }
 0x8a5   : > { %v3239_v48 = vadd.f32 %v3238_v1, %v3197_v2  ;;  %v3169_v2 = vunpack.c.l.bf16 %v6518_v3 }
 0x8a7   : > { %v3201_v50 = vmul.f32 33.0, %v3169_v2 }
 0x8ac   : > { %v3240_v53 = vpop.f32.mrf.mxu3 }
 0x8ad   : > { %v3241_v26 = vadd.f32 %v3240_v53, %v3198_v4  ;;  %v3202_v4 = vmul.f32 33.0, %v3170_v37 }
 0x8b1   : > { %3282 = vmatmul.bf16.gmra.mxu3 %v5878_v34 }
 0x8b2   : > { %3331 = vmatmul.bf16.gmra.mxu0 %v5791_v27 }
 0x8b4   : > { %v3243_v7 = vpop.f32.mrf.mxu3 }
 0x8b5   : > { %v3244_v30 = vadd.f32 %v3243_v7, %v3199_v54  ;;  %v3171_v54 = vunpack.c.l.bf16 %v6527_v16  ;;  %v5503_v16 = vld [vmem:[%s7065_s3 + $0x38] sm:$0xff] }
 0x8b6   : > { %3494 = vmatpush.bf16.msrb.mxu1 %v5503_v16 }
 0x8b7   : > { %v3203_v42 = vmul.f32 33.0, %v3171_v54 }
 0x8bc   : > { %v3245_v20 = vpop.f32.mrf.mxu3 }
 0x8bd   : > { %v3246_v52 = vadd.f32 %v3245_v20, %v3200_v28  ;;  %v3204_v28 = vmul.f32 33.0, %v3172_v10 }
 0x8c1   : > { %3287 = vmatmul.bf16.gmra.mxu3 %v5890_v62 }
 0x8c2   : > { %3336 = vmatmul.bf16.gmra.mxu0 %v5801_v33 }
 0x8c4   : > { %v3248_v11 = vpop.f32.mrf.mxu3 }
 0x8c5   : > { %v3249_v1 = vadd.f32 %v3248_v11, %v3201_v50  ;;  %v5502_v50 = vld [vmem:[%s7065_s3 + $0x30] sm:$0xff]  ;;  %v3109_v11 = vpop.f32.mrf.mxu0 }
 0x8c6   : > { %3495 = vmatpush.bf16.msrb.mxu1 %v5502_v50 }
 0x8cc   : > { %v3250_v53 = vpop.f32.mrf.mxu3 }
 0x8cd   : > { %v3251_v18 = vadd.f32 %v3250_v53, %v3202_v4  ;;  %v3111_v37 = vpop.f32.mrf.mxu0 }
 0x8d1   : > { %3292 = vmatmul.bf16.gmra.mxu3 %v5902_v24 }
 0x8d2   : > { %3341 = vmatmul.bf16.gmra.mxu0 %v5811_v39 }
 0x8d4   : > { %v3253_v3 = vpop.f32.mrf.mxu3 }
 0x8d5   : > { %v3254_v7 = vadd.f32 %v3253_v3, %v3203_v42 }
 0x8dc   : > { %v3255_v20 = vpop.f32.mrf.mxu3 }
 0x8dd   : > { %v3256_v2 = vadd.f32 %v3255_v20, %v3204_v28 }
 0x8e1   : > { %3297 = vmatmul.bf16.gmra.mxu3 %v5914_v58 }
 0x8e2   : > { %3346 = vmatmul.bf16.gmra.mxu0 %v5821_v45 }
 0x8e4   : > { %v3258_v55 = vpop.f32.mrf.mxu3 }
 0x8f1   : > { %3302 = vmatmul.bf16.gmra.mxu3 %v5926_v22 }
 0x8f2   : > { %3351 = vmatmul.bf16.gmra.mxu0 %v5831_v51 }
 0x901   : > { %3307 = vmatmul.bf16.gmra.mxu3 %v5938_v60 }
 0x902   : > { %3356 = vmatmul.bf16.gmra.mxu0 %v5841_v57 }
 0x911   : > { %3312 = vmatmul.bf16.gmra.mxu3 %v7169_v47  ;;  %v3260_v47 = vpop.f32.mrf.mxu3 }
 0x912   : > { %3361 = vmatmul.bf16.gmra.mxu0 %v7170_v56  ;;  %v7195_v56 = vld [vmem:[#allocation16_spill] sm:$0xff] }
 0x91e   : > { %v3123_v4 = vpop.f32.mrf.mxu1 }
 0x91f   : > { %v3327_v53 = vpop.f32.mrf.mxu0  ;;  %v3124_v42 = vadd.f32 %v3123_v4, %v3109_v11 }
 0x920   : > { %v3328_v28 = vadd.f32 %v3327_v53, %v3239_v48  ;;  %v3263_v48 = vpop.f32.mrf.mxu3 }
 0x922   : > { %3366 = vmatmul.bf16.gmra.mxu0 %v5868_v9 }
 0x926   : > { %v3125_v54 = vpop.f32.mrf.mxu1 }
 0x927   : > { %v3126_v3 = vadd.f32 %v3125_v54, %v3111_v37  ;;  %v3329_v10 = vpop.f32.mrf.mxu0 }
 0x928   : > { %v3330_v20 = vadd.f32 %v3329_v10, %v3241_v26  ;;  %v3265_v54 = vpop.f32.mrf.mxu3 }
 0x929   : > { %v3128_v25 = vpack.c.bf16 %v3126_v3, %v3124_v42  ;;  %v7196_v3 = vld [vmem:[#allocation17_spill] sm:$0xff] }
 0x92a   : > { %v3407_v16 = vpack.c.bf16 %v3330_v20, %v3328_v28  ;;  %v3173_v28 = vunpack.c.l.bf16 %v6560_v46  ;;  %v3176_v46 = vunpack.c.l.bf16 %v6549_v19  ;;  %v7199_v19 = vld [vmem:[#allocation20_spill] sm:$0xff] }
 0x92b   : > { %5281 = vmatmul.msk.bf16.vlgmr.msrb.gmra.mxu2 %vm918_vm0, %v3128_v25 }
 0x92c   : > { %5294 = vmatmul.msk.bf16.vlgmr.msrb.gmra.mxu1 %vm918_vm0, %v3407_v16 }
 0x92f   : > { %v3332_v50 = vpop.f32.mrf.mxu0 }
 0x930   : > { %v3333_v60 = vadd.f32 %v3332_v50, %v3244_v30  ;;  %v3268_v10 = vpop.f32.mrf.mxu3 }
 0x932   : > { %3371 = vmatmul.bf16.gmra.mxu0 %v7195_v56 }
 0x937   : > { %v3334_v57 = vpop.f32.mrf.mxu0 }
 0x938   : > { %v3335_v9 = vadd.f32 %v3334_v57, %v3246_v52 }
 0x93a   : > { %v3408_v51 = vpack.c.bf16 %v3335_v9, %v3333_v60 }
 0x93c   : > { %5295 = vmatmul.msk.bf16.gmra.mxu1 %vm918_vm0, %v3408_v51  ;;  %v3270_v51 = vpop.f32.mrf.mxu3 }
 0x93f   : > { %v3337_v11 = vpop.f32.mrf.mxu0 }
 0x940   : > { %v3338_v37 = vadd.f32 %v3337_v11, %v3249_v1  ;;  %v3174_v1 = vunpack.c.l.bf16 %v6557_v44 }
 0x942   : > { %3376 = vmatmul.bf16.gmra.mxu0 %v5892_v63  ;;  %v3206_v20 = vmul.f32 33.0, %v3174_v1  ;;  %v7197_v1 = vld [vmem:[#allocation30_spill] sm:$0xff] }
 0x944   : > { %v3261_v16 = vadd.f32 %v3260_v47, %v3206_v20 }
 0x947   : > { %v3339_v26 = vpop.f32.mrf.mxu0 }
 0x948   : > { %v3340_v4 = vadd.f32 %v3339_v26, %v3251_v18  ;;  %v3205_v18 = vmul.f32 33.0, %v3173_v28 }
 0x94a   : > { %v3409_v53 = vpack.c.bf16 %v3340_v4, %v3338_v37  ;;  %v3259_v25 = vadd.f32 %v3258_v55, %v3205_v18  ;;  %v3175_v4 = vunpack.c.l.bf16 %v6554_v6  ;;  %v3177_v18 = vunpack.c.l.bf16 %v7197_v1  ;;  %v7198_v6 = vld [vmem:[#allocation25_spill] sm:$0xff] }
 0x94b   : > { %v3178_v20 = vunpack.c.l.bf16 %v7198_v6 }
 0x94c   : > { %5296 = vmatmul.msk.bf16.gmra.mxu1 %vm918_vm0, %v3409_v53  ;;  %v3207_v53 = vmul.f32 33.0, %v3175_v4  ;;  %v5505_v4 = vld [vmem:[%s7066_s4 + $0x38] sm:$0xff] }
 0x94d   : > { %3696 = vmatpush.bf16.msra.mxu2 %v5505_v4 }
 0x94f   : > { %v3342_v42 = vpop.f32.mrf.mxu0 }
 0x950   : > { %v3343_v57 = vadd.f32 %v3342_v42, %v3254_v7  ;;  %v3273_v7 = vpop.f32.mrf.mxu3  ;;  %v3208_v42 = vmul.f32 33.0, %v3176_v46 }
 0x952   : > { %3381 = vmatmul.bf16.gmra.mxu0 %v7196_v3  ;;  %v3266_v55 = vadd.f32 %v3265_v54, %v3208_v42 }
 0x957   : > { %v3344_v30 = vpop.f32.mrf.mxu0 }
 0x958   : > { %v3345_v9 = vadd.f32 %v3344_v30, %v3256_v2  ;;  %v3275_v44 = vpop.f32.mrf.mxu3  ;;  %v3264_v30 = vadd.f32 %v3263_v48, %v3207_v53  ;;  %v7200_v53 = vld [vmem:[#allocation24_spill] sm:$0xff] }
 0x959   : > { %v3179_v42 = vunpack.c.l.bf16 %v7200_v53 }
 0x95a   : > { %v3410_v60 = vpack.c.bf16 %v3345_v9, %v3343_v57 }
 0x95c   : > { %5297 = vmatmul.msk.bf16.gmra.mxu1 %vm918_vm0, %v3410_v60 }
 0x95f   : > { %v3347_v52 = vpop.f32.mrf.mxu0 }
 0x960   : > { %v3348_v11 = vadd.f32 %v3347_v52, %v3259_v25  ;;  %v3278_v52 = vpop.f32.mrf.mxu3  ;;  %v3209_v25 = vmul.f32 33.0, %v3177_v18 }
 0x962   : > { %3386 = vmatmul.bf16.gmra.mxu0 %v5916_v59 }
 0x967   : > { %v3349_v50 = vpop.f32.mrf.mxu0 }
 0x968   : > { %v3350_v26 = vadd.f32 %v3349_v50, %v3261_v16  ;;  %v3210_v16 = vmul.f32 33.0, %v3178_v20  ;;  %v3269_v50 = vadd.f32 %v3268_v10, %v3209_v25  ;;  %v3280_v48 = vpop.f32.mrf.mxu3  ;;  %v5504_v10 = vld [vmem:[%s7066_s4 + $0x30] sm:$0xff] }
 0x969   : > { %3697 = vmatpush.bf16.msra.mxu2 %v5504_v10 }
 0x96a   : > { %v3411_v2 = vpack.c.bf16 %v3350_v26, %v3348_v11  ;;  %v3271_v11 = vadd.f32 %v3270_v51, %v3210_v16  ;;  %v7202_v51 = vld [vmem:[#allocation22_spill] sm:$0xff] }
 0x96c   : > { %5298 = vmatmul.msk.bf16.gmra.mxu1 %vm918_vm0, %v3411_v2 }
 0x96f   : > { %v3352_v37 = vpop.f32.mrf.mxu0 }
 0x970   : > { %v3353_v57 = vadd.f32 %v3352_v37, %v3264_v30  ;;  %v7201_v30 = vld [vmem:[#allocation29_spill] sm:$0xff] }
 0x972   : > { %3391 = vmatmul.bf16.gmra.mxu0 %v7149_v31 }
 0x977   : > { %v3354_v47 = vpop.f32.mrf.mxu0 }
 0x978   : > { %v3355_v9 = vadd.f32 %v3354_v47, %v3266_v55  ;;  %v3180_v55 = vunpack.c.l.bf16 %v7201_v30  ;;  %v3283_v47 = vpop.f32.mrf.mxu3  ;;  %v7203_v30 = vld [vmem:[#allocation18_spill] sm:$0xff] }
 0x97a   : > { %v3412_v60 = vpack.c.bf16 %v3355_v9, %v3353_v57  ;;  %v3211_v57 = vmul.f32 33.0, %v3179_v42  ;;  %v3212_v9 = vmul.f32 33.0, %v3180_v55  ;;  %v7204_v55 = vld [vmem:[#allocation28_spill] sm:$0xff] }
 0x97b   : > { %v2322_v10 = vadd.f32 %v7204_v55, %v7203_v30 }
 0x97c   : > { %5299 = vmatmul.msk.bf16.gmra.mxu1 %vm918_vm0, %v3412_v60  ;;  %v3274_v60 = vadd.f32 %v3273_v7, %v3211_v57 }
 0x97f   : > { %v3357_v28 = vpop.f32.mrf.mxu0 }
 0x980   : > { %v3358_v26 = vadd.f32 %v3357_v28, %v3269_v50  ;;  %v3276_v28 = vadd.f32 %v3275_v44, %v3212_v9  ;;  %v3285_v25 = vpop.f32.mrf.mxu3  ;;  %v3181_v50 = vunpack.c.l.bf16 %v6638_v40 }
 0x982   : > { %3396 = vmatmul.bf16.gmra.mxu0 %v7199_v19 }
 0x987   : > { %v3359_v54 = vpop.f32.mrf.mxu0 }
 0x988   : > { %v3360_v2 = vadd.f32 %v3359_v54, %v3271_v11  ;;  %v3182_v11 = vunpack.c.l.bf16 %v6635_v5  ;;  %v3213_v54 = vmul.f32 33.0, %v3181_v50 }
 0x98a   : > { %v3413_v37 = vpack.c.bf16 %v3360_v2, %v3358_v26  ;;  %v3214_v26 = vmul.f32 33.0, %v3182_v11  ;;  %v3288_v2 = vpop.f32.mrf.mxu3 }
 0x98c   : > { %5300 = vmatmul.msk.bf16.gmra.mxu1 %vm918_vm0, %v3413_v37  ;;  %v3279_v37 = vadd.f32 %v3278_v52, %v3213_v54  ;;  %v3281_v4 = vadd.f32 %v3280_v48, %v3214_v26  ;;  %v3184_v52 = vunpack.c.l.bf16 %v6627_v61  ;;  %v3185_v61 = vunpack.c.l.bf16 %v6623_v35 }
 0x98f   : > { %v3362_v46 = vpop.f32.mrf.mxu0 }
 0x990   : > { %v3363_v18 = vadd.f32 %v3362_v46, %v3274_v60  ;;  %v3183_v60 = vunpack.c.l.bf16 %v6632_v12 }
 0x992   : > { %3401 = vmatmul.bf16.gmra.mxu0 %v7202_v51  ;;  %v3290_v9 = vpop.f32.mrf.mxu3 }
 0x997   : > { %v3364_v1 = vpop.f32.mrf.mxu0 }
 0x998   : > { %v3365_v6 = vadd.f32 %v3364_v1, %v3276_v28 }
 0x99a   : > { %v3414_v20 = vpack.c.bf16 %v3365_v6, %v3363_v18  ;;  %v3215_v18 = vmul.f32 33.0, %v3183_v60  ;;  %v3216_v6 = vmul.f32 33.0, %v3184_v52 }
 0x99c   : > { %5301 = vmatmul.msk.bf16.gmra.mxu1 %vm918_vm0, %v3414_v20  ;;  %v3286_v50 = vadd.f32 %v3285_v25, %v3216_v6  ;;  %v3217_v25 = vmul.f32 33.0, %v3185_v61 }
 0x99f   : > { %v3367_v16 = vpop.f32.mrf.mxu0 }
 0x9a0   : > { %v3368_v7 = vadd.f32 %v3367_v16, %v3279_v37  ;;  %v3284_v16 = vadd.f32 %v3283_v47, %v3215_v18  ;;  %v3293_v37 = vpop.f32.mrf.mxu3  ;;  %v3188_v18 = vunpack.c.l.bf16 %v6611_v38  ;;  %v3189_v38 = vunpack.c.l.bf16 %v6608_v13 }
 0x9a1   : > { %v3191_v13 = vunpack.c.l.bf16 %v6602_v14 }
 0x9a7   : > { %v3369_v53 = vpop.f32.mrf.mxu0 }
 0x9a8   : > { %v3370_v44 = vadd.f32 %v3369_v53, %v3281_v4  ;;  %v3295_v47 = vpop.f32.mrf.mxu3 }
 0x9a9   : > { %v3497_v42 = vpop.f32.mrf.mxu1 }
 0x9aa   : > { %v3415_v46 = vpack.c.bf16 %v3370_v44, %v3368_v7  ;;  %v3577_v28 = vmax.f32 %v3497_v42, 0.0  ;;  %v3186_v7 = vunpack.c.l.bf16 %v6619_v41 }
 0x9ac   : > { %5302 = vmatmul.msk.bf16.gmra.mxu1 %vm918_vm0, %v3415_v46  ;;  %v3218_v30 = vmul.f32 33.0, %v3186_v7 }
 0x9ae   : > { %v3158_v57 = vpop.f32.mrf.mxu2 }
 0x9af   : > { %v6716_v40 = vadd.f32 %v3158_v57, %v2322_v10  ;;  %v3372_v5 = vpop.f32.mrf.mxu0  ;;  %v3289_v10 = vadd.f32 %v3288_v2, %v3217_v25  ;;  %v3291_v57 = vadd.f32 %v3290_v9, %v3218_v30  ;;  %v3220_v9 = vmul.f32 33.0, %v3188_v18 }
 0x9b0   : > { %v3373_v54 = vadd.f32 %v3372_v5, %v3284_v16  ;;  %v3298_v35 = vpop.f32.mrf.mxu3 }
 0x9b1   : > { %7205 = vst [vmem:[#allocation16_spill] sm:$0xff] %v6716_v40  ;;  %v3499_v48 = vpop.f32.mrf.mxu1 }
 0x9b2   : > { %v3578_v1 = vmax.f32 %v3499_v48, 0.0 }
 0x9b4   : > { %v3609_v20 = vpack.c.bf16 %v3578_v1, %v3577_v28  ;;  %v3187_v1 = vunpack.c.l.bf16 %v6615_v17 }
 0x9b6   : > { %5322 = vmatmul.msk.bf16.vlgmr.msra.gmra.mxu2 %vm918_vm0, %v3609_v20  ;;  %v3219_v2 = vmul.f32 33.0, %v3187_v1  ;;  %v3192_v1 = vunpack.c.l.bf16 %v6598_v15 }
 0x9b7   : > { %v3374_v11 = vpop.f32.mrf.mxu0 }
 0x9b8   : > { %v3375_v26 = vadd.f32 %v3374_v11, %v3286_v50  ;;  %v3294_v11 = vadd.f32 %v3293_v37, %v3219_v2 }
 0x9b9   : > { %v3502_v4 = vpop.f32.mrf.mxu1 }
 0x9ba   : > { %v3416_v53 = vpack.c.bf16 %v3375_v26, %v3373_v54  ;;  %v3579_v42 = vmax.f32 %v3502_v4, 0.0  ;;  %v3296_v54 = vadd.f32 %v3295_v47, %v3220_v9  ;;  %v3300_v26 = vpop.f32.mrf.mxu3  ;;  %v3221_v47 = vmul.f32 33.0, %v3189_v38 }
 0x9bc   : > { %5303 = vmatmul.msk.bf16.gmra.mxu1 %vm918_vm0, %v3416_v53 }
 0x9bf   : > { %v3377_v12 = vpop.f32.mrf.mxu0 }
 0x9c0   : > { %v3378_v60 = vadd.f32 %v3377_v12, %v3289_v10  ;;  %v3299_v10 = vadd.f32 %v3298_v35, %v3221_v47  ;;  %v3223_v35 = vmul.f32 33.0, %v3191_v13 }
 0x9c1   : > { %v3504_v44 = vpop.f32.mrf.mxu1 }
 0x9c2   : > { %v3580_v46 = vmax.f32 %v3504_v44, 0.0  ;;  %v3190_v44 = vunpack.c.l.bf16 %v6605_v49 }
 0x9c4   : > { %v3610_v55 = vpack.c.bf16 %v3580_v46, %v3579_v42  ;;  %v3303_v42 = vpop.f32.mrf.mxu3  ;;  %v3222_v30 = vmul.f32 33.0, %v3190_v44 }
 0x9c6   : > { %5323 = vmatmul.msk.bf16.gmra.mxu2 %vm918_vm0, %v3610_v55 }
 0x9c7   : > { %v3379_v5 = vpop.f32.mrf.mxu0 }
 0x9c8   : > { %v3380_v52 = vadd.f32 %v3379_v5, %v3291_v57  ;;  %v3301_v57 = vadd.f32 %v3300_v26, %v3222_v30 }
 0x9c9   : > { %v3507_v48 = vpop.f32.mrf.mxu1 }
 0x9ca   : > { %v3417_v28 = vpack.c.bf16 %v3380_v52, %v3378_v60  ;;  %v3581_v20 = vmax.f32 %v3507_v48, 0.0 }
 0x9cc   : > { %5304 = vmatmul.msk.bf16.gmra.mxu1 %vm918_vm0, %v3417_v28 }
 0x9cf   : > { %v3382_v41 = vpop.f32.mrf.mxu0 }
 0x9d0   : > { %v3383_v53 = vadd.f32 %v3382_v41, %v3294_v11  ;;  %v3305_v41 = vpop.f32.mrf.mxu3 }
 0x9d1   : > { %v3509_v6 = vpop.f32.mrf.mxu1 }
 0x9d2   : > { %v3582_v16 = vmax.f32 %v3509_v6, 0.0 }
 0x9d4   : > { %v3611_v50 = vpack.c.bf16 %v3582_v16, %v3581_v20  ;;  %v3224_v16 = vmul.f32 33.0, %v3192_v1 }
 0x9d6   : > { %5324 = vmatmul.msk.bf16.gmra.mxu2 %vm918_vm0, %v3611_v50  ;;  %v3304_v50 = vadd.f32 %v3303_v42, %v3223_v35  ;;  %v3306_v11 = vadd.f32 %v3305_v41, %v3224_v16 }
 0x9d7   : > { %v3384_v4 = vpop.f32.mrf.mxu0 }
 0x9d8   : > { %v3385_v12 = vadd.f32 %v3384_v4, %v3296_v54  ;;  %v3308_v9 = vpop.f32.mrf.mxu3 }
 0x9d9   : > { %v3512_v61 = vpop.f32.mrf.mxu1 }
 0x9da   : > { %v3418_v7 = vpack.c.bf16 %v3385_v12, %v3383_v53  ;;  %v3583_v25 = vmax.f32 %v3512_v61, 0.0  ;;  %v3193_v61 = vunpack.c.l.bf16 %v6594_v43 }
 0x9dc   : > { %5305 = vmatmul.msk.bf16.gmra.mxu1 %vm918_vm0, %v3418_v7  ;;  %v3194_v7 = vunpack.c.l.bf16 %v6590_v23  ;;  %v3225_v42 = vmul.f32 33.0, %v3193_v61  ;;  %v3195_v23 = vunpack.c.l.bf16 %v6588_v36 }
 0x9de   : > { %v3227_v13 = vmul.f32 33.0, %v3195_v23 }
 0x9df   : > { %v3387_v17 = vpop.f32.mrf.mxu0 }
 0x9e0   : > { %v3388_v60 = vadd.f32 %v3387_v17, %v3299_v10  ;;  %v3310_v14 = vpop.f32.mrf.mxu3 }
 0x9e1   : > { %v3514_v46 = vpop.f32.mrf.mxu1 }
 0x9e2   : > { %v3584_v37 = vmax.f32 %v3514_v46, 0.0  ;;  %v3226_v46 = vmul.f32 33.0, %v3194_v7 }
 0x9e4   : > { %v3612_v55 = vpack.c.bf16 %v3584_v37, %v3583_v25  ;;  %v3309_v37 = vadd.f32 %v3308_v9, %v3225_v42  ;;  %v3311_v47 = vadd.f32 %v3310_v14, %v3226_v46 }
 0x9e6   : > { %5325 = vmatmul.msk.bf16.gmra.mxu2 %vm918_vm0, %v3612_v55 }
 0x9e7   : > { %v3389_v5 = vpop.f32.mrf.mxu0 }
 0x9e8   : > { %v3390_v52 = vadd.f32 %v3389_v5, %v3301_v57  ;;  %v3313_v57 = vpop.f32.mrf.mxu3 }
 0x9e9   : > { %v3517_v48 = vpop.f32.mrf.mxu1 }
 0x9ea   : > { %v3419_v28 = vpack.c.bf16 %v3390_v52, %v3388_v60  ;;  %v3585_v6 = vmax.f32 %v3517_v48, 0.0  ;;  %v3196_v52 = vunpack.c.l.bf16 %v6592_v32 }
 0x9ec   : > { %5306 = vmatmul.msk.bf16.gmra.mxu1 %vm918_vm0, %v3419_v28  ;;  %v3228_v1 = vmul.f32 33.0, %v3196_v52 }
 0x9ef   : > { %v3392_v49 = vpop.f32.mrf.mxu0 }
 0x9f0   : > { %v3393_v26 = vadd.f32 %v3392_v49, %v3304_v50  ;;  %v3315_v49 = vpop.f32.mrf.mxu3 }
 0x9f1   : > { %v3519_v18 = vpop.f32.mrf.mxu1 }
 0x9f2   : > { %v3586_v20 = vmax.f32 %v3519_v18, 0.0 }
 0x9f4   : > { %v3613_v2 = vpack.c.bf16 %v3586_v20, %v3585_v6  ;;  %v3314_v6 = vadd.f32 %v3313_v57, %v3227_v13  ;;  %v3316_v20 = vadd.f32 %v3315_v49, %v3228_v1 }
 0x9f6   : > { %5326 = vmatmul.msk.bf16.gmra.mxu2 %vm918_vm0, %v3613_v2 }
 0x9f7   : > { %v3394_v54 = vpop.f32.mrf.mxu0 }
 0x9f8   : > { %v3395_v4 = vadd.f32 %v3394_v54, %v3306_v11 }
 0x9f9   : > { %v3522_v53 = vpop.f32.mrf.mxu1 }
 0x9fa   : > { %v3420_v12 = vpack.c.bf16 %v3395_v4, %v3393_v26  ;;  %v3587_v38 = vmax.f32 %v3522_v53, 0.0  ;;  %v6747_v4 = vpop.f32.mrf.mxu2 }
 0x9fb   : > { %7206 = vst [vmem:[#allocation17_spill] sm:$0xff] %v6747_v4 }
 0x9fc   : > { %5307 = vmatmul.msk.bf16.gmra.mxu1 %vm918_vm0, %v3420_v12 }
 0x9ff   : > { %v3397_v15 = vpop.f32.mrf.mxu0 }
 0xa00   : > { %v3398_v55 = vadd.f32 %v3397_v15, %v3309_v37 }
 0xa01   : > { %v3524_v17 = vpop.f32.mrf.mxu1 }
 0xa02   : > { %v3588_v44 = vmax.f32 %v3524_v17, 0.0 }
 0xa04   : > { %v3614_v25 = vpack.c.bf16 %v3588_v44, %v3587_v38 }
 0xa06   : > { %5327 = vmatmul.msk.bf16.gmra.mxu2 %vm918_vm0, %v3614_v25 }
 0xa07   : > { %v3399_v30 = vpop.f32.mrf.mxu0 }
 0xa08   : > { %v3400_v10 = vadd.f32 %v3399_v30, %v3311_v47 }
 0xa09   : > { %v3527_v5 = vpop.f32.mrf.mxu1 }
 0xa0a   : > { %v3421_v60 = vpack.c.bf16 %v3400_v10, %v3398_v55  ;;  %v3589_v28 = vmax.f32 %v3527_v5, 0.0 }
 0xa0c   : > { %5308 = vmatmul.msk.bf16.gmra.mxu1 %vm918_vm0, %v3421_v60 }
 0xa0f   : > { %v3402_v43 = vpop.f32.mrf.mxu0 }
 0xa10   : > { %v3403_v16 = vadd.f32 %v3402_v43, %v3314_v6 }
 0xa11   : > { %v3529_v48 = vpop.f32.mrf.mxu1 }
 0xa12   : > { %v3590_v41 = vmax.f32 %v3529_v48, 0.0 }
 0xa14   : > { %v3615_v18 = vpack.c.bf16 %v3590_v41, %v3589_v28 }
 0xa16   : > { %5328 = vmatmul.msk.bf16.gmra.mxu2 %vm918_vm0, %v3615_v18 }
 0xa17   : > { %v3404_v35 = vpop.f32.mrf.mxu0 }
 0xa18   : > { %v3405_v2 = vadd.f32 %v3404_v35, %v3316_v20 }
 0xa19   : > { %v3532_v9 = vpop.f32.mrf.mxu1 }
 0xa1a   : > { %v3422_v50 = vpack.c.bf16 %v3405_v2, %v3403_v16  ;;  %v3591_v32 = vmax.f32 %v3532_v9, 0.0 }
 0xa1c   : > { %5309 = vmatmul.msk.bf16.gmra.mxu1 %vm918_vm0, %v3422_v50 }
 0xa21   : > { %v3534_v36 = vpop.f32.mrf.mxu1 }
 0xa22   : > { %v3592_v11 = vmax.f32 %v3534_v36, 0.0 }
 0xa24   : > { %v3616_v54 = vpack.c.bf16 %v3592_v11, %v3591_v32 }
 0xa26   : > { %5329 = vmatmul.msk.bf16.gmra.mxu2 %vm918_vm0, %v3616_v54 }
 0xa29   : > { %v3537_v26 = vpop.f32.mrf.mxu1 }
 0xa2a   : > { %v3593_v12 = vmax.f32 %v3537_v26, 0.0 }
 0xa31   : > { %v3539_v53 = vpop.f32.mrf.mxu1 }
 0xa32   : > { %v3594_v14 = vmax.f32 %v3539_v53, 0.0 }
 0xa34   : > { %v3617_v15 = vpack.c.bf16 %v3594_v14, %v3593_v12 }
 0xa36   : > { %5330 = vmatmul.msk.bf16.gmra.mxu2 %vm918_vm0, %v3617_v15 }
 0xa39   : > { %v3542_v61 = vpop.f32.mrf.mxu1  ;;  %v3699_v7 = vpop.f32.mrf.mxu2 }
 0xa3a   : > { %v3779_v17 = vmax.f32 %v3699_v7, 0.0  ;;  %v3595_v42 = vmax.f32 %v3542_v61, 0.0 }
 0xa3c   : > { %v6750_v46 = vpack.c.bf16 %v3779_v17, %v3779_v17 }
 0xa3e   : > { %v3875_v55 = vunpack.c.l.b16 %v6750_v46 }
 0xa41   : > { %v3544_v38 = vpop.f32.mrf.mxu1  ;;  %v3701_v44 = vpop.f32.mrf.mxu2 }
 0xa42   : > { %v3596_v25 = vmax.f32 %v3544_v38, 0.0  ;;  %v3780_v37 = vmax.f32 %v3701_v44, 0.0 }
 0xa44   : > { %v3618_v47 = vpack.c.bf16 %v3596_v25, %v3595_v42  ;;  %v6752_v30 = vpack.c.bf16 %v3780_v37, %v3780_v37 }
 0xa46   : > { %v3876_v10 = vunpack.c.l.b16 %v6752_v30  ;;  %5331 = vmatmul.msk.bf16.gmra.mxu2 %vm918_vm0, %v3618_v47 }
 0xa48   : > { %v6757_v57 = vpack.c.b16 %v3876_v10, %v3875_v55 }
 0xa49   : > { %v3547_v5 = vpop.f32.mrf.mxu1  ;;  %v3704_v60 = vpop.f32.mrf.mxu2 }
 0xa4a   : > { %v3781_v43 = vmax.f32 %v3704_v60, 0.0  ;;  %v3597_v48 = vmax.f32 %v3547_v5, 0.0 }
 0xa4c   : > { %v6759_v28 = vpack.c.bf16 %v3781_v43, %v3781_v43 }
 0xa4e   : > { %v3877_v18 = vunpack.c.l.b16 %v6759_v28 }
 0xa51   : > { %v3549_v23 = vpop.f32.mrf.mxu1  ;;  %v3706_v52 = vpop.f32.mrf.mxu2 }
 0xa52   : > { %v3598_v41 = vmax.f32 %v3549_v23, 0.0  ;;  %v3782_v49 = vmax.f32 %v3706_v52, 0.0 }
 0xa54   : > { %v3619_v13 = vpack.c.bf16 %v3598_v41, %v3597_v48  ;;  %v6761_v1 = vpack.c.bf16 %v3782_v49, %v3782_v49 }
 0xa56   : > { %v3878_v6 = vunpack.c.l.b16 %v6761_v1  ;;  %5332 = vmatmul.msk.bf16.gmra.mxu2 %vm918_vm0, %v3619_v13 }
 0xa58   : > { %v6766_v20 = vpack.c.b16 %v3878_v6, %v3877_v18 }
 0xa59   : > { %v3552_v35 = vpop.f32.mrf.mxu1  ;;  %v3709_v16 = vpop.f32.mrf.mxu2 }
 0xa5a   : > { %v3783_v2 = vmax.f32 %v3709_v16, 0.0  ;;  %v3599_v36 = vmax.f32 %v3552_v35, 0.0 }
 0xa5c   : > { %v6768_v32 = vpack.c.bf16 %v3783_v2, %v3783_v2 }
 0xa5e   : > { %v3879_v12 = vunpack.c.l.b16 %v6768_v32 }
 0xa61   : > { %v3554_v9 = vpop.f32.mrf.mxu1  ;;  %v3711_v50 = vpop.f32.mrf.mxu2 }
 0xa62   : > { %v3600_v11 = vmax.f32 %v3554_v9, 0.0  ;;  %v3784_v54 = vmax.f32 %v3711_v50, 0.0 }
 0xa64   : > { %v3620_v26 = vpack.c.bf16 %v3600_v11, %v3599_v36  ;;  %v6770_v53 = vpack.c.bf16 %v3784_v54, %v3784_v54 }
 0xa66   : > { %v3880_v14 = vunpack.c.l.b16 %v6770_v53  ;;  %5333 = vmatmul.msk.bf16.gmra.mxu2 %vm918_vm0, %v3620_v26 }
 0xa68   : > { %v6775_v15 = vpack.c.b16 %v3880_v14, %v3879_v12 }
 0xa69   : > { %v3557_v61 = vpop.f32.mrf.mxu1  ;;  %v3714_v7 = vpop.f32.mrf.mxu2 }
 0xa6a   : > { %v3785_v17 = vmax.f32 %v3714_v7, 0.0  ;;  %v3601_v42 = vmax.f32 %v3557_v61, 0.0 }
 0xa6c   : > { %v6777_v25 = vpack.c.bf16 %v3785_v17, %v3785_v17 }
 0xa6e   : > { %v3881_v5 = vunpack.c.l.b16 %v6777_v25 }
 0xa71   : > { %v3559_v38 = vpop.f32.mrf.mxu1  ;;  %v3716_v44 = vpop.f32.mrf.mxu2 }
 0xa72   : > { %v3602_v37 = vmax.f32 %v3559_v38, 0.0  ;;  %v3786_v47 = vmax.f32 %v3716_v44, 0.0 }
 0xa74   : > { %v3621_v55 = vpack.c.bf16 %v3602_v37, %v3601_v42  ;;  %v6779_v10 = vpack.c.bf16 %v3786_v47, %v3786_v47 }
 0xa76   : > { %v3882_v60 = vunpack.c.l.b16 %v6779_v10  ;;  %5334 = vmatmul.msk.bf16.gmra.mxu2 %vm918_vm0, %v3621_v55 }
 0xa78   : > { %v6784_v43 = vpack.c.b16 %v3882_v60, %v3881_v5 }
 0xa79   : > { %v3562_v23 = vpop.f32.mrf.mxu1  ;;  %v3719_v52 = vpop.f32.mrf.mxu2 }
 0xa7a   : > { %v3603_v49 = vmax.f32 %v3562_v23, 0.0 }
 0xa81   : > { %v3564_v48 = vpop.f32.mrf.mxu1  ;;  %v3721_v41 = vpop.f32.mrf.mxu2 }
 0xa82   : > { %v3604_v13 = vmax.f32 %v3564_v48, 0.0 }
 0xa84   : > { %v3622_v18 = vpack.c.bf16 %v3604_v13, %v3603_v49 }
 0xa86   : > { %5335 = vmatmul.msk.bf16.gmra.mxu2 %vm918_vm0, %v3622_v18 }
 0xa89   : > { %v3567_v6 = vpop.f32.mrf.mxu1  ;;  %v3724_v35 = vpop.f32.mrf.mxu2 }
 0xa8a   : > { %v3605_v9 = vmax.f32 %v3567_v6, 0.0  ;;  %v3789_v48 = vmax.f32 %v3724_v35, 0.0  ;;  %v3788_v6 = vmax.f32 %v3721_v41, 0.0 }
 0xa8c   : > { %v6807_v35 = vpack.c.bf16 %v3788_v6, %v3788_v6  ;;  %v7211_v6 = vld [vmem:[#allocation7_spill] sm:$0xff] }
 0xa91   : > { %v3569_v16 = vpop.f32.mrf.mxu1  ;;  %v3726_v2 = vpop.f32.mrf.mxu2 }
 0xa92   : > { %v3606_v50 = vmax.f32 %v3569_v16, 0.0  ;;  %v3790_v5 = vmax.f32 %v3726_v2, 0.0  ;;  %v3787_v2 = vmax.f32 %v3719_v52, 0.0 }
 0xa94   : > { %v3623_v36 = vpack.c.bf16 %v3606_v50, %v3605_v9  ;;  %v6799_v16 = vpack.c.bf16 %v3790_v5, %v3790_v5  ;;  %v6810_v41 = vpack.c.bf16 %v3787_v2, %v3787_v2  ;;  %v7209_v5 = vld [vmem:[#allocation27_spill] sm:$0xff] }
 0xa96   : > { %5336 = vmatmul.msk.bf16.gmra.mxu2 %vm918_vm0, %v3623_v36 }
 0xa99   : > { %v3572_v11 = vpop.f32.mrf.mxu1  ;;  %v3729_v54 = vpop.f32.mrf.mxu2 }
 0xa9a   : > { %v3607_v14 = vmax.f32 %v3572_v11, 0.0  ;;  %v3791_v37 = vmax.f32 %v3729_v54, 0.0  ;;  %v6804_v11 = vpack.c.bf16 %v3789_v48, %v3789_v48 }
 0xa9c   : > { %v6795_v49 = vpack.c.bf16 %v3791_v37, %v3791_v37 }
 0xa9e   : > { %v3887_v54 = vunpack.c.l.b16 %v6795_v49 }
 0xaa1   : > { %v3574_v26 = vpop.f32.mrf.mxu1  ;;  %v3731_v12 = vpop.f32.mrf.mxu2 }
 0xaa2   : > { %v3608_v61 = vmax.f32 %v3574_v26, 0.0  ;;  %v3792_v44 = vmax.f32 %v3731_v12, 0.0  ;;  %v3886_v26 = vunpack.c.l.b16 %v6799_v16 }
 0xaa4   : > { %v3624_v7 = vpack.c.bf16 %v3608_v61, %v3607_v14  ;;  %v6791_v60 = vpack.c.bf16 %v3792_v44, %v3792_v44  ;;  %v3885_v14 = vunpack.c.l.b16 %v6804_v11  ;;  %v3884_v61 = vunpack.c.l.b16 %v6807_v35 }
 0xaa6   : > { %5337 = vmatmul.msk.bf16.gmra.mxu2 %vm918_vm0, %v3624_v7  ;;  %v3888_v9 = vunpack.c.l.b16 %v6791_v60  ;;  %v3912_v52 = vpack.c.b16 %v3886_v26, %v3885_v14  ;;  %v7214_v14 = vld [vmem:[#allocation10_spill] sm:$0xff] }
 0xaa8   : > { %v3913_v12 = vpack.c.b16 %v3888_v9, %v3887_v54  ;;  %v7213_v54 = vld [vmem:[#allocation9_spill] sm:$0xff] }
 0xaa9   : > { %v3734_v17 = vpop.f32.mrf.mxu2 }
 0xaaa   : > { %v3793_v38 = vmax.f32 %v3734_v17, 0.0  ;;  %v3883_v17 = vunpack.c.l.b16 %v6810_v41 }
 0xaac   : > { %v6789_v47 = vpack.c.bf16 %v3793_v38, %v3793_v38  ;;  %v3911_v38 = vpack.c.b16 %v3884_v61, %v3883_v17 }
 0xaae   : > { %v3889_v13 = vunpack.c.l.b16 %v6789_v47 }
 0xab1   : > { %v3736_v42 = vpop.f32.mrf.mxu2 }
 0xab2   : > { %v3794_v55 = vmax.f32 %v3736_v42, 0.0 }
 0xab4   : > { %v6793_v23 = vpack.c.bf16 %v3794_v55, %v3794_v55  ;;  %v7208_v55 = vld [vmem:[#allocation5_spill] sm:$0xff] }
 0xab6   : > { %7207 = vst [vmem:[#allocation30_spill] sm:$0xff] %v6793_v23  ;;  %v3890_v18 = vunpack.c.l.b16 %v6793_v23 }
 0xab8   : > { %v3914_v50 = vpack.c.b16 %v3890_v18, %v3889_v13  ;;  %v7210_v13 = vld [vmem:[#allocation6_spill] sm:$0xff] }
 0xab9   : > { %v6802_v36 = vpop.f32.mrf.mxu2 }
 0xaba   : > { %3939 = vmatpush.bf16.msra.mxu3 %v3914_v50  ;;  %4068 = vmatpush.bf16.msra.mxu0 %v3914_v50  ;;  %v7212_v50 = vld [vmem:[#allocation8_spill] sm:$0xff] }
 0xabe   : > { %3940 = vmatpush.bf16.msra.mxu3 %v3913_v12  ;;  %4069 = vmatpush.bf16.msra.mxu0 %v3913_v12 }
 0xac1   : > { %v6814_v7 = vpop.f32.mrf.mxu2 }
 0xac2   : > { %3941 = vmatpush.bf16.msra.mxu3 %v3912_v52  ;;  %4070 = vmatpush.bf16.msra.mxu0 %v3912_v52 }
 0xac6   : > { %3942 = vmatpush.bf16.msra.mxu3 %v3911_v38  ;;  %4071 = vmatpush.bf16.msra.mxu0 %v3911_v38 }
 0xac9   : > { %v6817_v44 = vpop.f32.mrf.mxu2 }
 0xaca   : > { %3943 = vmatpush.bf16.msra.mxu3 %v6784_v43  ;;  %4072 = vmatpush.bf16.msra.mxu0 %v6784_v43 }
 0xace   : > { %3944 = vmatpush.bf16.msra.mxu3 %v6775_v15  ;;  %4073 = vmatpush.bf16.msra.mxu0 %v6775_v15 }
 0xad1   : > { %v6823_v42 = vpop.f32.mrf.mxu2 }
 0xad2   : > { %3945 = vmatpush.bf16.msra.mxu3 %v6766_v20  ;;  %4074 = vmatpush.bf16.msra.mxu0 %v6766_v20 }
 0xad6   : > { %3946 = vmatpush.bf16.msra.mxu3 %v6757_v57  ;;  %4075 = vmatpush.bf16.msra.mxu0 %v6757_v57 }
 0xad9   : > { %v6829_v37 = vpop.f32.mrf.mxu2  ;;  %4076 = vmatmul.bf16.vlgmr.msra.gmra.mxu0 %v7208_v55  ;;  %3947 = vmatmul.bf16.vlgmr.msra.gmra.mxu3 %v7209_v5 }
 0xae1   : > { %v3751_v43 = vpop.f32.mrf.mxu2 }
 0xae9   : > { %v3754_v48 = vpop.f32.mrf.mxu2  ;;  %4081 = vmatmul.bf16.gmra.mxu0 %v7210_v13 }
 0xaf1   : > { %v3756_v15 = vpop.f32.mrf.mxu2 }
 0xaf9   : > { %v3759_v18 = vpop.f32.mrf.mxu2  ;;  %4086 = vmatmul.bf16.gmra.mxu0 %v7211_v6 }
 0xb01   : > { %v3761_v9 = vpop.f32.mrf.mxu2 }
 0xb09   : > { %v3764_v20 = vpop.f32.mrf.mxu2  ;;  %4091 = vmatmul.bf16.gmra.mxu0 %v7212_v50 }
 0xb0a   : > { %v3805_v50 = vmax.f32 %v3764_v20, 0.0  ;;  %v3802_v20 = vmax.f32 %v3756_v15, 0.0  ;;  %v3799_v15 = vmax.f32 %v6829_v37, 0.0  ;;  %v3796_v37 = vmax.f32 %v6814_v7, 0.0 }
 0xb11   : > { %v3766_v2 = vpop.f32.mrf.mxu2 }
 0xb12   : > { %v3806_v6 = vmax.f32 %v3766_v2, 0.0  ;;  %v3803_v2 = vmax.f32 %v3759_v18, 0.0  ;;  %v3800_v18 = vmax.f32 %v3751_v43, 0.0 }
 0xb19   : > { %v3769_v57 = vpop.f32.mrf.mxu2  ;;  %4096 = vmatmul.bf16.gmra.mxu0 %v7213_v54 }
 0xb1a   : > { %v3807_v38 = vmax.f32 %v3769_v57, 0.0 }
 0xb1c   : > { %v6844_v40 = vpack.c.bf16 %v3807_v38, %v3807_v38 }
 0xb21   : > { %v3771_v26 = vpop.f32.mrf.mxu2 }
 0xb22   : > { %v3808_v52 = vmax.f32 %v3771_v26, 0.0 }
 0xb24   : > { %v6840_v4 = vpack.c.bf16 %v3808_v52, %v3808_v52  ;;  %v6852_v52 = vpack.c.bf16 %v3805_v50, %v3805_v50  ;;  %v6861_v50 = vpack.c.bf16 %v3802_v20, %v3802_v20  ;;  %v6873_v20 = vpack.c.bf16 %v3799_v15, %v3799_v15 }
 0xb26   : > { %v3904_v57 = vunpack.c.l.b16 %v6840_v4 }
 0xb29   : > { %v3774_v12 = vpop.f32.mrf.mxu2  ;;  %4101 = vmatmul.bf16.gmra.mxu0 %v7214_v14  ;;  %v3804_v14 = vmax.f32 %v3761_v9, 0.0 }
 0xb2a   : > { %v3809_v61 = vmax.f32 %v3774_v12, 0.0  ;;  %v6848_v12 = vpack.c.bf16 %v3806_v6, %v3806_v6  ;;  %v3801_v6 = vmax.f32 %v3754_v48, 0.0  ;;  %v3798_v48 = vmax.f32 %v6823_v42, 0.0 }
 0xb2b   : > { %v6855_v38 = vpack.c.bf16 %v3804_v14, %v3804_v14 }
 0xb2c   : > { %v6838_v55 = vpack.c.bf16 %v3809_v61, %v3809_v61  ;;  %v7216_v61 = vld [vmem:[#allocation12_spill] sm:$0xff]  ;;  %v6865_v14 = vpack.c.bf16 %v3801_v6, %v3801_v6 }
 0xb2e   : > { %v3905_v54 = vunpack.c.l.b16 %v6838_v55 }
 0xb31   : > { %v3776_v17 = vpop.f32.mrf.mxu2 }
 0xb32   : > { %v3810_v13 = vmax.f32 %v3776_v17, 0.0  ;;  %v3903_v17 = vunpack.c.l.b16 %v6844_v40 }
 0xb34   : > { %v6842_v5 = vpack.c.bf16 %v3810_v13, %v3810_v13  ;;  %v3902_v13 = vunpack.c.l.b16 %v6848_v12  ;;  %v3921_v9 = vpack.c.b16 %v3904_v57, %v3903_v17  ;;  %v6869_v57 = vpack.c.bf16 %v3800_v18, %v3800_v18 }
 0xb35   : > { %v3797_v17 = vmax.f32 %v6817_v44, 0.0  ;;  %v3895_v44 = vunpack.c.l.b16 %v6873_v20 }
 0xb36   : > { %7215 = vst [vmem:[#allocation25_spill] sm:$0xff] %v6842_v5  ;;  %v3906_v23 = vunpack.c.l.b16 %v6842_v5  ;;  %v6858_v5 = vpack.c.bf16 %v3803_v2, %v3803_v2  ;;  %v3898_v2 = vunpack.c.l.b16 %v6861_v50  ;;  %v3896_v6 = vunpack.c.l.b16 %v6869_v57 }
 0xb37   : > { %v6882_v18 = vpack.c.bf16 %v3797_v17, %v3797_v17 }
 0xb38   : > { %v3922_v26 = vpack.c.b16 %v3906_v23, %v3905_v54  ;;  %v3901_v23 = vunpack.c.l.b16 %v6852_v52  ;;  %v3900_v54 = vunpack.c.l.b16 %v6855_v38  ;;  %v3917_v7 = vpack.c.b16 %v3896_v6, %v3895_v44 }
 0xb39   : > { %4106 = vmatmul.bf16.gmra.mxu0 %v7216_v61  ;;  %v4005_v6 = vunpack.c.l.bf16 %v6752_v30  ;;  %v4006_v44 = vunpack.c.l.bf16 %v6759_v28  ;;  %v4009_v28 = vunpack.c.l.bf16 %v6770_v53  ;;  %v7218_v53 = vld [vmem:[#allocation19_spill] sm:$0xff] }
 0xb3a   : > { %3953 = vmatpush.bf16.msra.mxu1 %v3922_v26  ;;  %4157 = vmatpush.bf16.msrb.mxu3 %v3922_v26  ;;  %v3920_v61 = vpack.c.b16 %v3902_v13, %v3901_v23  ;;  %v3899_v26 = vunpack.c.l.b16 %v6858_v5  ;;  %v3897_v13 = vunpack.c.l.b16 %v6865_v14  ;;  %v3795_v23 = vmax.f32 %v6802_v36, 0.0 }
 0xb3c   : > { %v3919_v43 = vpack.c.b16 %v3900_v54, %v3899_v26  ;;  %v3918_v42 = vpack.c.b16 %v3898_v2, %v3897_v13  ;;  %v6885_v54 = vpack.c.bf16 %v3796_v37, %v3796_v37  ;;  %v6888_v15 = vpack.c.bf16 %v3795_v23, %v3795_v23 }
 0xb3d   : > { %v3893_v26 = vunpack.c.l.b16 %v6882_v18 }
 0xb3e   : > { %3954 = vmatpush.bf16.msra.mxu1 %v3921_v9  ;;  %4158 = vmatpush.bf16.msrb.mxu3 %v3921_v9  ;;  %v6877_v9 = vpack.c.bf16 %v3798_v48, %v3798_v48  ;;  %v4004_v48 = vunpack.c.l.bf16 %v6750_v46  ;;  %v3891_v2 = vunpack.c.l.b16 %v6888_v15  ;;  %v4037_v46 = vmul.f32 33.0, %v4005_v6 }
 0xb40   : > { %v4036_v17 = vmul.f32 33.0, %v4004_v48 }
 0xb42   : > { %3955 = vmatpush.bf16.msra.mxu1 %v3920_v61  ;;  %4159 = vmatpush.bf16.msrb.mxu3 %v3920_v61  ;;  %v3894_v61 = vunpack.c.l.b16 %v6877_v9 }
 0xb44   : > { %v3916_v36 = vpack.c.b16 %v3894_v61, %v3893_v26  ;;  %v4038_v61 = vmul.f32 33.0, %v4006_v44 }
 0xb46   : > { %3956 = vmatpush.bf16.msra.mxu1 %v3919_v43  ;;  %4160 = vmatpush.bf16.msrb.mxu3 %v3919_v43 }
 0xb49   : > { %4111 = vmatmul.bf16.gmra.mxu0 %v5855_v0  ;;  %v3892_v0 = vunpack.c.l.b16 %v6885_v54 }
 0xb4a   : > { %3957 = vmatpush.bf16.msra.mxu1 %v3918_v42  ;;  %4161 = vmatpush.bf16.msrb.mxu3 %v3918_v42 }
 0xb4b   : > { %v3915_v43 = vpack.c.b16 %v3892_v0, %v3891_v2  ;;  %v4007_v0 = vunpack.c.l.bf16 %v6761_v1  ;;  %v4010_v1 = vunpack.c.l.bf16 %v6777_v25  ;;  %v7219_v25 = vld [vmem:[#allocation13_spill] sm:$0xff] }
 0xb4e   : > { %3958 = vmatpush.bf16.msra.mxu1 %v3917_v7  ;;  %4162 = vmatpush.bf16.msrb.mxu3 %v3917_v7 }
 0xb52   : > { %3959 = vmatpush.bf16.msra.mxu1 %v3916_v36  ;;  %4163 = vmatpush.bf16.msrb.mxu3 %v3916_v36 }
 0xb56   : > { %3960 = vmatpush.bf16.msra.mxu1 %v3915_v43  ;;  %v4077_v13 = vpop.f32.mrf.mxu0  ;;  %4164 = vmatpush.bf16.msrb.mxu3 %v3915_v43 }
 0xb57   : > { %v6894_v37 = vadd.f32 %v4077_v13, %v4036_v17  ;;  %v4041_v17 = vmul.f32 33.0, %v4009_v28 }
 0xb59   : > { %3961 = vmatmul.bf16.vlgmr.msra.gmra.mxu1 %v6162_v29  ;;  %4116 = vmatmul.bf16.gmra.mxu0 %v5866_v8  ;;  %v4039_v8 = vmul.f32 33.0, %v4007_v0 }
 0xb5a   : > { %4165 = vmatmul.bf16.vlgmr.msrb.gmra.mxu3 %v5781_v21  ;;  %v4008_v21 = vunpack.c.l.bf16 %v6768_v32  ;;  %v4011_v32 = vunpack.c.l.bf16 %v6779_v10  ;;  %v7221_v10 = vld [vmem:[#allocation14_spill] sm:$0xff] }
 0xb5c   : > { %v4040_v48 = vmul.f32 33.0, %v4008_v21 }
 0xb5e   : > { %v4079_v42 = vpop.f32.mrf.mxu0 }
 0xb5f   : > { %v4080_v23 = vadd.f32 %v4079_v42, %v4037_v46  ;;  %v4043_v42 = vmul.f32 33.0, %v4011_v32 }
 0xb66   : > { %v4082_v7 = vpop.f32.mrf.mxu0 }
 0xb67   : > { %v6901_v26 = vadd.f32 %v4082_v7, %v4038_v61  ;;  %v3948_v61 = vpop.f32.mrf.mxu3 }
 0xb69   : > { %4121 = vmatmul.bf16.gmra.mxu0 %v5878_v34 }
 0xb6a   : > { %4170 = vmatmul.bf16.gmra.mxu3 %v5791_v27  ;;  %v4042_v27 = vmul.f32 33.0, %v4010_v1 }
 0xb6e   : > { %v4084_v36 = vpop.f32.mrf.mxu0 }
 0xb6f   : > { %v4085_v30 = vadd.f32 %v4084_v36, %v4039_v8  ;;  %v3950_v7 = vpop.f32.mrf.mxu3  ;;  %v7222_v8 = vld [vmem:[#allocation15_spill] sm:$0xff] }
 0xb76   : > { %v4087_v2 = vpop.f32.mrf.mxu0 }
 0xb77   : > { %v4088_v43 = vadd.f32 %v4087_v2, %v4040_v48 }
 0xb79   : > { %4126 = vmatmul.bf16.gmra.mxu0 %v5890_v62 }
 0xb7a   : > { %4175 = vmatmul.bf16.gmra.mxu3 %v5801_v33  ;;  %v7217_v33 = vld [vmem:[#allocation11_spill] sm:$0xff] }
 0xb7e   : > { %v4089_v34 = vpop.f32.mrf.mxu0 }
 0xb7f   : > { %v4090_v13 = vadd.f32 %v4089_v34, %v4041_v17 }
 0xb86   : > { %v4092_v6 = vpop.f32.mrf.mxu0 }
 0xb87   : > { %v4093_v46 = vadd.f32 %v4092_v6, %v4042_v27 }
 0xb89   : > { %4131 = vmatmul.bf16.gmra.mxu0 %v5902_v24  ;;  %v5507_v24 = vld [vmem:[%s7067_s5 + $0x38] sm:$0xff] }
 0xb8a   : > { %4180 = vmatmul.bf16.gmra.mxu3 %v5811_v39  ;;  %3994 = vmatpush.bf16.msrb.mxu2 %v5507_v24  ;;  %v5506_v39 = vld [vmem:[%s7067_s5 + $0x30] sm:$0xff] }
 0xb8e   : > { %v4094_v62 = vpop.f32.mrf.mxu0  ;;  %3995 = vmatpush.bf16.msrb.mxu2 %v5506_v39 }
 0xb8f   : > { %v4095_v44 = vadd.f32 %v4094_v62, %v4043_v42 }
 0xb96   : > { %v4097_v6 = vpop.f32.mrf.mxu0 }
 0xb99   : > { %4136 = vmatmul.bf16.gmra.mxu0 %v5914_v58  ;;  %v5508_v58 = vld [vmem:[%s7065_s3 + $0x40] sm:$0xff] }
 0xb9a   : > { %4185 = vmatmul.bf16.gmra.mxu3 %v5821_v45  ;;  %v5509_v45 = vld [vmem:[%s7065_s3 + $0x48] sm:$0xff] }
 0xb9b   : > { %4333 = vmatpush.bf16.msrb.mxu1 %v5509_v45 }
 0xb9e   : > { %v4099_v42 = vpop.f32.mrf.mxu0 }
 0xb9f   : > { %4334 = vmatpush.bf16.msrb.mxu1 %v5508_v58 }
 0xba9   : > { %4141 = vmatmul.bf16.gmra.mxu0 %v5926_v22  ;;  %v7220_v22 = vld [vmem:[#allocation21_spill] sm:$0xff] }
 0xbaa   : > { %4190 = vmatmul.bf16.gmra.mxu3 %v7217_v33 }
 0xbb9   : > { %4146 = vmatmul.bf16.gmra.mxu0 %v7218_v53 }
 0xbba   : > { %4195 = vmatmul.bf16.gmra.mxu3 %v7219_v25 }
 0xbc9   : > { %4151 = vmatmul.bf16.gmra.mxu0 %v7220_v22 }
 0xbca   : > { %4200 = vmatmul.bf16.gmra.mxu3 %v7221_v10 }
 0xbd6   : > { %v3962_v0 = vpop.f32.mrf.mxu1 }
 0xbd7   : > { %v3963_v48 = vadd.f32 %v3962_v0, %v3948_v61 }
 0xbda   : > { %4205 = vmatmul.bf16.gmra.mxu3 %v7222_v8 }
 0xbdd   : > { %v4166_v36 = vpop.f32.mrf.mxu3 }
 0xbde   : > { %v3964_v21 = vpop.f32.mrf.mxu1  ;;  %v4167_v34 = vadd.f32 %v4166_v36, %v6894_v37  ;;  %v4102_v37 = vpop.f32.mrf.mxu0 }
 0xbdf   : > { %v3965_v2 = vadd.f32 %v3964_v21, %v3950_v7 }
 0xbe1   : > { %v3967_v28 = vpack.c.bf16 %v3965_v2, %v3963_v48 }
 0xbe3   : > { %5350 = vmatmul.msk.bf16.vlgmr.msrb.gmra.mxu2 %vm918_vm0, %v3967_v28 }
 0xbe5   : > { %v4168_v17 = vpop.f32.mrf.mxu3 }
 0xbe6   : > { %v4169_v1 = vadd.f32 %v4168_v17, %v4080_v23  ;;  %v4104_v58 = vpop.f32.mrf.mxu0  ;;  %v4014_v17 = vunpack.c.l.bf16 %v6804_v11  ;;  %v4017_v11 = vunpack.c.l.bf16 %v6791_v60  ;;  %v4018_v60 = vunpack.c.l.bf16 %v6789_v47 }
 0xbe8   : > { %v4246_v27 = vpack.c.bf16 %v4169_v1, %v4167_v34 }
 0xbea   : > { %4210 = vmatmul.bf16.gmra.mxu3 %v7195_v56  ;;  %5363 = vmatmul.msk.bf16.vlgmr.msrb.gmra.mxu1 %vm918_vm0, %v4246_v27 }
 0xbed   : > { %v4171_v32 = vpop.f32.mrf.mxu3 }
 0xbee   : > { %v4172_v33 = vadd.f32 %v4171_v32, %v6901_v26  ;;  %v4107_v10 = vpop.f32.mrf.mxu0 }
 0xbf5   : > { %v4173_v62 = vpop.f32.mrf.mxu3 }
 0xbf6   : > { %v4174_v53 = vadd.f32 %v4173_v62, %v4085_v30 }
 0xbf8   : > { %v4247_v25 = vpack.c.bf16 %v4174_v53, %v4172_v33 }
 0xbfa   : > { %4215 = vmatmul.bf16.gmra.mxu3 %v5892_v63  ;;  %5364 = vmatmul.msk.bf16.gmra.mxu1 %vm918_vm0, %v4247_v25  ;;  %v4109_v63 = vpop.f32.mrf.mxu0  ;;  %v4016_v25 = vunpack.c.l.bf16 %v6795_v49 }
 0xbfd   : > { %v4176_v24 = vpop.f32.mrf.mxu3 }
 0xbfe   : > { %v4177_v39 = vadd.f32 %v4176_v24, %v4088_v43  ;;  %v4012_v43 = vunpack.c.l.bf16 %v6810_v41  ;;  %v4015_v41 = vunpack.c.l.bf16 %v6799_v16  ;;  %v4048_v16 = vmul.f32 33.0, %v4016_v25 }
 0xbff   : > { %v4049_v24 = vmul.f32 33.0, %v4017_v11 }
 0xc00   : > { %v4044_v8 = vmul.f32 33.0, %v4012_v43  ;;  %v4047_v1 = vmul.f32 33.0, %v4015_v41 }
 0xc02   : > { %v4098_v36 = vadd.f32 %v4097_v6, %v4044_v8  ;;  %v4105_v6 = vadd.f32 %v4104_v58, %v4047_v1  ;;  %v7224_v1 = vld [vmem:[#allocation16_spill] sm:$0xff] }
 0xc05   : > { %v4178_v23 = vpop.f32.mrf.mxu3 }
 0xc06   : > { %v4179_v45 = vadd.f32 %v4178_v23, %v4090_v13  ;;  %v4013_v13 = vunpack.c.l.bf16 %v6807_v35  ;;  %v4046_v35 = vmul.f32 33.0, %v4014_v17  ;;  %v4108_v23 = vadd.f32 %v4107_v10, %v4048_v16 }
 0xc08   : > { %v4248_v56 = vpack.c.bf16 %v4179_v45, %v4177_v39  ;;  %v4103_v27 = vadd.f32 %v4102_v37, %v4046_v35  ;;  %v4110_v39 = vadd.f32 %v4109_v63, %v4049_v24 }
 0xc0a   : > { %4220 = vmatmul.bf16.gmra.mxu3 %v7196_v3  ;;  %5365 = vmatmul.msk.bf16.gmra.mxu1 %vm918_vm0, %v4248_v56  ;;  %v4045_v3 = vmul.f32 33.0, %v4013_v13 }
 0xc0c   : > { %v4100_v21 = vadd.f32 %v4099_v42, %v4045_v3 }
 0xc0d   : > { %v4181_v22 = vpop.f32.mrf.mxu3 }
 0xc0e   : > { %v4182_v30 = vadd.f32 %v4181_v22, %v4093_v46  ;;  %v4112_v46 = vpop.f32.mrf.mxu0 }
 0xc15   : > { %v4183_v26 = vpop.f32.mrf.mxu3 }
 0xc16   : > { %v4184_v61 = vadd.f32 %v4183_v26, %v4095_v44  ;;  %v4114_v34 = vpop.f32.mrf.mxu0  ;;  %v7223_v26 = vld [vmem:[#allocation30_spill] sm:$0xff] }
 0xc17   : > { %v4019_v10 = vunpack.c.l.bf16 %v7223_v26 }
 0xc18   : > { %v4249_v7 = vpack.c.bf16 %v4184_v61, %v4182_v30  ;;  %v5510_v61 = vld [vmem:[%s7066_s4 + $0x40] sm:$0xff] }
 0xc1a   : > { %4225 = vmatmul.bf16.gmra.mxu3 %v5916_v59  ;;  %5366 = vmatmul.msk.bf16.gmra.mxu1 %vm918_vm0, %v4249_v7  ;;  %v4050_v7 = vmul.f32 33.0, %v4018_v60 }
 0xc1c   : > { %v4113_v63 = vadd.f32 %v4112_v46, %v4050_v7 }
 0xc1d   : > { %v4186_v0 = vpop.f32.mrf.mxu3 }
 0xc1e   : > { %v4187_v2 = vadd.f32 %v4186_v0, %v4098_v36 }
 0xc25   : > { %v4188_v48 = vpop.f32.mrf.mxu3 }
 0xc26   : > { %v4189_v28 = vadd.f32 %v4188_v48, %v4100_v21  ;;  %v4020_v21 = vunpack.c.l.bf16 %v6888_v15  ;;  %v4021_v48 = vunpack.c.l.bf16 %v6885_v54  ;;  %v4022_v54 = vunpack.c.l.bf16 %v6882_v18 }
 0xc28   : > { %v4250_v44 = vpack.c.bf16 %v4189_v28, %v4187_v2  ;;  %v4052_v2 = vmul.f32 33.0, %v4020_v21  ;;  %v4053_v28 = vmul.f32 33.0, %v4021_v48  ;;  %v4054_v25 = vmul.f32 33.0, %v4022_v54 }
 0xc2a   : > { %4230 = vmatmul.bf16.gmra.mxu3 %v7149_v31  ;;  %5367 = vmatmul.msk.bf16.gmra.mxu1 %vm918_vm0, %v4250_v44  ;;  %v4117_v31 = vpop.f32.mrf.mxu0 }
 0xc2d   : > { %v4191_v59 = vpop.f32.mrf.mxu3 }
 0xc2e   : > { %v4192_v42 = vadd.f32 %v4191_v59, %v4103_v27  ;;  %v4118_v59 = vadd.f32 %v4117_v31, %v4052_v2 }
 0xc32   : > { %v4119_v37 = vpop.f32.mrf.mxu0 }
 0xc33   : > { %v4120_v17 = vadd.f32 %v4119_v37, %v4053_v28 }
 0xc35   : > { %v4193_v32 = vpop.f32.mrf.mxu3 }
 0xc36   : > { %v4194_v62 = vadd.f32 %v4193_v32, %v4105_v6 }
 0xc38   : > { %v4251_v33 = vpack.c.bf16 %v4194_v62, %v4192_v42  ;;  %v4023_v62 = vunpack.c.l.bf16 %v6877_v9  ;;  %v4024_v9 = vunpack.c.l.bf16 %v6873_v20 }
 0xc3a   : > { %4235 = vmatmul.bf16.gmra.mxu3 %v7199_v19  ;;  %5368 = vmatmul.msk.bf16.gmra.mxu1 %vm918_vm0, %v4251_v33  ;;  %v5511_v19 = vld [vmem:[%s7066_s4 + $0x48] sm:$0xff]  ;;  %v4122_v30 = vpop.f32.mrf.mxu0  ;;  %v4055_v11 = vmul.f32 33.0, %v4023_v62 }
 0xc3b   : > { %4535 = vmatpush.bf16.msra.mxu2 %v5511_v19  ;;  %v4123_v24 = vadd.f32 %v4122_v30, %v4054_v25  ;;  %v4025_v19 = vunpack.c.l.bf16 %v6869_v57  ;;  %v4056_v30 = vmul.f32 33.0, %v4024_v9 }
 0xc3d   : > { %v4196_v53 = vpop.f32.mrf.mxu3 }
 0xc3e   : > { %v4197_v56 = vadd.f32 %v4196_v53, %v4108_v23 }
 0xc3f   : > { %4536 = vmatpush.bf16.msra.mxu2 %v5510_v61  ;;  %v4057_v61 = vmul.f32 33.0, %v4025_v19 }
 0xc42   : > { %v4124_v36 = vpop.f32.mrf.mxu0 }
 0xc43   : > { %v4125_v23 = vadd.f32 %v4124_v36, %v4055_v11  ;;  %v4026_v36 = vunpack.c.l.bf16 %v6865_v14 }
 0xc45   : > { %v4198_v45 = vpop.f32.mrf.mxu3  ;;  %v4058_v28 = vmul.f32 33.0, %v4026_v36 }
 0xc46   : > { %v4199_v58 = vadd.f32 %v4198_v45, %v4110_v39 }
 0xc48   : > { %v4252_v22 = vpack.c.bf16 %v4199_v58, %v4197_v56 }
 0xc4a   : > { %4240 = vmatmul.bf16.gmra.mxu3 %v7202_v51  ;;  %5369 = vmatmul.msk.bf16.gmra.mxu1 %vm918_vm0, %v4252_v22  ;;  %v4051_v51 = vmul.f32 33.0, %v4019_v10  ;;  %v4127_v44 = vpop.f32.mrf.mxu0 }
 0xc4c   : > { %v4115_v0 = vadd.f32 %v4114_v34, %v4051_v51  ;;  %v4128_v51 = vadd.f32 %v4127_v44, %v4056_v30 }
 0xc4d   : > { %v4201_v49 = vpop.f32.mrf.mxu3 }
 0xc4e   : > { %v4202_v13 = vadd.f32 %v4201_v49, %v4113_v63 }
 0xc52   : > { %v4129_v42 = vpop.f32.mrf.mxu0 }
 0xc53   : > { %v4130_v63 = vadd.f32 %v4129_v42, %v4057_v61  ;;  %v4029_v42 = vunpack.c.l.bf16 %v6855_v38  ;;  %v4030_v38 = vunpack.c.l.bf16 %v6852_v52 }
 0xc55   : > { %v4203_v43 = vpop.f32.mrf.mxu3  ;;  %v4062_v19 = vmul.f32 33.0, %v4030_v38 }
 0xc56   : > { %v4204_v8 = vadd.f32 %v4203_v43, %v4115_v0 }
 0xc58   : > { %v4253_v3 = vpack.c.bf16 %v4204_v8, %v4202_v13 }
 0xc5a   : > { %5370 = vmatmul.msk.bf16.gmra.mxu1 %vm918_vm0, %v4253_v3  ;;  %v4132_v56 = vpop.f32.mrf.mxu0 }
 0xc5d   : > { %v4206_v47 = vpop.f32.mrf.mxu3 }
 0xc5e   : > { %v4207_v46 = vadd.f32 %v4206_v47, %v4118_v59  ;;  %v4027_v47 = vunpack.c.l.bf16 %v6861_v50  ;;  %v4028_v50 = vunpack.c.l.bf16 %v6858_v5 }
 0xc60   : > { %v4059_v44 = vmul.f32 33.0, %v4027_v47 }
 0xc62   : > { %v4134_v10 = vpop.f32.mrf.mxu0 }
 0xc65   : > { %v4208_v41 = vpop.f32.mrf.mxu3 }
 0xc66   : > { %v4209_v34 = vadd.f32 %v4208_v41, %v4120_v17  ;;  %v3997_v35 = vpop.f32.mrf.mxu2  ;;  %v4133_v17 = vadd.f32 %v4132_v56, %v4058_v28  ;;  %v4135_v41 = vadd.f32 %v4134_v10, %v4059_v44 }
 0xc67   : > { %v6970_v27 = vadd.f32 %v3997_v35, %v7224_v1  ;;  %v4336_v6 = vpop.f32.mrf.mxu1 }
 0xc68   : > { %v4254_v32 = vpack.c.bf16 %v4209_v34, %v4207_v46  ;;  %v4416_v31 = vmax.f32 %v4336_v6, 0.0 }
 0xc6a   : > { %5371 = vmatmul.msk.bf16.gmra.mxu1 %vm918_vm0, %v4254_v32  ;;  %v4137_v20 = vpop.f32.mrf.mxu0 }
 0xc6d   : > { %v4211_v15 = vpop.f32.mrf.mxu3 }
 0xc6e   : > { %v4212_v37 = vadd.f32 %v4211_v15, %v4123_v24 }
 0xc6f   : > { %v4338_v33 = vpop.f32.mrf.mxu1 }
 0xc70   : > { %v4417_v53 = vmax.f32 %v4338_v33, 0.0 }
 0xc72   : > { %v4448_v16 = vpack.c.bf16 %v4417_v53, %v4416_v31  ;;  %v4139_v46 = vpop.f32.mrf.mxu0  ;;  %v4060_v31 = vmul.f32 33.0, %v4028_v50  ;;  %v4061_v53 = vmul.f32 33.0, %v4029_v42 }
 0xc74   : > { %5391 = vmatmul.msk.bf16.vlgmr.msra.gmra.mxu2 %vm918_vm0, %v4448_v16  ;;  %v4138_v11 = vadd.f32 %v4137_v20, %v4060_v31  ;;  %v4140_v16 = vadd.f32 %v4139_v46, %v4061_v53  ;;  %v7225_v46 = vld [vmem:[#allocation25_spill] sm:$0xff] }
 0xc75   : > { %v4213_v39 = vpop.f32.mrf.mxu3 }
 0xc76   : > { %v4214_v45 = vadd.f32 %v4213_v39, %v4125_v23 }
 0xc77   : > { %v4341_v58 = vpop.f32.mrf.mxu1 }
 0xc78   : > { %v4255_v22 = vpack.c.bf16 %v4214_v45, %v4212_v37  ;;  %v4418_v60 = vmax.f32 %v4341_v58, 0.0  ;;  %v4031_v58 = vunpack.c.l.bf16 %v6848_v12 }
 0xc7a   : > { %5372 = vmatmul.msk.bf16.gmra.mxu1 %vm918_vm0, %v4255_v22  ;;  %v4142_v15 = vpop.f32.mrf.mxu0 }
 0xc7b   : > { %v4143_v10 = vadd.f32 %v4142_v15, %v4062_v19 }
 0xc7d   : > { %v4216_v18 = vpop.f32.mrf.mxu3 }
 0xc7e   : > { %v4217_v43 = vadd.f32 %v4216_v18, %v4128_v51 }
 0xc7f   : > { %v4343_v49 = vpop.f32.mrf.mxu1 }
 0xc80   : > { %v4419_v26 = vmax.f32 %v4343_v49, 0.0  ;;  %v4063_v49 = vmul.f32 33.0, %v4031_v58 }
 0xc82   : > { %v4449_v7 = vpack.c.bf16 %v4419_v26, %v4418_v60  ;;  %v4144_v56 = vpop.f32.mrf.mxu0 }
 0xc83   : > { %v4145_v30 = vadd.f32 %v4144_v56, %v4063_v49 }
 0xc84   : > { %5392 = vmatmul.msk.bf16.gmra.mxu2 %vm918_vm0, %v4449_v7 }
 0xc85   : > { %v4218_v0 = vpop.f32.mrf.mxu3 }
 0xc86   : > { %v4219_v13 = vadd.f32 %v4218_v0, %v4130_v63 }
 0xc87   : > { %v4346_v8 = vpop.f32.mrf.mxu1 }
 0xc88   : > { %v4256_v3 = vpack.c.bf16 %v4219_v13, %v4217_v43  ;;  %v4420_v48 = vmax.f32 %v4346_v8, 0.0  ;;  %v4032_v43 = vunpack.c.l.bf16 %v6844_v40  ;;  %v4033_v13 = vunpack.c.l.bf16 %v6840_v4 }
 0xc89   : > { %v4034_v4 = vunpack.c.l.bf16 %v6838_v55 }
 0xc8a   : > { %5373 = vmatmul.msk.bf16.gmra.mxu1 %vm918_vm0, %v4256_v3  ;;  %v4147_v26 = vpop.f32.mrf.mxu0  ;;  %v4065_v36 = vmul.f32 33.0, %v4033_v13 }
 0xc8d   : > { %v4221_v57 = vpop.f32.mrf.mxu3 }
 0xc8e   : > { %v4222_v35 = vadd.f32 %v4221_v57, %v4133_v17  ;;  %v4064_v57 = vmul.f32 33.0, %v4032_v43 }
 0xc8f   : > { %v4348_v21 = vpop.f32.mrf.mxu1 }
 0xc90   : > { %v4421_v2 = vmax.f32 %v4348_v21, 0.0  ;;  %v4148_v21 = vadd.f32 %v4147_v26, %v4064_v57 }
 0xc92   : > { %v4450_v59 = vpack.c.bf16 %v4421_v2, %v4420_v48  ;;  %v4149_v52 = vpop.f32.mrf.mxu0 }
 0xc93   : > { %v4150_v48 = vadd.f32 %v4149_v52, %v4065_v36 }
 0xc94   : > { %5393 = vmatmul.msk.bf16.gmra.mxu2 %vm918_vm0, %v4450_v59 }
 0xc95   : > { %v4223_v34 = vpop.f32.mrf.mxu3 }
 0xc96   : > { %v4224_v1 = vadd.f32 %v4223_v34, %v4135_v41  ;;  %v4035_v34 = vunpack.c.l.bf16 %v7225_v46 }
 0xc97   : > { %v4351_v6 = vpop.f32.mrf.mxu1 }
 0xc98   : > { %v4257_v32 = vpack.c.bf16 %v4224_v1, %v4222_v35  ;;  %v4422_v62 = vmax.f32 %v4351_v6, 0.0  ;;  %v4067_v50 = vmul.f32 33.0, %v4035_v34 }
 0xc9a   : > { %5374 = vmatmul.msk.bf16.gmra.mxu1 %vm918_vm0, %v4257_v32  ;;  %v4152_v59 = vpop.f32.mrf.mxu0 }
 0xc9d   : > { %v4226_v14 = vpop.f32.mrf.mxu3 }
 0xc9e   : > { %v4227_v23 = vadd.f32 %v4226_v14, %v4138_v11  ;;  %v4066_v14 = vmul.f32 33.0, %v4034_v4 }
 0xc9f   : > { %v4353_v54 = vpop.f32.mrf.mxu1 }
 0xca0   : > { %v4423_v33 = vmax.f32 %v4353_v54, 0.0  ;;  %v4153_v15 = vadd.f32 %v4152_v59, %v4066_v14 }
 0xca2   : > { %v4451_v25 = vpack.c.bf16 %v4423_v33, %v4422_v62  ;;  %v4154_v32 = vpop.f32.mrf.mxu0 }
 0xca3   : > { %v4155_v54 = vadd.f32 %v4154_v32, %v4067_v50 }
 0xca4   : > { %5394 = vmatmul.msk.bf16.gmra.mxu2 %vm918_vm0, %v4451_v25 }
 0xca5   : > { %v4228_v24 = vpop.f32.mrf.mxu3 }
 0xca6   : > { %v4229_v39 = vadd.f32 %v4228_v24, %v4140_v16 }
 0xca7   : > { %v4356_v37 = vpop.f32.mrf.mxu1 }
 0xca8   : > { %v4258_v45 = vpack.c.bf16 %v4229_v39, %v4227_v23  ;;  %v4424_v18 = vmax.f32 %v4356_v37, 0.0  ;;  %v7002_v39 = vpop.f32.mrf.mxu2 }
 0xcaa   : > { %5375 = vmatmul.msk.bf16.gmra.mxu1 %vm918_vm0, %v4258_v45 }
 0xcad   : > { %v4231_v5 = vpop.f32.mrf.mxu3 }
 0xcae   : > { %v4232_v7 = vadd.f32 %v4231_v5, %v4143_v10 }
 0xcaf   : > { %v4358_v22 = vpop.f32.mrf.mxu1 }
 0xcb0   : > { %v4425_v9 = vmax.f32 %v4358_v22, 0.0 }
 0xcb2   : > { %v4452_v60 = vpack.c.bf16 %v4425_v9, %v4424_v18 }
 0xcb4   : > { %5395 = vmatmul.msk.bf16.gmra.mxu2 %vm918_vm0, %v4452_v60 }
 0xcb5   : > { %v4233_v61 = vpop.f32.mrf.mxu3 }
 0xcb6   : > { %v4234_v51 = vadd.f32 %v4233_v61, %v4145_v30 }
 0xcb7   : > { %v4361_v63 = vpop.f32.mrf.mxu1 }
 0xcb8   : > { %v4259_v0 = vpack.c.bf16 %v4234_v51, %v4232_v7  ;;  %v4426_v3 = vmax.f32 %v4361_v63, 0.0 }
 0xcba   : > { %5376 = vmatmul.msk.bf16.gmra.mxu1 %vm918_vm0, %v4259_v0 }
 0xcbd   : > { %v4236_v12 = vpop.f32.mrf.mxu3 }
 0xcbe   : > { %v4237_v28 = vadd.f32 %v4236_v12, %v4148_v21 }
 0xcbf   : > { %v4363_v8 = vpop.f32.mrf.mxu1 }
 0xcc0   : > { %v4427_v20 = vmax.f32 %v4363_v8, 0.0 }
 0xcc2   : > { %v4453_v47 = vpack.c.bf16 %v4427_v20, %v4426_v3 }
 0xcc4   : > { %5396 = vmatmul.msk.bf16.gmra.mxu2 %vm918_vm0, %v4453_v47 }
 0xcc5   : > { %v4238_v2 = vpop.f32.mrf.mxu3 }
 0xcc6   : > { %v4239_v44 = vadd.f32 %v4238_v2, %v4150_v48 }
 0xcc7   : > { %v4366_v17 = vpop.f32.mrf.mxu1 }
 0xcc8   : > { %v4260_v41 = vpack.c.bf16 %v4239_v44, %v4237_v28  ;;  %v4428_v1 = vmax.f32 %v4366_v17, 0.0 }
 0xcca   : > { %5377 = vmatmul.msk.bf16.gmra.mxu1 %vm918_vm0, %v4260_v41 }
 0xccd   : > { %v4241_v40 = vpop.f32.mrf.mxu3 }
 0xcce   : > { %v4242_v33 = vadd.f32 %v4241_v40, %v4153_v15 }
 0xccf   : > { %v4368_v35 = vpop.f32.mrf.mxu1 }
 0xcd0   : > { %v4429_v6 = vmax.f32 %v4368_v35, 0.0 }
 0xcd2   : > { %v4454_v42 = vpack.c.bf16 %v4429_v6, %v4428_v1 }
 0xcd4   : > { %5397 = vmatmul.msk.bf16.gmra.mxu2 %vm918_vm0, %v4454_v42 }
 0xcd5   : > { %v4243_v62 = vpop.f32.mrf.mxu3 }
 0xcd6   : > { %v4244_v31 = vadd.f32 %v4243_v62, %v4155_v54 }
 0xcd7   : > { %v4371_v53 = vpop.f32.mrf.mxu1 }
 0xcd8   : > { %v4261_v25 = vpack.c.bf16 %v4244_v31, %v4242_v33  ;;  %v4430_v11 = vmax.f32 %v4371_v53, 0.0 }
 0xcda   : > { %5378 = vmatmul.msk.bf16.gmra.mxu1 %vm918_vm0, %v4261_v25 }
 0xcdf   : > { %v4373_v55 = vpop.f32.mrf.mxu1 }
 0xce0   : > { %v4431_v16 = vmax.f32 %v4373_v55, 0.0 }
 0xce2   : > { %v4455_v24 = vpack.c.bf16 %v4431_v16, %v4430_v11 }
 0xce4   : > { %5398 = vmatmul.msk.bf16.gmra.mxu2 %vm918_vm0, %v4455_v24 }
 0xce7   : > { %v4376_v23 = vpop.f32.mrf.mxu1 }
 0xce8   : > { %v4432_v45 = vmax.f32 %v4376_v23, 0.0 }
 0xcef   : > { %v4378_v37 = vpop.f32.mrf.mxu1 }
 0xcf0   : > { %v4433_v56 = vmax.f32 %v4378_v37, 0.0 }
 0xcf2   : > { %v4456_v5 = vpack.c.bf16 %v4433_v56, %v4432_v45 }
 0xcf4   : > { %5399 = vmatmul.msk.bf16.gmra.mxu2 %vm918_vm0, %v4456_v5 }
 0xcf7   : > { %v4381_v38 = vpop.f32.mrf.mxu1  ;;  %v4538_v58 = vpop.f32.mrf.mxu2 }
 0xcf8   : > { %v4434_v9 = vmax.f32 %v4381_v38, 0.0  ;;  %v4618_v19 = vmax.f32 %v4538_v58, 0.0 }
 0xcff   : > { %v4383_v22 = vpop.f32.mrf.mxu1  ;;  %v4540_v18 = vpop.f32.mrf.mxu2 }
 0xd00   : > { %v4435_v49 = vmax.f32 %v4383_v22, 0.0  ;;  %v4619_v60 = vmax.f32 %v4540_v18, 0.0 }
 0xd02   : > { %v4457_v26 = vpack.c.bf16 %v4435_v49, %v4434_v9  ;;  %v7005_v10 = vpack.c.bf16 %v4619_v60, %v4618_v19 }
 0xd04   : > { %5400 = vmatmul.msk.bf16.gmra.mxu2 %vm918_vm0, %v4457_v26 }
 0xd07   : > { %v4386_v30 = vpop.f32.mrf.mxu1  ;;  %v4543_v61 = vpop.f32.mrf.mxu2 }
 0xd08   : > { %v4436_v63 = vmax.f32 %v4386_v30, 0.0  ;;  %v4620_v0 = vmax.f32 %v4543_v61, 0.0 }
 0xd0f   : > { %v4388_v7 = vpop.f32.mrf.mxu1  ;;  %v4545_v51 = vpop.f32.mrf.mxu2 }
 0xd10   : > { %v4437_v52 = vmax.f32 %v4388_v7, 0.0  ;;  %v4621_v12 = vmax.f32 %v4545_v51, 0.0 }
 0xd12   : > { %v4458_v43 = vpack.c.bf16 %v4437_v52, %v4436_v63  ;;  %v7008_v13 = vpack.c.bf16 %v4621_v12, %v4620_v0 }
 0xd14   : > { %5401 = vmatmul.msk.bf16.gmra.mxu2 %vm918_vm0, %v4458_v43 }
 0xd17   : > { %v4391_v8 = vpop.f32.mrf.mxu1  ;;  %v4548_v3 = vpop.f32.mrf.mxu2 }
 0xd18   : > { %v4438_v36 = vmax.f32 %v4391_v8, 0.0  ;;  %v4622_v47 = vmax.f32 %v4548_v3, 0.0 }
 0xd1f   : > { %v4393_v20 = vpop.f32.mrf.mxu1  ;;  %v4550_v57 = vpop.f32.mrf.mxu2 }
 0xd20   : > { %v4439_v21 = vmax.f32 %v4393_v20, 0.0  ;;  %v4623_v48 = vmax.f32 %v4550_v57, 0.0 }
 0xd22   : > { %v4459_v2 = vpack.c.bf16 %v4439_v21, %v4438_v36  ;;  %v4652_v28 = vpack.c.bf16 %v4623_v48, %v4622_v47  ;;  %v7226_v21 = vld [vmem:[#allocation27_spill] sm:$0xff] }
 0xd24   : > { %5402 = vmatmul.msk.bf16.gmra.mxu2 %vm918_vm0, %v4459_v2 }
 0xd27   : > { %v4396_v44 = vpop.f32.mrf.mxu1  ;;  %v4553_v59 = vpop.f32.mrf.mxu2 }
 0xd28   : > { %v4440_v40 = vmax.f32 %v4396_v44, 0.0  ;;  %v4624_v4 = vmax.f32 %v4553_v59, 0.0 }
 0xd2f   : > { %v4398_v17 = vpop.f32.mrf.mxu1  ;;  %v4555_v41 = vpop.f32.mrf.mxu2 }
 0xd30   : > { %v4441_v46 = vmax.f32 %v4398_v17, 0.0  ;;  %v4625_v34 = vmax.f32 %v4555_v41, 0.0 }
 0xd32   : > { %v4460_v35 = vpack.c.bf16 %v4441_v46, %v4440_v40  ;;  %v4653_v1 = vpack.c.bf16 %v4625_v34, %v4624_v4 }
 0xd34   : > { %5403 = vmatmul.msk.bf16.gmra.mxu2 %vm918_vm0, %v4460_v35 }
 0xd37   : > { %v4401_v6 = vpop.f32.mrf.mxu1  ;;  %v4558_v32 = vpop.f32.mrf.mxu2 }
 0xd38   : > { %v4442_v42 = vmax.f32 %v4401_v6, 0.0  ;;  %v4626_v63 = vmax.f32 %v4558_v32, 0.0 }
 0xd3f   : > { %v4403_v14 = vpop.f32.mrf.mxu1  ;;  %v4560_v50 = vpop.f32.mrf.mxu2 }
 0xd40   : > { %v4443_v15 = vmax.f32 %v4403_v14, 0.0  ;;  %v4627_v7 = vmax.f32 %v4560_v50, 0.0 }
 0xd42   : > { %v4461_v54 = vpack.c.bf16 %v4443_v15, %v4442_v42  ;;  %v4654_v0 = vpack.c.bf16 %v4627_v7, %v4626_v63 }
 0xd44   : > { %5404 = vmatmul.msk.bf16.gmra.mxu2 %vm918_vm0, %v4461_v54 }
 0xd47   : > { %v4406_v62 = vpop.f32.mrf.mxu1  ;;  %v4563_v33 = vpop.f32.mrf.mxu2 }
 0xd48   : > { %v4444_v25 = vmax.f32 %v4406_v62, 0.0  ;;  %v4628_v61 = vmax.f32 %v4563_v33, 0.0  ;;  %v5513_v62 = vld [vmem:[%s7067_s5 + $0x48] sm:$0xff] }
 0xd49   : > { %4721 = vmatpush.bf16.msrb.mxu2 %v5513_v62 }
 0xd4f   : > { %v4408_v31 = vpop.f32.mrf.mxu1  ;;  %v4565_v53 = vpop.f32.mrf.mxu2 }
 0xd50   : > { %v4445_v55 = vmax.f32 %v4408_v31, 0.0  ;;  %v4629_v60 = vmax.f32 %v4565_v53, 0.0 }
 0xd52   : > { %v4462_v11 = vpack.c.bf16 %v4445_v55, %v4444_v25  ;;  %v4655_v51 = vpack.c.bf16 %v4629_v60, %v4628_v61 }
 0xd54   : > { %5405 = vmatmul.msk.bf16.gmra.mxu2 %vm918_vm0, %v4462_v11 }
 0xd57   : > { %v4411_v16 = vpop.f32.mrf.mxu1  ;;  %v4568_v24 = vpop.f32.mrf.mxu2 }
 0xd58   : > { %v4446_v45 = vmax.f32 %v4411_v16, 0.0  ;;  %v4630_v49 = vmax.f32 %v4568_v24, 0.0 }
 0xd5f   : > { %v4413_v23 = vpop.f32.mrf.mxu1  ;;  %v4570_v37 = vpop.f32.mrf.mxu2 }
 0xd60   : > { %v4447_v56 = vmax.f32 %v4413_v23, 0.0  ;;  %v4631_v9 = vmax.f32 %v4570_v37, 0.0  ;;  %v5512_v23 = vld [vmem:[%s7067_s5 + $0x40] sm:$0xff]  ;;  %v5515_v37 = vld [vmem:[%s7068_s6 + $0x8] sm:$0xff] }
 0xd61   : > { %4722 = vmatpush.bf16.msrb.mxu2 %v5512_v23  ;;  %4759 = vmatpush.bf16.msra.mxu3 %v5515_v37 }
 0xd62   : > { %v4463_v5 = vpack.c.bf16 %v4447_v56, %v4446_v45  ;;  %v4656_v26 = vpack.c.bf16 %v4631_v9, %v4630_v49  ;;  %v7228_v49 = vld [vmem:[#allocation23_spill] sm:$0xff] }
 0xd64   : > { %5406 = vmatmul.msk.bf16.gmra.mxu2 %vm918_vm0, %v4463_v5 }
 0xd67   : > { %v4573_v38 = vpop.f32.mrf.mxu2 }
 0xd68   : > { %v4632_v22 = vmax.f32 %v4573_v38, 0.0 }
 0xd6f   : > { %v4575_v58 = vpop.f32.mrf.mxu2 }
 0xd70   : > { %v4633_v18 = vmax.f32 %v4575_v58, 0.0 }
 0xd72   : > { %v4657_v19 = vpack.c.bf16 %v4633_v18, %v4632_v22 }
 0xd74   : > { %4666 = vmatpush.bf16.msrb.mxu0 %v4657_v19  ;;  %v7227_v19 = vld [vmem:[#allocation26_spill] sm:$0xff] }
 0xd75   : > { %v2324_v60 = vadd.f32 %v7228_v49, %v7227_v19 }
 0xd77   : > { %v4578_v30 = vpop.f32.mrf.mxu2 }
 0xd78   : > { %4667 = vmatpush.bf16.msrb.mxu0 %v4656_v26  ;;  %v4634_v12 = vmax.f32 %v4578_v30, 0.0  ;;  %v7229_v26 = vld [vmem:[#allocation17_spill] sm:$0xff] }
 0xd79   : > { %v3164_v30 = vadd.f32 %v7229_v26, %v2324_v60 }
 0xd7b   : > { %v4003_v61 = vadd.f32 %v7002_v39, %v3164_v30 }
 0xd7c   : > { %4668 = vmatpush.bf16.msrb.mxu0 %v4655_v51 }
 0xd7f   : > { %v4580_v52 = vpop.f32.mrf.mxu2 }
 0xd80   : > { %v4635_v43 = vmax.f32 %v4580_v52, 0.0  ;;  %4669 = vmatpush.bf16.msrb.mxu0 %v4654_v0 }
 0xd82   : > { %v4658_v8 = vpack.c.bf16 %v4635_v43, %v4634_v12 }
 0xd84   : > { %4670 = vmatpush.bf16.msrb.mxu0 %v4653_v1 }
 0xd87   : > { %v4583_v3 = vpop.f32.mrf.mxu2 }
 0xd88   : > { %4671 = vmatpush.bf16.msrb.mxu0 %v4652_v28  ;;  %v4636_v57 = vmax.f32 %v4583_v3, 0.0 }
 0xd8c   : > { %4672 = vmatpush.bf16.msrb.mxu0 %v7008_v13 }
 0xd8f   : > { %v4585_v20 = vpop.f32.mrf.mxu2 }
 0xd90   : > { %v4637_v36 = vmax.f32 %v4585_v20, 0.0  ;;  %4673 = vmatpush.bf16.msrb.mxu0 %v7005_v10 }
 0xd92   : > { %v4659_v47 = vpack.c.bf16 %v4637_v36, %v4636_v57 }
 0xd93   : > { %4674 = vmatmul.bf16.vlgmr.msrb.gmra.mxu0 %v7226_v21 }
 0xd97   : > { %v4588_v48 = vpop.f32.mrf.mxu2 }
 0xd98   : > { %v4638_v44 = vmax.f32 %v4588_v48, 0.0 }
 0xd9f   : > { %v4590_v2 = vpop.f32.mrf.mxu2 }
 0xda0   : > { %v4639_v59 = vmax.f32 %v4590_v2, 0.0 }
 0xda2   : > { %v4660_v17 = vpack.c.bf16 %v4639_v59, %v4638_v44 }
 0xda7   : > { %v4593_v41 = vpop.f32.mrf.mxu2 }
 0xda8   : > { %v4640_v4 = vmax.f32 %v4593_v41, 0.0 }
 0xdaf   : > { %v4595_v40 = vpop.f32.mrf.mxu2 }
 0xdb0   : > { %v4641_v46 = vmax.f32 %v4595_v40, 0.0 }
 0xdb2   : > { %v4661_v28 = vpack.c.bf16 %v4641_v46, %v4640_v4 }
 0xdb7   : > { %v4598_v34 = vpop.f32.mrf.mxu2 }
 0xdb8   : > { %v4642_v16 = vmax.f32 %v4598_v34, 0.0 }
 0xdbf   : > { %v4600_v13 = vpop.f32.mrf.mxu2 }
 0xdc0   : > { %v4643_v55 = vmax.f32 %v4600_v13, 0.0 }
 0xdc2   : > { %v4662_v24 = vpack.c.bf16 %v4643_v55, %v4642_v16 }
 0xdc7   : > { %v4603_v35 = vpop.f32.mrf.mxu2 }
 0xdc8   : > { %v4644_v25 = vmax.f32 %v4603_v35, 0.0 }
 0xdcf   : > { %v4605_v1 = vpop.f32.mrf.mxu2 }
 0xdd0   : > { %v4645_v31 = vmax.f32 %v4605_v1, 0.0 }
 0xdd2   : > { %v4663_v11 = vpack.c.bf16 %v4645_v31, %v4644_v25 }
 0xdd7   : > { %v4608_v6 = vpop.f32.mrf.mxu2 }
 0xdd8   : > { %v4646_v33 = vmax.f32 %v4608_v6, 0.0 }
 0xddf   : > { %v4610_v32 = vpop.f32.mrf.mxu2 }
 0xde0   : > { %v4647_v15 = vmax.f32 %v4610_v32, 0.0 }
 0xde2   : > { %v4664_v53 = vpack.c.bf16 %v4647_v15, %v4646_v33 }
 0xde7   : > { %v4613_v10 = vpop.f32.mrf.mxu2 }
 0xde8   : > { %v4648_v50 = vmax.f32 %v4613_v10, 0.0 }
 0xdef   : > { %v4615_v14 = vpop.f32.mrf.mxu2 }
 0xdf0   : > { %v4649_v42 = vmax.f32 %v4615_v14, 0.0 }
 0xdf2   : > { %v4665_v54 = vpack.c.bf16 %v4649_v42, %v4648_v50 }
 0xdf4   : > { %4680 = vmatpush.bf16.msra.mxu1 %v4665_v54 }
 0xdf8   : > { %4681 = vmatpush.bf16.msra.mxu1 %v4664_v53 }
 0xdfc   : > { %4682 = vmatpush.bf16.msra.mxu1 %v4663_v11 }
 0xe00   : > { %4683 = vmatpush.bf16.msra.mxu1 %v4662_v24 }
 0xe04   : > { %4684 = vmatpush.bf16.msra.mxu1 %v4661_v28 }
 0xe08   : > { %4685 = vmatpush.bf16.msra.mxu1 %v4660_v17 }
 0xe0c   : > { %4686 = vmatpush.bf16.msra.mxu1 %v4659_v47 }
 0xe10   : > { %4687 = vmatpush.bf16.msra.mxu1 %v4658_v8  ;;  %v4675_v45 = vpop.f32.mrf.mxu0 }
 0xe13   : > { %4688 = vmatmul.bf16.vlgmr.msra.gmra.mxu1 %v6162_v29  ;;  %v5514_v29 = vld [vmem:[%s7068_s6] sm:$0xff] }
 0xe14   : > { %4760 = vmatpush.bf16.msra.mxu3 %v5514_v29 }
 0xe18   : > { %v4677_v5 = vpop.f32.mrf.mxu0 }
 0xe90   : > { %v4689_v56 = vpop.f32.mrf.mxu1 }
 0xe91   : > { %v4690_v58 = vadd.f32 %v4689_v56, %v4675_v45 }
 0xe98   : > { %v4691_v38 = vpop.f32.mrf.mxu1 }
 0xe99   : > { %v4692_v22 = vadd.f32 %v4691_v38, %v4677_v5 }
 0xe9b   : > { %v4694_v18 = vpack.c.bf16 %v4692_v22, %v4690_v58 }
 0xe9d   : > { %5419 = vmatmul.msk.bf16.vlgmr.msrb.gmra.mxu2 %vm918_vm0, %v4694_v18 }
 0xf20   : > { %v4724_v9 = vpop.f32.mrf.mxu2 }
 0xf21   : > { %v4729_v7 = vadd.f32 %v4724_v9, %v6970_v27 }
 0xf23   : > { %v4731_v0 = vmax.f32 %v4729_v7, 0.0 }
 0xf28   : > { %v4726_v51 = vpop.f32.mrf.mxu2 }
 0xf29   : > { %v4730_v63 = vadd.f32 %v4726_v51, %v4003_v61 }
 0xf2b   : > { %v4732_v52 = vmax.f32 %v4730_v63, 0.0 }
 0xf2d   : > { %v4733_v12 = vpack.c.bf16 %v4732_v52, %v4731_v0 }
 0xf2f   : > { %5428 = vmatmul.msk.bf16.vlgmr.msra.gmra.mxu3 %vm918_vm0, %v4733_v12 }
 0xfb2   : > { %v4762_v43 = vpop.f32.mrf.mxu3 }
 0xfb3   : > { %v4768_v8 = vsel %vm4767_vm1, %v4762_v43, -inf }
 0xfb4   : > { %4769 = vmax.xlane.f32.xlu0 %v4768_v8 }
 0xfba   : > { %v4764_v3 = vpop.f32.mrf.mxu3 }
 0xfbb   : > { %v4771_v20 = vsel %vm4767_vm1, %v4764_v3, -inf }
 0xfbc   : > { %4772 = vmax.xlane.f32.xlu0 %v4771_v20 }
0x1027   : > { %v4770_v57 = vpop.xlane.xlu0 %4769 }
0x1028   : > { %v4774_v39 = vsub.f32 %v4762_v43, %v4770_v57 }
0x102a   : > { %v4776_v27 = vmul.f32 1.442695, %v4774_v39 }
0x102c   : > { %5557 = vpow2.f32 %v4776_v27 }
0x102f   : > { %v4773_v36 = vpop.xlane.xlu0 %4772 }
0x1030   : > { %v4775_v47 = vsub.f32 %v4764_v3, %v4773_v36 }
0x1032   : > { %v5558_v21 = vpop.eup %5557  ;;  %v4778_v48 = vmul.f32 1.442695, %v4775_v47 }
0x1033   : > { %v4780_v2 = vsel %vm4767_vm1, %v5558_v21, 0.0 }
0x1034   : > { %5559 = vpow2.f32 %v4778_v48  ;;  %4781 = vadd.xlane.f32.xlu1 %v4780_v2 }
0x103a   : > { %v5560_v44 = vpop.eup %5559 }
0x103b   : > { %v4783_v59 = vsel %vm4767_vm1, %v5560_v44, 0.0 }
0x103c   : > { %4784 = vadd.xlane.f32.xlu1 %v4783_v59 }
0x10a7   : > { %v4782_v17 = vpop.xlane.xlu1 %4781 }
0x10a8   : > { %5561 = vlog2.f32 %v4782_v17 }
0x10ae   : > { %v5562_v41 = vpop.eup %5561 }
0x10af   : > { %v4787_v40 = vmul.f32 0.6931472, %v5562_v41  ;;  %v4785_v4 = vpop.xlane.xlu1 %4784 }
0x10b0   : > { %5563 = vlog2.f32 %v4785_v4 }
0x10b1   : > { %v4790_v46 = vadd.f32 %v4787_v40, %v4770_v57 }
0x10b3   : > { %v4792_v28 = vsub.f32 %v4762_v43, %v4790_v46 }
0x10b5   : > { %4794 = vst.msk [vmem:[%s320_s30] sm:$0xff] %vm4767_vm1, %v4792_v28 }
0x10b6   : > { %v5564_v34 = vpop.eup %5563 }
0x10b7   : > { %v4789_v13 = vmul.f32 0.6931472, %v5564_v34 }
0x10b9   : > { %v4791_v35 = vadd.f32 %v4789_v13, %v4773_v36 }
0x10bb   : > { %v4793_v1 = vsub.f32 %v4764_v3, %v4791_v35 }
0x10bd   : > { %4795 = vst.msk [vmem:[%s320_s30 + $0x8] sm:$0xff] %vm4767_vm1, %v4793_v1 }
0x10be PF: > { %p17_p7 = scmp.ge.s32.totalorder %s5695_s29, 4   ;;  %s7230_s24 = smov %s5621_s25 }
0x10bf   : > { %s7231_s25 = smov %s5625_s26  ;;  %s7232_s26 = smov %s5705_s9 }
0x10c0   : > { %s7233_s27 = smov %s5695_s29  ;;  %19 = sbr.rel (!%p17_p7) target bundleno = 3 (0x3), region = 103 }
0x10c5   :  { %4817 = vsyncpa [#allocation3], 1 }
0x10c6   :  { %4819 = vsyncpa [#allocation3 + $0x1], 1 }

</bundles_post_ra>
